<compile_context>
chip_gen: v5e
topology: v5e:2x2
jax: 0.10.0
libtpu: 0.0.40
codegen_flags: <defaults>
</compile_context>

<pallas_src>
import functools

import jax
import jax.numpy as jnp
import numpy as np
from jax.experimental import pallas as pl
from jax.experimental.pallas import tpu as pltpu


def _rcu_kernel(x_ref, w1_ref, b1_ref, w2_ref, b2_ref, o_ref, pad_ref, col_ref,
                *, H, W, C):
    # x_ref : (1, H*W, C)   one batch element, channels-last, spatial flattened
    # w*_ref: (9*C, C)      conv weights, rows ordered (dy, dx, cin)
    # b*_ref: (1, C)        bias
    # pad_ref: (H+2, W+2, C) staging buffer (input dtype) with a zero halo
    # col_ref: (H*W, 9*C)    im2col buffer (input dtype)
    dt = x_ref.dtype

    # Zero only the 1-element halo.  The interior is fully rewritten by every
    # conv, so the border stays zero across both convs of this grid step.
    pad_ref[0:1, :, :] = jnp.zeros((1, W + 2, C), dt)
    pad_ref[H + 1:H + 2, :, :] = jnp.zeros((1, W + 2, C), dt)
    pad_ref[:, 0:1, :] = jnp.zeros((H + 2, 1, C), dt)
    pad_ref[:, W + 1:W + 2, :] = jnp.zeros((H + 2, 1, C), dt)

    def conv3x3(inp_hw_c, w_ref, b_ref):
        # inp_hw_c: (H*W, C) in the input dtype.
        pad_ref[1:H + 1, 1:W + 1, :] = inp_hw_c.reshape(H, W, C)
        # Stage the 9 shifted windows into contiguous column blocks of im2col.
        for dy in range(3):
            for dx in range(3):
                k = dy * 3 + dx
                col_ref[:, k * C:(k + 1) * C] = (
                    pad_ref[dy:dy + H, dx:dx + W, :].reshape(H * W, C))
        # Single MXU matmul, K = 9*C, f32 accumulation; narrow (e.g. bf16) operands.
        acc = jnp.dot(col_ref[...], w_ref[...],
                      preferred_element_type=jnp.float32)
        return acc + b_ref[...].astype(jnp.float32)   # (H*W, C), f32

    h = jnp.maximum(x_ref[0], 0)                      # relu(x), input dtype
    y = conv3x3(h, w1_ref, b1_ref)                    # conv1 (f32 out)
    h = jnp.maximum(y, 0.0).astype(dt)                # relu, back to narrow dtype
    y = conv3x3(h, w2_ref, b2_ref)                    # conv2 (f32 out)
    # Residual: re-read x only in the epilogue (short f32 live range).
    o_ref[0] = (y + x_ref[0].astype(jnp.float32)).astype(o_ref.dtype)


def residual_conv_unit_nhwc(x_nhwc, w1_hwio, b1, w2_hwio, b2):
    """NHWC-native entry point (preferred: no activation transposes)."""
    N, H, W, C = x_nhwc.shape
    dt = x_nhwc.dtype

    x_flat = x_nhwc.reshape(N, H * W, C)              # contiguous -> free reshape
    w1_flat = w1_hwio.reshape(9 * C, C).astype(dt)    # rows ordered (dy, dx, cin)
    w2_flat = w2_hwio.reshape(9 * C, C).astype(dt)
    b1_2d = b1.reshape(1, C)
    b2_2d = b2.reshape(1, C)

    kernel = functools.partial(_rcu_kernel, H=H, W=W, C=C)

    # Explicit VMEM budget: double-buffered in/out blocks + weights/biases + scratch.
    isz = jnp.dtype(dt).itemsize
    blk = H * W * C * isz
    wts = 2 * (9 * C * C + C) * isz
    scratch = ((H + 2) * (W + 2) * C + H * W * 9 * C) * isz
    est = 2 * (2 * blk) + 2 * wts + scratch
    vmem_limit = int(min(64 * 1024 * 1024,
                         max(2 * est + (1 << 20), 16 * 1024 * 1024)))

    grid_spec = pltpu.PrefetchScalarGridSpec(
        num_scalar_prefetch=0,
        grid=(N,),
        in_specs=[
            pl.BlockSpec((1, H * W, C), lambda n: (n, 0, 0)),
            pl.BlockSpec((9 * C, C), lambda n: (0, 0)),
            pl.BlockSpec((1, C), lambda n: (0, 0)),
            pl.BlockSpec((9 * C, C), lambda n: (0, 0)),
            pl.BlockSpec((1, C), lambda n: (0, 0)),
        ],
        out_specs=pl.BlockSpec((1, H * W, C), lambda n: (n, 0, 0)),
        scratch_shapes=[
            pltpu.VMEM((H + 2, W + 2, C), dt),   # padded staging buffer
            pltpu.VMEM((H * W, 9 * C), dt),      # im2col buffer
        ],
    )

    out_flat = pl.pallas_call(
        kernel,
        out_shape=jax.ShapeDtypeStruct((N, H * W, C), dt),
        grid_spec=grid_spec,
        compiler_params=pltpu.CompilerParams(
            dimension_semantics=("parallel",),     # batch is fully independent
            vmem_limit_bytes=vmem_limit),
    )(x_flat, w1_flat, b1_2d, w2_flat, b2_2d)

    return out_flat.reshape(N, H, W, C)


def residual_conv_unit(x_nchw, w1_oihw, b1, w2_oihw, b2):
    """PyTorch-convention wrapper (NCHW activations, OIHW weights).

    The transposes here are parity-test glue; in a real NHWC pipeline call
    residual_conv_unit_nhwc directly with weights converted once at load time.
    """
    x_nhwc = jnp.transpose(x_nchw, (0, 2, 3, 1))
    w1_hwio = jnp.transpose(w1_oihw, (2, 3, 1, 0))
    w2_hwio = jnp.transpose(w2_oihw, (2, 3, 1, 0))
    out_nhwc = residual_conv_unit_nhwc(x_nhwc, w1_hwio, b1, w2_hwio, b2)
    return jnp.transpose(out_nhwc, (0, 3, 1, 2))


def _reference(x_nchw, w1_oihw, b1, w2_oihw, b2):
    def conv(x, w, b):
        y = jax.lax.conv_general_dilated(
            x, w, window_strides=(1, 1), padding=((1, 1), (1, 1)),
            dimension_numbers=("NCHW", "OIHW", "NCHW"))
        return y + b[None, :, None, None]

    h = jnp.maximum(x_nchw, 0.0)
    h = conv(h, w1_oihw, b1)
    h = jnp.maximum(h, 0.0)
    h = conv(h, w2_oihw, b2)
    return h + x_nchw


if __name__ == "__main__":
    N, C, H, W = 2, 4, 16, 16  # features = 4

    key = jax.random.PRNGKey(0)
    kx, kw1, kb1, kw2, kb2 = jax.random.split(key, 5)

    x = jax.random.normal(kx, (N, C, H, W), dtype=jnp.float32)
    # deterministic, kaiming-uniform-like init: U(-bound, bound), fan_in = C*3*3
    bound = 1.0 / np.sqrt(C * 3 * 3)
    w1 = jax.random.uniform(kw1, (C, C, 3, 3), jnp.float32, -bound, bound)
    b1 = jax.random.uniform(kb1, (C,), jnp.float32, -bound, bound)
    w2 = jax.random.uniform(kw2, (C, C, 3, 3), jnp.float32, -bound, bound)
    b2 = jax.random.uniform(kb2, (C,), jnp.float32, -bound, bound)

    out = residual_conv_unit(x, w1, b1, w2, b2)
    out = jax.block_until_ready(out)

    ref = jax.block_until_ready(_reference(x, w1, b1, w2, b2))
    np.testing.assert_allclose(np.asarray(out), np.asarray(ref),
                               rtol=1e-5, atol=1e-5)
    print("KERNEL_OK")
</pallas_src>

<mosaic_0001>
module attributes {stable_mosaic.version = 11 : i64} {
  func.func @_rcu_kernel(%arg0: i32, %arg1: memref<1x256x4xf32, #tpu.memory_space<vmem>>, %arg2: memref<36x4xf32, #tpu.memory_space<vmem>>, %arg3: memref<1x4xf32, #tpu.memory_space<vmem>>, %arg4: memref<36x4xf32, #tpu.memory_space<vmem>>, %arg5: memref<1x4xf32, #tpu.memory_space<vmem>>, %arg6: memref<1x256x4xf32, #tpu.memory_space<vmem>>, %arg7: memref<18x18x4xf32, #tpu.memory_space<vmem>>, %arg8: memref<256x36xf32, #tpu.memory_space<vmem>>) attributes {dimension_semantics = [#tpu.dimension_semantics<parallel>], iteration_bounds = array<i64: 2>, scalar_prefetch = 0 : i64, scratch_operands = 2 : i64, tpu.core_type = #tpu.core_type<tc>, window_params = [{transform_indices = @transform_0, window_bounds = array<i64: 1, 256, 4>}, {pipeline_mode = #tpu.pipeline_mode<synchronous>, transform_indices = @transform_1, window_bounds = array<i64: 36, 4>}, {pipeline_mode = #tpu.pipeline_mode<synchronous>, transform_indices = @transform_2, window_bounds = array<i64: 1, 4>}, {pipeline_mode = #tpu.pipeline_mode<synchronous>, transform_indices = @transform_3, window_bounds = array<i64: 36, 4>}, {pipeline_mode = #tpu.pipeline_mode<synchronous>, transform_indices = @transform_4, window_bounds = array<i64: 1, 4>}, {transform_indices = @transform_5, window_bounds = array<i64: 1, 256, 4>}]} {
    %cst = arith.constant 0.000000e+00 : f32
    %0 = vector.broadcast %cst : f32 to vector<1x18x4xf32>
    %c0 = arith.constant 0 : index
    %c0_0 = arith.constant 0 : index
    %c0_1 = arith.constant 0 : index
    %1 = vector.load %arg7[%c0, %c0_0, %c0_1] : memref<18x18x4xf32, #tpu.memory_space<vmem>>, vector<1x18x4xf32>
    tpu.vector_store %arg7[%c0, %c0_0, %c0_1], %0 {strides = array<i32>} : memref<18x18x4xf32, #tpu.memory_space<vmem>>, vector<1x18x4xf32>,
    %cst_2 = arith.constant 0.000000e+00 : f32
    %2 = vector.broadcast %cst_2 : f32 to vector<1x18x4xf32>
    %c17 = arith.constant 17 : index
    %c0_3 = arith.constant 0 : index
    %c0_4 = arith.constant 0 : index
    %3 = vector.load %arg7[%c17, %c0_3, %c0_4] : memref<18x18x4xf32, #tpu.memory_space<vmem>>, vector<1x18x4xf32>
    tpu.vector_store %arg7[%c17, %c0_3, %c0_4], %2 {strides = array<i32>} : memref<18x18x4xf32, #tpu.memory_space<vmem>>, vector<1x18x4xf32>,
    %cst_5 = arith.constant 0.000000e+00 : f32
    %4 = vector.broadcast %cst_5 : f32 to vector<18x1x4xf32>
    %c0_6 = arith.constant 0 : index
    %c0_7 = arith.constant 0 : index
    %c0_8 = arith.constant 0 : index
    %5 = vector.load %arg7[%c0_6, %c0_7, %c0_8] : memref<18x18x4xf32, #tpu.memory_space<vmem>>, vector<18x1x4xf32>
    tpu.vector_store %arg7[%c0_6, %c0_7, %c0_8], %4 {strides = array<i32>} : memref<18x18x4xf32, #tpu.memory_space<vmem>>, vector<18x1x4xf32>,
    %cst_9 = arith.constant 0.000000e+00 : f32
    %6 = vector.broadcast %cst_9 : f32 to vector<18x1x4xf32>
    %c0_10 = arith.constant 0 : index
    %c17_11 = arith.constant 17 : index
    %c0_12 = arith.constant 0 : index
    %7 = vector.load %arg7[%c0_10, %c17_11, %c0_12] : memref<18x18x4xf32, #tpu.memory_space<vmem>>, vector<18x1x4xf32>
    tpu.vector_store %arg7[%c0_10, %c17_11, %c0_12], %6 {strides = array<i32>} : memref<18x18x4xf32, #tpu.memory_space<vmem>>, vector<18x1x4xf32>,
    %c0_13 = arith.constant 0 : index
    %c0_14 = arith.constant 0 : index
    %c0_15 = arith.constant 0 : index
    %8 = vector.load %arg1[%c0_13, %c0_14, %c0_15] : memref<1x256x4xf32, #tpu.memory_space<vmem>>, vector<1x256x4xf32>
    %9 = vector.shape_cast %8 : vector<1x256x4xf32> to vector<256x4xf32>
    %cst_16 = arith.constant 0.000000e+00 : f32
    %10 = vector.broadcast %cst_16 : f32 to vector<256x4xf32>
    %11 = arith.maximumf %9, %10 : vector<256x4xf32>
    %12 = vector.shape_cast %11 : vector<256x4xf32> to vector<16x16x4xf32>
    %c1 = arith.constant 1 : index
    %c1_17 = arith.constant 1 : index
    %c0_18 = arith.constant 0 : index
    %13 = vector.load %arg7[%c1, %c1_17, %c0_18] : memref<18x18x4xf32, #tpu.memory_space<vmem>>, vector<16x16x4xf32>
    tpu.vector_store %arg7[%c1, %c1_17, %c0_18], %12 {strides = array<i32>} : memref<18x18x4xf32, #tpu.memory_space<vmem>>, vector<16x16x4xf32>,
    %c0_19 = arith.constant 0 : index
    %c0_20 = arith.constant 0 : index
    %c0_21 = arith.constant 0 : index
    %14 = vector.load %arg7[%c0_19, %c0_20, %c0_21] : memref<18x18x4xf32, #tpu.memory_space<vmem>>, vector<16x16x4xf32>
    %15 = vector.shape_cast %14 : vector<16x16x4xf32> to vector<256x4xf32>
    %c0_22 = arith.constant 0 : index
    %c0_23 = arith.constant 0 : index
    %16 = vector.load %arg8[%c0_22, %c0_23] : memref<256x36xf32, #tpu.memory_space<vmem>>, vector<256x4xf32>
    tpu.vector_store %arg8[%c0_22, %c0_23], %15 {strides = array<i32>} : memref<256x36xf32, #tpu.memory_space<vmem>>, vector<256x4xf32>,
    %c0_24 = arith.constant 0 : index
    %c1_25 = arith.constant 1 : index
    %c0_26 = arith.constant 0 : index
    %17 = vector.load %arg7[%c0_24, %c1_25, %c0_26] : memref<18x18x4xf32, #tpu.memory_space<vmem>>, vector<16x16x4xf32>
    %18 = vector.shape_cast %17 : vector<16x16x4xf32> to vector<256x4xf32>
    %c0_27 = arith.constant 0 : index
    %c4 = arith.constant 4 : index
    %19 = vector.load %arg8[%c0_27, %c4] : memref<256x36xf32, #tpu.memory_space<vmem>>, vector<256x4xf32>
    tpu.vector_store %arg8[%c0_27, %c4], %18 {strides = array<i32>} : memref<256x36xf32, #tpu.memory_space<vmem>>, vector<256x4xf32>,
    %c0_28 = arith.constant 0 : index
    %c2 = arith.constant 2 : index
    %c0_29 = arith.constant 0 : index
    %20 = vector.load %arg7[%c0_28, %c2, %c0_29] : memref<18x18x4xf32, #tpu.memory_space<vmem>>, vector<16x16x4xf32>
    %21 = vector.shape_cast %20 : vector<16x16x4xf32> to vector<256x4xf32>
    %c0_30 = arith.constant 0 : index
    %c8 = arith.constant 8 : index
    %22 = vector.load %arg8[%c0_30, %c8] : memref<256x36xf32, #tpu.memory_space<vmem>>, vector<256x4xf32>
    tpu.vector_store %arg8[%c0_30, %c8], %21 {strides = array<i32>} : memref<256x36xf32, #tpu.memory_space<vmem>>, vector<256x4xf32>,
    %c1_31 = arith.constant 1 : index
    %c0_32 = arith.constant 0 : index
    %c0_33 = arith.constant 0 : index
    %23 = vector.load %arg7[%c1_31, %c0_32, %c0_33] : memref<18x18x4xf32, #tpu.memory_space<vmem>>, vector<16x16x4xf32>
    %24 = vector.shape_cast %23 : vector<16x16x4xf32> to vector<256x4xf32>
    %c0_34 = arith.constant 0 : index
    %c12 = arith.constant 12 : index
    %25 = vector.load %arg8[%c0_34, %c12] : memref<256x36xf32, #tpu.memory_space<vmem>>, vector<256x4xf32>
    tpu.vector_store %arg8[%c0_34, %c12], %24 {strides = array<i32>} : memref<256x36xf32, #tpu.memory_space<vmem>>, vector<256x4xf32>,
    %c1_35 = arith.constant 1 : index
    %c1_36 = arith.constant 1 : index
    %c0_37 = arith.constant 0 : index
    %26 = vector.load %arg7[%c1_35, %c1_36, %c0_37] : memref<18x18x4xf32, #tpu.memory_space<vmem>>, vector<16x16x4xf32>
    %27 = vector.shape_cast %26 : vector<16x16x4xf32> to vector<256x4xf32>
    %c0_38 = arith.constant 0 : index
    %c16 = arith.constant 16 : index
    %28 = vector.load %arg8[%c0_38, %c16] : memref<256x36xf32, #tpu.memory_space<vmem>>, vector<256x4xf32>
    tpu.vector_store %arg8[%c0_38, %c16], %27 {strides = array<i32>} : memref<256x36xf32, #tpu.memory_space<vmem>>, vector<256x4xf32>,
    %c1_39 = arith.constant 1 : index
    %c2_40 = arith.constant 2 : index
    %c0_41 = arith.constant 0 : index
    %29 = vector.load %arg7[%c1_39, %c2_40, %c0_41] : memref<18x18x4xf32, #tpu.memory_space<vmem>>, vector<16x16x4xf32>
    %30 = vector.shape_cast %29 : vector<16x16x4xf32> to vector<256x4xf32>
    %c0_42 = arith.constant 0 : index
    %c20 = arith.constant 20 : index
    %31 = vector.load %arg8[%c0_42, %c20] : memref<256x36xf32, #tpu.memory_space<vmem>>, vector<256x4xf32>
    tpu.vector_store %arg8[%c0_42, %c20], %30 {strides = array<i32>} : memref<256x36xf32, #tpu.memory_space<vmem>>, vector<256x4xf32>,
    %c2_43 = arith.constant 2 : index
    %c0_44 = arith.constant 0 : index
    %c0_45 = arith.constant 0 : index
    %32 = vector.load %arg7[%c2_43, %c0_44, %c0_45] : memref<18x18x4xf32, #tpu.memory_space<vmem>>, vector<16x16x4xf32>
    %33 = vector.shape_cast %32 : vector<16x16x4xf32> to vector<256x4xf32>
    %c0_46 = arith.constant 0 : index
    %c24 = arith.constant 24 : index
    %34 = vector.load %arg8[%c0_46, %c24] : memref<256x36xf32, #tpu.memory_space<vmem>>, vector<256x4xf32>
    tpu.vector_store %arg8[%c0_46, %c24], %33 {strides = array<i32>} : memref<256x36xf32, #tpu.memory_space<vmem>>, vector<256x4xf32>,
    %c2_47 = arith.constant 2 : index
    %c1_48 = arith.constant 1 : index
    %c0_49 = arith.constant 0 : index
    %35 = vector.load %arg7[%c2_47, %c1_48, %c0_49] : memref<18x18x4xf32, #tpu.memory_space<vmem>>, vector<16x16x4xf32>
    %36 = vector.shape_cast %35 : vector<16x16x4xf32> to vector<256x4xf32>
    %c0_50 = arith.constant 0 : index
    %c28 = arith.constant 28 : index
    %37 = vector.load %arg8[%c0_50, %c28] : memref<256x36xf32, #tpu.memory_space<vmem>>, vector<256x4xf32>
    tpu.vector_store %arg8[%c0_50, %c28], %36 {strides = array<i32>} : memref<256x36xf32, #tpu.memory_space<vmem>>, vector<256x4xf32>,
    %c2_51 = arith.constant 2 : index
    %c2_52 = arith.constant 2 : index
    %c0_53 = arith.constant 0 : index
    %38 = vector.load %arg7[%c2_51, %c2_52, %c0_53] : memref<18x18x4xf32, #tpu.memory_space<vmem>>, vector<16x16x4xf32>
    %39 = vector.shape_cast %38 : vector<16x16x4xf32> to vector<256x4xf32>
    %c0_54 = arith.constant 0 : index
    %c32 = arith.constant 32 : index
    %40 = vector.load %arg8[%c0_54, %c32] : memref<256x36xf32, #tpu.memory_space<vmem>>, vector<256x4xf32>
    tpu.vector_store %arg8[%c0_54, %c32], %39 {strides = array<i32>} : memref<256x36xf32, #tpu.memory_space<vmem>>, vector<256x4xf32>,
    %c0_55 = arith.constant 0 : index
    %c0_56 = arith.constant 0 : index
    %41 = vector.load %arg8[%c0_55, %c0_56] : memref<256x36xf32, #tpu.memory_space<vmem>>, vector<256x36xf32>
    %c0_57 = arith.constant 0 : index
    %c0_58 = arith.constant 0 : index
    %42 = vector.load %arg2[%c0_57, %c0_58] : memref<36x4xf32, #tpu.memory_space<vmem>>, vector<36x4xf32>
    %cst_59 = arith.constant dense<0.000000e+00> : vector<256x4xf32>
    %43 = tpu.matmul %41, %42, %cst_59 {dimension_numbers = #tpu.dot_dimension_numbers<[1], [0], [0], [1], [0, 0, 1, 1], [], []>} : vector<256x36xf32>, vector<36x4xf32>, vector<256x4xf32> -> vector<256x4xf32>
    %c0_60 = arith.constant 0 : index
    %c0_61 = arith.constant 0 : index
    %44 = vector.load %arg3[%c0_60, %c0_61] : memref<1x4xf32, #tpu.memory_space<vmem>>, vector<1x4xf32>
    %45 = vector.broadcast %44 : vector<1x4xf32> to vector<256x4xf32>
    %46 = arith.addf %43, %45 : vector<256x4xf32>
    %cst_62 = arith.constant 0.000000e+00 : f32
    %47 = vector.broadcast %cst_62 : f32 to vector<256x4xf32>
    %48 = arith.maximumf %46, %47 : vector<256x4xf32>
    %49 = vector.shape_cast %48 : vector<256x4xf32> to vector<16x16x4xf32>
    %c1_63 = arith.constant 1 : index
    %c1_64 = arith.constant 1 : index
    %c0_65 = arith.constant 0 : index
    %50 = vector.load %arg7[%c1_63, %c1_64, %c0_65] : memref<18x18x4xf32, #tpu.memory_space<vmem>>, vector<16x16x4xf32>
    tpu.vector_store %arg7[%c1_63, %c1_64, %c0_65], %49 {strides = array<i32>} : memref<18x18x4xf32, #tpu.memory_space<vmem>>, vector<16x16x4xf32>,
    %c0_66 = arith.constant 0 : index
    %c0_67 = arith.constant 0 : index
    %c0_68 = arith.constant 0 : index
    %51 = vector.load %arg7[%c0_66, %c0_67, %c0_68] : memref<18x18x4xf32, #tpu.memory_space<vmem>>, vector<16x16x4xf32>
    %52 = vector.shape_cast %51 : vector<16x16x4xf32> to vector<256x4xf32>
    %c0_69 = arith.constant 0 : index
    %c0_70 = arith.constant 0 : index
    %53 = vector.load %arg8[%c0_69, %c0_70] : memref<256x36xf32, #tpu.memory_space<vmem>>, vector<256x4xf32>
    tpu.vector_store %arg8[%c0_69, %c0_70], %52 {strides = array<i32>} : memref<256x36xf32, #tpu.memory_space<vmem>>, vector<256x4xf32>,
    %c0_71 = arith.constant 0 : index
    %c1_72 = arith.constant 1 : index
    %c0_73 = arith.constant 0 : index
    %54 = vector.load %arg7[%c0_71, %c1_72, %c0_73] : memref<18x18x4xf32, #tpu.memory_space<vmem>>, vector<16x16x4xf32>
    %55 = vector.shape_cast %54 : vector<16x16x4xf32> to vector<256x4xf32>
    %c0_74 = arith.constant 0 : index
    %c4_75 = arith.constant 4 : index
    %56 = vector.load %arg8[%c0_74, %c4_75] : memref<256x36xf32, #tpu.memory_space<vmem>>, vector<256x4xf32>
    tpu.vector_store %arg8[%c0_74, %c4_75], %55 {strides = array<i32>} : memref<256x36xf32, #tpu.memory_space<vmem>>, vector<256x4xf32>,
    %c0_76 = arith.constant 0 : index
    %c2_77 = arith.constant 2 : index
    %c0_78 = arith.constant 0 : index
    %57 = vector.load %arg7[%c0_76, %c2_77, %c0_78] : memref<18x18x4xf32, #tpu.memory_space<vmem>>, vector<16x16x4xf32>
    %58 = vector.shape_cast %57 : vector<16x16x4xf32> to vector<256x4xf32>
    %c0_79 = arith.constant 0 : index
    %c8_80 = arith.constant 8 : index
    %59 = vector.load %arg8[%c0_79, %c8_80] : memref<256x36xf32, #tpu.memory_space<vmem>>, vector<256x4xf32>
    tpu.vector_store %arg8[%c0_79, %c8_80], %58 {strides = array<i32>} : memref<256x36xf32, #tpu.memory_space<vmem>>, vector<256x4xf32>,
    %c1_81 = arith.constant 1 : index
    %c0_82 = arith.constant 0 : index
    %c0_83 = arith.constant 0 : index
    %60 = vector.load %arg7[%c1_81, %c0_82, %c0_83] : memref<18x18x4xf32, #tpu.memory_space<vmem>>, vector<16x16x4xf32>
    %61 = vector.shape_cast %60 : vector<16x16x4xf32> to vector<256x4xf32>
    %c0_84 = arith.constant 0 : index
    %c12_85 = arith.constant 12 : index
    %62 = vector.load %arg8[%c0_84, %c12_85] : memref<256x36xf32, #tpu.memory_space<vmem>>, vector<256x4xf32>
    tpu.vector_store %arg8[%c0_84, %c12_85], %61 {strides = array<i32>} : memref<256x36xf32, #tpu.memory_space<vmem>>, vector<256x4xf32>,
    %c1_86 = arith.constant 1 : index
    %c1_87 = arith.constant 1 : index
    %c0_88 = arith.constant 0 : index
    %63 = vector.load %arg7[%c1_86, %c1_87, %c0_88] : memref<18x18x4xf32, #tpu.memory_space<vmem>>, vector<16x16x4xf32>
    %64 = vector.shape_cast %63 : vector<16x16x4xf32> to vector<256x4xf32>
    %c0_89 = arith.constant 0 : index
    %c16_90 = arith.constant 16 : index
    %65 = vector.load %arg8[%c0_89, %c16_90] : memref<256x36xf32, #tpu.memory_space<vmem>>, vector<256x4xf32>
    tpu.vector_store %arg8[%c0_89, %c16_90], %64 {strides = array<i32>} : memref<256x36xf32, #tpu.memory_space<vmem>>, vector<256x4xf32>,
    %c1_91 = arith.constant 1 : index
    %c2_92 = arith.constant 2 : index
    %c0_93 = arith.constant 0 : index
    %66 = vector.load %arg7[%c1_91, %c2_92, %c0_93] : memref<18x18x4xf32, #tpu.memory_space<vmem>>, vector<16x16x4xf32>
    %67 = vector.shape_cast %66 : vector<16x16x4xf32> to vector<256x4xf32>
    %c0_94 = arith.constant 0 : index
    %c20_95 = arith.constant 20 : index
    %68 = vector.load %arg8[%c0_94, %c20_95] : memref<256x36xf32, #tpu.memory_space<vmem>>, vector<256x4xf32>
    tpu.vector_store %arg8[%c0_94, %c20_95], %67 {strides = array<i32>} : memref<256x36xf32, #tpu.memory_space<vmem>>, vector<256x4xf32>,
    %c2_96 = arith.constant 2 : index
    %c0_97 = arith.constant 0 : index
    %c0_98 = arith.constant 0 : index
    %69 = vector.load %arg7[%c2_96, %c0_97, %c0_98] : memref<18x18x4xf32, #tpu.memory_space<vmem>>, vector<16x16x4xf32>
    %70 = vector.shape_cast %69 : vector<16x16x4xf32> to vector<256x4xf32>
    %c0_99 = arith.constant 0 : index
    %c24_100 = arith.constant 24 : index
    %71 = vector.load %arg8[%c0_99, %c24_100] : memref<256x36xf32, #tpu.memory_space<vmem>>, vector<256x4xf32>
    tpu.vector_store %arg8[%c0_99, %c24_100], %70 {strides = array<i32>} : memref<256x36xf32, #tpu.memory_space<vmem>>, vector<256x4xf32>,
    %c2_101 = arith.constant 2 : index
    %c1_102 = arith.constant 1 : index
    %c0_103 = arith.constant 0 : index
    %72 = vector.load %arg7[%c2_101, %c1_102, %c0_103] : memref<18x18x4xf32, #tpu.memory_space<vmem>>, vector<16x16x4xf32>
    %73 = vector.shape_cast %72 : vector<16x16x4xf32> to vector<256x4xf32>
    %c0_104 = arith.constant 0 : index
    %c28_105 = arith.constant 28 : index
    %74 = vector.load %arg8[%c0_104, %c28_105] : memref<256x36xf32, #tpu.memory_space<vmem>>, vector<256x4xf32>
    tpu.vector_store %arg8[%c0_104, %c28_105], %73 {strides = array<i32>} : memref<256x36xf32, #tpu.memory_space<vmem>>, vector<256x4xf32>,
    %c2_106 = arith.constant 2 : index
    %c2_107 = arith.constant 2 : index
    %c0_108 = arith.constant 0 : index
    %75 = vector.load %arg7[%c2_106, %c2_107, %c0_108] : memref<18x18x4xf32, #tpu.memory_space<vmem>>, vector<16x16x4xf32>
    %76 = vector.shape_cast %75 : vector<16x16x4xf32> to vector<256x4xf32>
    %c0_109 = arith.constant 0 : index
    %c32_110 = arith.constant 32 : index
    %77 = vector.load %arg8[%c0_109, %c32_110] : memref<256x36xf32, #tpu.memory_space<vmem>>, vector<256x4xf32>
    tpu.vector_store %arg8[%c0_109, %c32_110], %76 {strides = array<i32>} : memref<256x36xf32, #tpu.memory_space<vmem>>, vector<256x4xf32>,
    %c0_111 = arith.constant 0 : index
    %c0_112 = arith.constant 0 : index
    %78 = vector.load %arg8[%c0_111, %c0_112] : memref<256x36xf32, #tpu.memory_space<vmem>>, vector<256x36xf32>
    %c0_113 = arith.constant 0 : index
    %c0_114 = arith.constant 0 : index
    %79 = vector.load %arg4[%c0_113, %c0_114] : memref<36x4xf32, #tpu.memory_space<vmem>>, vector<36x4xf32>
    %cst_115 = arith.constant dense<0.000000e+00> : vector<256x4xf32>
    %80 = tpu.matmul %78, %79, %cst_115 {dimension_numbers = #tpu.dot_dimension_numbers<[1], [0], [0], [1], [0, 0, 1, 1], [], []>} : vector<256x36xf32>, vector<36x4xf32>, vector<256x4xf32> -> vector<256x4xf32>
    %c0_116 = arith.constant 0 : index
    %c0_117 = arith.constant 0 : index
    %81 = vector.load %arg5[%c0_116, %c0_117] : memref<1x4xf32, #tpu.memory_space<vmem>>, vector<1x4xf32>
    %82 = vector.broadcast %81 : vector<1x4xf32> to vector<256x4xf32>
    %83 = arith.addf %80, %82 : vector<256x4xf32>
    %c0_118 = arith.constant 0 : index
    %c0_119 = arith.constant 0 : index
    %c0_120 = arith.constant 0 : index
    %84 = vector.load %arg1[%c0_118, %c0_119, %c0_120] : memref<1x256x4xf32, #tpu.memory_space<vmem>>, vector<1x256x4xf32>
    %85 = vector.shape_cast %84 : vector<1x256x4xf32> to vector<256x4xf32>
    %86 = arith.addf %83, %85 : vector<256x4xf32>
    %c0_121 = arith.constant 0 : index
    %c0_122 = arith.constant 0 : index
    %c0_123 = arith.constant 0 : index
    %87 = vector.load %arg6[%c0_121, %c0_122, %c0_123] : memref<1x256x4xf32, #tpu.memory_space<vmem>>, vector<1x256x4xf32>
    %88 = vector.shape_cast %87 : vector<1x256x4xf32> to vector<256x4xf32>
    %89 = vector.shape_cast %86 : vector<256x4xf32> to vector<1x256x4xf32>
    tpu.vector_store %arg6[%c0_121, %c0_122, %c0_123], %89 {strides = array<i32>} : memref<1x256x4xf32, #tpu.memory_space<vmem>>, vector<1x256x4xf32>,
    return
  }
  func.func @transform_0(%arg0: i32) -> (i32, i32, i32) {
    %c0_i32 = arith.constant 0 : i32
    %c0_i32_0 = arith.constant 0 : i32
    %c0_i32_1 = arith.constant 0 : i32
    return %arg0, %c0_i32, %c0_i32_0 : i32, i32, i32
  }
  func.func @transform_1(%arg0: i32) -> (i32, i32) {
    %c0_i32 = arith.constant 0 : i32
    %c0_i32_0 = arith.constant 0 : i32
    %c0_i32_1 = arith.constant 0 : i32
    return %c0_i32, %c0_i32_0 : i32, i32
  }
  func.func @transform_2(%arg0: i32) -> (i32, i32) {
    %c0_i32 = arith.constant 0 : i32
    %c0_i32_0 = arith.constant 0 : i32
    %c0_i32_1 = arith.constant 0 : i32
    return %c0_i32, %c0_i32_0 : i32, i32
  }
  func.func @transform_3(%arg0: i32) -> (i32, i32) {
    %c0_i32 = arith.constant 0 : i32
    %c0_i32_0 = arith.constant 0 : i32
    %c0_i32_1 = arith.constant 0 : i32
    return %c0_i32, %c0_i32_0 : i32, i32
  }
  func.func @transform_4(%arg0: i32) -> (i32, i32) {
    %c0_i32 = arith.constant 0 : i32
    %c0_i32_0 = arith.constant 0 : i32
    %c0_i32_1 = arith.constant 0 : i32
    return %c0_i32, %c0_i32_0 : i32, i32
  }
  func.func @transform_5(%arg0: i32) -> (i32, i32, i32) {
    %c0_i32 = arith.constant 0 : i32
    %c0_i32_0 = arith.constant 0 : i32
    %c0_i32_1 = arith.constant 0 : i32
    return %arg0, %c0_i32, %c0_i32_0 : i32, i32, i32
  }
}

</mosaic_0001>

<bundles_post_ra>
// kernel: tpu_custom_call.1
= control target key start
LH: loop header
LB: loop body
LE: loop exit
PB: predicated region body
PF: predicated region fallthrough
CT: control target
= control target key end

     0   :  { %s4455_s18 = smov 0   ;;  %s6785_s0 = inlined_call_operand.vmem [shape: f32[2,256,4], index: 0, kind: input, shape index: {}]   ;;  %s6786_s1 = inlined_call_operand.vmem [shape: f32[36,4], index: 1, kind: input, shape index: {}]   ;;  %s6787_s2 = inlined_call_operand.vmem [shape: f32[1,4], index: 2, kind: input, shape index: {}]   ;;  %s6788_s3 = inlined_call_operand.vmem [shape: f32[36,4], index: 3, kind: input, shape index: {}]   ;;  %s6789_s4 = inlined_call_operand.vmem [shape: f32[1,4], index: 4, kind: input, shape index: {}]   ;;  %s6790_s5 = inlined_call_operand.vmem [shape: f32[2,256,4], index: 5, kind: output, shape index: {}]  }
   0x1 LB: > { %s4300_s19 = sadd.s32 4294967295, %s4414_s18   ;;  %p4304_p0 = scmp.ge.s32.totalorder %s4414_s18, 1  ;;  %s4414_s18 = sphi %s4455_s18, %s15_s18  }
   0x2   : > { %p187_p1 = scmp.lt.s32.totalorder %s4414_s18, 3 }
   0x4   : > { %p188_p2 = pnand %p4304_p0, %p187_p1 }
   0x6   : > { %191 = sbr.rel (%p188_p2) target bundleno = 1881 (0x759), region = 40 }
   0xb   : > { %vm225_vm0 = vcmask 31744   ;;  %p215_p3 = scmp.lt.s32.totalorder %s4300_s19, 1  ;;  %v4416_v0 = vmov 0.0   ;;  %vm228_vm1 = vcmask 25600   ;;  %s4417_s24 = smov 4   ;;  %vm234_vm2 = vcmask 24576  }
   0xc   : > { %226 = vst.msk [vmem:[#allocation2] sm:$0xff] %vm225_vm0, %v4416_v0  ;;  %s4418_s25 = smov 8   ;;  %vm592_vm3 = vcmask 64544   ;;  %s4419_s26 = smov 12   ;;  %vm785_vm4 = vcmask 97344   ;;  %vm978_vm5 = vcmask 130144  }
   0xd   : > { %227 = vst.msk [vmem:[#allocation2 + $0x8] sm:$0xff] %vm225_vm0, %v4416_v0  ;;  %s6982_s19 = smov (!%p215_p3, %s4300_s19), 1  ;;  %s4420_s27 = smov 16   ;;  %vm1171_vm6 = vcmask 162944   ;;  %vm1364_vm7 = vcmask 195744   ;;  %vm1558_vm8 = vcmask 228544  }
   0xe   : > { %231 = vst.msk [vmem:[#allocation2 + $0x198] sm:$0xff] %vm225_vm0, %v4416_v0  ;;  %s4377_s20 = sshll.u32 %s6982_s19, 8  ;;  %s4421_s28 = smov 20   ;;  %vm1751_vm9 = vcmask 261344   ;;  %vm2115_vm10 = vcmask 1043456   ;;  %vm1944_vm11 = vcmask 294144  }
   0xf   : > { %232 = vst.msk [vmem:[#allocation2 + $0x1a0] sm:$0xff] %vm225_vm0, %v4416_v0  ;;  %s4480_s23 = scalar_lea.vmem %s6785_s0, %s4377_s20  ;;  %s4422_s29 = smov 24   ;;  %vm2018_vm12 = vcmask 293888  }
  0x10   : > { %229 = vst.msk [vmem:[#allocation2 + $0x10] sm:$0x3] %vm228_vm1, %v4416_v0  ;;  %v271_v1 = vld [vmem:[%s4480_s23] sm:$0xff]  ;;  %v272_v3 = vld [vmem:[%s4480_s23 + $0x8] sm:$0xff]  ;;  %v278_v7 = vld [vmem:[%s4480_s23 + $0x38] sm:$0xff]  ;;  %s4423_s30 = smov 28   ;;  %s6592_s15 = scalar_lea.vmem %s6790_s5, %s4377_s20 }
  0x11   : > { %233 = vst.msk [vmem:[#allocation2 + $0x1a8] sm:$0x3] %vm228_vm1, %v4416_v0  ;;  %v275_v2 = vld [vmem:[%s4480_s23 + $0x20] sm:$0xff]  ;;  %v303_v4 = vmax.f32 %v271_v1, 0.0  ;;  %v304_v6 = vmax.f32 %v272_v3, 0.0  ;;  %v273_v8 = vld [vmem:[%s4480_s23 + $0x10] sm:$0xff] }
  0x12   : > { %v307_v5 = vmax.f32 %v275_v2, 0.0  ;;  %v276_v9 = vld [vmem:[%s4480_s23 + $0x28] sm:$0xff]  ;;  %v310_v10 = vmax.f32 %v278_v7, 0.0  ;;  %v281_v11 = vld [vmem:[%s4480_s23 + $0x50] sm:$0xff]  ;;  %v305_v13 = vmax.f32 %v273_v8, 0.0  ;;  %v274_v14 = vld [vmem:[%s4480_s23 + $0x18] sm:$0xff] }
  0x13   : > { %336 = vst.msk [vmem:[#allocation2 + $0x19] sm:$0xff] %vm225_vm0, %v303_v4  ;;  %v308_v15 = vmax.f32 %v276_v9, 0.0  ;;  %v279_v16 = vld [vmem:[%s4480_s23 + $0x40] sm:$0xff]  ;;  %v313_v17 = vmax.f32 %v281_v11, 0.0  ;;  %v284_v18 = vld [vmem:[%s4480_s23 + $0x68] sm:$0xff]  ;;  %v306_v19 = vmax.f32 %v274_v14, 0.0 }
  0x14   : > { %v432_v12 = vld [vmem:[#allocation2 + $0x1] sm:$0xff]  ;;  %340 = vst.msk [vmem:[#allocation2 + $0x49] sm:$0xff] %vm225_vm0, %v307_v5  ;;  %v277_v20 = vld [vmem:[%s4480_s23 + $0x30] sm:$0xff]  ;;  %v311_v21 = vmax.f32 %v279_v16, 0.0  ;;  %v282_v22 = vld [vmem:[%s4480_s23 + $0x58] sm:$0xff]  ;;  %v316_v23 = vmax.f32 %v284_v18, 0.0 }
  0x15   : > { %496 = vrot.lane.b32.xlu0 %v432_v12, %s4417_s24  ;;  %337 = vst.msk [vmem:[#allocation2 + $0x21] sm:$0xff] %vm225_vm0, %v304_v6  ;;  %v309_v25 = vmax.f32 %v277_v20, 0.0  ;;  %v287_v26 = vld [vmem:[%s4480_s23 + $0x80] sm:$0xff]  ;;  %v280_v27 = vld [vmem:[%s4480_s23 + $0x48] sm:$0xff]  ;;  %v314_v29 = vmax.f32 %v282_v22, 0.0  ;;  %v285_v30 = vld [vmem:[%s4480_s23 + $0x70] sm:$0xff] }
  0x16   : > { %343 = vst.msk [vmem:[#allocation2 + $0x69] sm:$0xff] %vm225_vm0, %v310_v10  ;;  %v319_v31 = vmax.f32 %v287_v26, 0.0  ;;  %v312_v32 = vmax.f32 %v280_v27, 0.0  ;;  %v317_v33 = vmax.f32 %v285_v30, 0.0  ;;  %v290_v37 = vld [vmem:[%s4480_s23 + $0x98] sm:$0xff]  ;;  %v283_v38 = vld [vmem:[%s4480_s23 + $0x60] sm:$0xff] }
  0x17   : > { %338 = vst.msk [vmem:[#allocation2 + $0x31] sm:$0xff] %vm225_vm0, %v305_v13  ;;  %v433_v24 = vld [vmem:[#allocation2 + $0x9] sm:$0xff]  ;;  %v322_v39 = vmax.f32 %v290_v37, 0.0  ;;  %v315_v40 = vmax.f32 %v283_v38, 0.0  ;;  %v286_v47 = vld [vmem:[%s4480_s23 + $0x78] sm:$0xff]  ;;  %v291_v48 = vld [vmem:[%s4480_s23 + $0xa0] sm:$0xff] }
  0x18   : > { %341 = vst.msk [vmem:[#allocation2 + $0x51] sm:$0xff] %vm225_vm0, %v308_v15  ;;  %v288_v41 = vld [vmem:[%s4480_s23 + $0x88] sm:$0xff]  ;;  %v293_v46 = vld [vmem:[%s4480_s23 + $0xb0] sm:$0xff]  ;;  %v318_v50 = vmax.f32 %v286_v47, 0.0  ;;  %v323_v51 = vmax.f32 %v291_v48, 0.0  ;;  %v294_v57 = vld [vmem:[%s4480_s23 + $0xb8] sm:$0xff] }
  0x19   : > { %346 = vst.msk [vmem:[#allocation2 + $0x91] sm:$0xff] %vm225_vm0, %v313_v17  ;;  %v320_v42 = vmax.f32 %v288_v41, 0.0  ;;  %v325_v49 = vmax.f32 %v293_v46, 0.0  ;;  %v296_v55 = vld [vmem:[%s4480_s23 + $0xc8] sm:$0xff]  ;;  %v289_v56 = vld [vmem:[%s4480_s23 + $0x90] sm:$0xff]  ;;  %v326_v60 = vmax.f32 %v294_v57, 0.0 }
  0x1a   : > { %v4505_v28 = vld [vmem:[#allocation2 + $0x19] sm:$0xff]  ;;  %339 = vst.msk [vmem:[#allocation2 + $0x39] sm:$0xff] %vm225_vm0, %v306_v19  ;;  %v328_v58 = vmax.f32 %v296_v55, 0.0  ;;  %v321_v59 = vmax.f32 %v289_v56, 0.0  ;;  %v292_v2 = vld [vmem:[%s4480_s23 + $0xa8] sm:$0xff]  ;;  %v297_v3 = vld [vmem:[%s4480_s23 + $0xd0] sm:$0xff] }
  0x1b   : > { %500 = vrot.lane.b32.xlu1 %v4505_v28, %s4417_s24  ;;  %344 = vst.msk [vmem:[#allocation2 + $0x79] sm:$0xff] %vm225_vm0, %v311_v21  ;;  %v4524_v36 = vld [vmem:[#allocation2 + $0x49] sm:$0xff]  ;;  %v299_v1 = vld [vmem:[%s4480_s23 + $0xe0] sm:$0xff]  ;;  %v324_v5 = vmax.f32 %v292_v2, 0.0  ;;  %v329_v6 = vmax.f32 %v297_v3, 0.0  ;;  %s4424_s6 = smov 32  }
  0x1c   : > { %349 = vst.msk [vmem:[#allocation2 + $0xb1] sm:$0xff] %vm225_vm0, %v316_v23  ;;  %v4521_v35 = vld [vmem:[#allocation2 + $0x21] sm:$0xff]  ;;  %v331_v4 = vmax.f32 %v299_v1, 0.0  ;;  %v298_v23 = vld [vmem:[%s4480_s23 + $0xd8] sm:$0xff] }
  0x1d   : > { %498 = vrot.lane.b32.xlu0 %v433_v24, %s4417_s24  ;;  %342 = vst.msk [vmem:[#allocation2 + $0x61] sm:$0xff] %vm225_vm0, %v309_v25  ;;  %v4541_v44 = vld [vmem:[#allocation2 + $0x69] sm:$0xff]  ;;  %v295_v21 = vld [vmem:[%s4480_s23 + $0xc0] sm:$0xff]  ;;  %v330_v26 = vmax.f32 %v298_v23, 0.0 }
  0x1e   : > { %v4515_v34 = vld [vmem:[#allocation2 + $0x31] sm:$0xff]  ;;  %347 = vst.msk [vmem:[#allocation2 + $0x99] sm:$0xff] %vm225_vm0, %v314_v29  ;;  %v300_v22 = vld [vmem:[%s4480_s23 + $0xe8] sm:$0xff]  ;;  %v327_v24 = vmax.f32 %v295_v21, 0.0  ;;  %v4767_v48 = vld [vmem:[#allocation2 + $0x20] sm:$0xff] }
  0x1f   : > { %504 = vrot.lane.b32.xlu2 %v4515_v34, %s4417_s24  ;;  %352 = vst.msk [vmem:[#allocation2 + $0xd9] sm:$0xff] %vm225_vm0, %v319_v31  ;;  %v4543_v45 = vld [vmem:[#allocation2 + $0x51] sm:$0xff]  ;;  %v332_v25 = vmax.f32 %v300_v22, 0.0 }
  0x20   : > { %345 = vst.msk [vmem:[#allocation2 + $0x81] sm:$0xff] %vm225_vm0, %v312_v32  ;;  %v4559_v53 = vld [vmem:[#allocation2 + $0x91] sm:$0xff] }
  0x21   : > { %350 = vst.msk [vmem:[#allocation2 + $0xc1] sm:$0xff] %vm225_vm0, %v317_v33  ;;  %v4534_v43 = vld [vmem:[#allocation2 + $0x39] sm:$0xff]  ;;  %v369_v33 = vld [vmem:[#allocation2 + $0x8] sm:$0xff] }
  0x22   : > { %355 = vst.msk [vmem:[#allocation2 + $0xf9] sm:$0xff] %vm225_vm0, %v322_v39  ;;  %v4561_v54 = vld [vmem:[#allocation2 + $0x79] sm:$0xff]  ;;  %v4823_v21 = vld [vmem:[#allocation2 + $0x4a] sm:$0xff] }
  0x23   : > { %502 = vrot.lane.b32.xlu1 %v4521_v35, %s4417_s24  ;;  %348 = vst.msk [vmem:[#allocation2 + $0xa9] sm:$0xff] %vm225_vm0, %v315_v40  ;;  %v4577_v62 = vld [vmem:[#allocation2 + $0xb1] sm:$0xff]  ;;  %v4754_v40 = vld [vmem:[#allocation2 + $0x1a] sm:$0xff] }
  0x24   : > { %353 = vst.msk [vmem:[#allocation2 + $0xe1] sm:$0xff] %vm225_vm0, %v320_v42  ;;  %v4552_v52 = vld [vmem:[#allocation2 + $0x61] sm:$0xff]  ;;  %v4739_v32 = vld [vmem:[#allocation2 + $0x32] sm:$0xff] }
  0x25   : > { %508 = vrot.lane.b32.xlu0 %v4524_v36, %s4417_s24  ;;  %358 = vst.msk [vmem:[#allocation2 + $0x121] sm:$0xff] %vm225_vm0, %v325_v49  ;;  %v4579_v63 = vld [vmem:[#allocation2 + $0x99] sm:$0xff]  ;;  %v625_v49 = vld [vmem:[#allocation2 + $0x2] sm:$0xff] }
  0x26   : > { %351 = vst.msk [vmem:[#allocation2 + $0xc9] sm:$0xff] %vm225_vm0, %v318_v50  ;;  %v4597_v9 = vld [vmem:[#allocation2 + $0xd9] sm:$0xff]  ;;  %v4784_v56 = vld [vmem:[#allocation2 + $0x68] sm:$0xff] }
  0x27   : > { %506 = vrot.lane.b32.xlu2 %v4534_v43, %s4417_s24  ;;  %356 = vst.msk [vmem:[#allocation2 + $0x109] sm:$0xff] %vm225_vm0, %v323_v51  ;;  %v4570_v61 = vld [vmem:[#allocation2 + $0x81] sm:$0xff]  ;;  %v4741_v37 = vld [vmem:[#allocation2 + $0x38] sm:$0xff] }
  0x28   : > { %361 = vst.msk [vmem:[#allocation2 + $0x141] sm:$0xff] %vm225_vm0, %v328_v58  ;;  %v4595_v8 = vld [vmem:[#allocation2 + $0xc1] sm:$0xff]  ;;  %v4789_v58 = vld [vmem:[#allocation2 + $0x50] sm:$0xff] }
  0x29   : > { %354 = vst.msk [vmem:[#allocation2 + $0xf1] sm:$0xff] %vm225_vm0, %v321_v59  ;;  %v4619_v12 = vld [vmem:[#allocation2 + $0xf9] sm:$0xff] }
  0x2a   : > { %359 = vst.msk [vmem:[#allocation2 + $0x129] sm:$0xff] %vm225_vm0, %v326_v60  ;;  %v4588_v7 = vld [vmem:[#allocation2 + $0xa9] sm:$0xff]  ;;  %v4782_v51 = vld [vmem:[#allocation2 + $0x7a] sm:$0xff] }
  0x2b   : > { %510 = vrot.lane.b32.xlu1 %v4543_v45, %s4417_s24  ;;  %364 = vst.msk [vmem:[#allocation2 + $0x169] sm:$0xff] %vm225_vm0, %v331_v4  ;;  %v4615_v11 = vld [vmem:[#allocation2 + $0xe1] sm:$0xff] }
  0x2c   : > { %357 = vst.msk [vmem:[#allocation2 + $0x111] sm:$0xff] %vm225_vm0, %v324_v5  ;;  %v4647_v15 = vld [vmem:[#allocation2 + $0x121] sm:$0xff] }
  0x2d   : > { %514 = vrot.lane.b32.xlu0 %v4541_v44, %s4417_s24  ;;  %362 = vst.msk [vmem:[#allocation2 + $0x151] sm:$0xff] %vm225_vm0, %v329_v6  ;;  %v4603_v10 = vld [vmem:[#allocation2 + $0xc9] sm:$0xff]  ;;  %v4786_v57 = vld [vmem:[#allocation2 + $0x80] sm:$0xff] }
  0x2e   : > { %253 = vst.msk [vmem:[#allocation2 + $0x11] sm:$0x1] %vm234_vm2, %v4416_v0  ;;  %v4643_v14 = vld [vmem:[#allocation2 + $0x109] sm:$0xff] }
  0x2f   : > { %512 = vrot.lane.b32.xlu2 %v4552_v52, %s4417_s24  ;;  %235 = vst.msk [vmem:[#allocation2] sm:$0x1] %vm234_vm2, %v4416_v0  ;;  %v4675_v18 = vld [vmem:[#allocation2 + $0x141] sm:$0xff] }
  0x30   : > { %236 = vst.msk [vmem:[#allocation2 + $0x18] sm:$0x1] %vm234_vm2, %v4416_v0  ;;  %v4631_v13 = vld [vmem:[#allocation2 + $0xf1] sm:$0xff]  ;;  %v4801_v60 = vld [vmem:[#allocation2 + $0x62] sm:$0xff] }
  0x31   : > { %237 = vst.msk [vmem:[#allocation2 + $0x30] sm:$0x1] %vm234_vm2, %v4416_v0  ;;  %v4671_v17 = vld [vmem:[#allocation2 + $0x129] sm:$0xff] }
  0x32   : > { %238 = vst.msk [vmem:[#allocation2 + $0x48] sm:$0x1] %vm234_vm2, %v4416_v0  ;;  %v4699_v20 = vld [vmem:[#allocation2 + $0x169] sm:$0xff] }
  0x33   : > { %516 = vrot.lane.b32.xlu1 %v4561_v54, %s4417_s24  ;;  %239 = vst.msk [vmem:[#allocation2 + $0x60] sm:$0x1] %vm234_vm2, %v4416_v0  ;;  %v4659_v16 = vld [vmem:[#allocation2 + $0x111] sm:$0xff] }
  0x34   : > { %240 = vst.msk [vmem:[#allocation2 + $0x78] sm:$0x1] %vm234_vm2, %v4416_v0  ;;  %v4695_v19 = vld [vmem:[#allocation2 + $0x151] sm:$0xff] }
  0x35   : > { %520 = vrot.lane.b32.xlu0 %v4559_v53, %s4417_s24  ;;  %241 = vst.msk [vmem:[#allocation2 + $0x90] sm:$0x1] %vm234_vm2, %v4416_v0  ;;  %v626_v27 = vld [vmem:[#allocation2 + $0xa] sm:$0xff] }
  0x36   : > { %242 = vst.msk [vmem:[#allocation2 + $0xa8] sm:$0x1] %vm234_vm2, %v4416_v0  ;;  %v368_v29 = vld [vmem:[#allocation2] sm:$0xff] }
  0x37   : > { %518 = vrot.lane.b32.xlu2 %v4570_v61, %s4417_s24  ;;  %243 = vst.msk [vmem:[#allocation2 + $0xc0] sm:$0x1] %vm234_vm2, %v4416_v0  ;;  %v4744_v38 = vld [vmem:[#allocation2 + $0x18] sm:$0xff] }
  0x38   : > { %244 = vst.msk [vmem:[#allocation2 + $0xd8] sm:$0x1] %vm234_vm2, %v4416_v0  ;;  %v4724_v30 = vld [vmem:[#allocation2 + $0x30] sm:$0xff] }
  0x39   : > { %245 = vst.msk [vmem:[#allocation2 + $0xf0] sm:$0x1] %vm234_vm2, %v4416_v0  ;;  %v4762_v46 = vld [vmem:[#allocation2 + $0x48] sm:$0xff] }
  0x3a   : > { %246 = vst.msk [vmem:[#allocation2 + $0x108] sm:$0x1] %vm234_vm2, %v4416_v0  ;;  %v4764_v47 = vld [vmem:[#allocation2 + $0x60] sm:$0xff] }
  0x3b   : > { %522 = vrot.lane.b32.xlu1 %v4579_v63, %s4417_s24  ;;  %247 = vst.msk [vmem:[#allocation2 + $0x120] sm:$0x1] %vm234_vm2, %v4416_v0  ;;  %v4815_v6 = vld [vmem:[#allocation2 + $0x78] sm:$0xff] }
  0x3c   : > { %248 = vst.msk [vmem:[#allocation2 + $0x138] sm:$0x1] %vm234_vm2, %v4416_v0  ;;  %v4810_v4 = vld [vmem:[#allocation2 + $0x90] sm:$0xff] }
  0x3d   : > { %526 = vrot.lane.b32.xlu0 %v4577_v62, %s4417_s24  ;;  %249 = vst.msk [vmem:[#allocation2 + $0x150] sm:$0x1] %vm234_vm2, %v4416_v0  ;;  %v4812_v5 = vld [vmem:[#allocation2 + $0xa8] sm:$0xff] }
  0x3e   : > { %250 = vst.msk [vmem:[#allocation2 + $0x168] sm:$0x1] %vm234_vm2, %v4416_v0 }
  0x3f   : > { %524 = vrot.lane.b32.xlu2 %v4588_v7, %s4417_s24  ;;  %251 = vst.msk [vmem:[#allocation2 + $0x180] sm:$0x1] %vm234_vm2, %v4416_v0 }
  0x40   : > { %252 = vst.msk [vmem:[#allocation2 + $0x198] sm:$0x1] %vm234_vm2, %v4416_v0 }
  0x41   : > { %254 = vst.msk [vmem:[#allocation2 + $0x29] sm:$0x1] %vm234_vm2, %v4416_v0 }
  0x42   : > { %255 = vst.msk [vmem:[#allocation2 + $0x41] sm:$0x1] %vm234_vm2, %v4416_v0 }
  0x43   : > { %528 = vrot.lane.b32.xlu1 %v4595_v8, %s4417_s24  ;;  %256 = vst.msk [vmem:[#allocation2 + $0x59] sm:$0x1] %vm234_vm2, %v4416_v0 }
  0x44   : > { %257 = vst.msk [vmem:[#allocation2 + $0x71] sm:$0x1] %vm234_vm2, %v4416_v0 }
  0x45   : > { %532 = vrot.lane.b32.xlu0 %v4597_v9, %s4417_s24  ;;  %258 = vst.msk [vmem:[#allocation2 + $0x89] sm:$0x1] %vm234_vm2, %v4416_v0 }
  0x46   : > { %259 = vst.msk [vmem:[#allocation2 + $0xa1] sm:$0x1] %vm234_vm2, %v4416_v0 }
  0x47   : > { %530 = vrot.lane.b32.xlu2 %v4603_v10, %s4417_s24  ;;  %260 = vst.msk [vmem:[#allocation2 + $0xb9] sm:$0x1] %vm234_vm2, %v4416_v0 }
  0x48   : > { %261 = vst.msk [vmem:[#allocation2 + $0xd1] sm:$0x1] %vm234_vm2, %v4416_v0  ;;  %v4797_v59 = vld [vmem:[#allocation2 + $0x22] sm:$0xff] }
  0x49   : > { %262 = vst.msk [vmem:[#allocation2 + $0xe9] sm:$0x1] %vm234_vm2, %v4416_v0  ;;  %v4777_v50 = vld [vmem:[#allocation2 + $0x3a] sm:$0xff] }
  0x4a   : > { %6857 = vst [vmem:[#allocation4_spill] sm:$0xff] %v4695_v19  ;;  %v4760_v41 = vld [vmem:[#allocation2 + $0x52] sm:$0xff] }
  0x4b   : > { %534 = vrot.lane.b32.xlu1 %v4615_v11, %s4417_s24  ;;  %263 = vst.msk [vmem:[#allocation2 + $0x101] sm:$0x1] %vm234_vm2, %v4416_v0 }
  0x4c   : > { %264 = vst.msk [vmem:[#allocation2 + $0x119] sm:$0x1] %vm234_vm2, %v4416_v0  ;;  %v4827_v23 = vld [vmem:[#allocation2 + $0x82] sm:$0xff] }
  0x4d   : > { %538 = vrot.lane.b32.xlu0 %v4619_v12, %s4417_s24  ;;  %265 = vst.msk [vmem:[#allocation2 + $0x131] sm:$0x1] %vm234_vm2, %v4416_v0  ;;  %v4808_v2 = vld [vmem:[#allocation2 + $0x9a] sm:$0xff] }
  0x4e   : > { %266 = vst.msk [vmem:[#allocation2 + $0x149] sm:$0x1] %vm234_vm2, %v4416_v0 }
  0x4f   : > { %536 = vrot.lane.b32.xlu2 %v4631_v13, %s4417_s24  ;;  %267 = vst.msk [vmem:[#allocation2 + $0x161] sm:$0x1] %vm234_vm2, %v4416_v0 }
  0x50   : > { %268 = vst.msk [vmem:[#allocation2 + $0x179] sm:$0x1] %vm234_vm2, %v4416_v0 }
  0x51   : > { %269 = vst.msk [vmem:[#allocation2 + $0x191] sm:$0x1] %vm234_vm2, %v4416_v0 }
  0x52   : > { %270 = vst.msk [vmem:[#allocation2 + $0x1a9] sm:$0x1] %vm234_vm2, %v4416_v0 }
  0x53   : > { %540 = vrot.lane.b32.xlu1 %v4643_v14, %s4417_s24  ;;  %360 = vst.msk [vmem:[#allocation2 + $0x139] sm:$0xff] %vm225_vm0, %v327_v24 }
  0x54   : > { %365 = vst.msk [vmem:[#allocation2 + $0x171] sm:$0xff] %vm225_vm0, %v332_v25  ;;  %v4835_v25 = vld [vmem:[#allocation2 + $0xc2] sm:$0xff] }
  0x55   : > { %544 = vrot.lane.b32.xlu0 %v4647_v15, %s4417_s24  ;;  %363 = vst.msk [vmem:[#allocation2 + $0x159] sm:$0xff] %vm225_vm0, %v330_v26 }
  0x56   : > { %400 = vst.msk [vmem:[#allocation3] sm:$0xff] %vm225_vm0, %v368_v29  ;;  %v4839_v29 = vld [vmem:[#allocation2 + $0xc8] sm:$0xff] }
  0x57   : > { %542 = vrot.lane.b32.xlu2 %v4659_v16, %s4417_s24  ;;  %404 = vst.msk [vmem:[#allocation3 + $0x20] sm:$0xff] %vm225_vm0, %v4724_v30 }
  0x58   : > { %6859 = vst [vmem:[#allocation6_spill] sm:$0xff] %v4739_v32 }
  0x59   : > { %401 = vst.msk [vmem:[#allocation3 + $0x8] sm:$0xff] %vm225_vm0, %v369_v33  ;;  %v4842_v33 = vld [vmem:[#allocation2 + $0x98] sm:$0xff] }
  0x5a   : > { %v4731_v31 = vld [vmem:[#allocation2 + $0x139] sm:$0xff]  ;;  %405 = vst.msk [vmem:[#allocation3 + $0x28] sm:$0xff] %vm225_vm0, %v4741_v37 }
  0x5b   : > { %546 = vrot.lane.b32.xlu1 %v4671_v17, %s4417_s24  ;;  %v4735_v0 = vld [vmem:[#allocation2 + $0x171] sm:$0xff]  ;;  %402 = vst.msk [vmem:[#allocation3 + $0x10] sm:$0xff] %vm225_vm0, %v4744_v38 }
  0x5c   : > { %6858 = vst [vmem:[#allocation5_spill] sm:$0xff] %v4735_v0  ;;  %v4752_v39 = vld [vmem:[#allocation2 + $0x159] sm:$0xff] }
  0x5d   : > { %550 = vrot.lane.b32.xlu0 %v4675_v18, %s4417_s24  ;;  %6860 = vst [vmem:[#allocation7_spill] sm:$0xff] %v4754_v40 }
  0x5e   : > { %6861 = vst [vmem:[#allocation8_spill] sm:$0xff] %v4760_v41 }
  0x5f   : > { %548 = vrot.lane.b32.xlu2 %v4731_v31, %s4417_s24  ;;  %406 = vst.msk [vmem:[#allocation3 + $0x30] sm:$0xff] %vm225_vm0, %v4762_v46 }
  0x60   : > { %408 = vst.msk [vmem:[#allocation3 + $0x40] sm:$0xff] %vm225_vm0, %v4764_v47 }
  0x61   : > { %403 = vst.msk [vmem:[#allocation3 + $0x18] sm:$0xff] %vm225_vm0, %v4767_v48 }
  0x62   : > { %6862 = vst [vmem:[#allocation9_spill] sm:$0xff] %v4777_v50 }
  0x63   : > { %552 = vrot.lane.b32.xlu1 %v4695_v19, %s4417_s24  ;;  %6863 = vst [vmem:[#allocation10_spill] sm:$0xff] %v4782_v51  ;;  %v4992_v19 = vld [vmem:[#allocation2 + $0x170] sm:$0xff] }
  0x64   : > { %409 = vst.msk [vmem:[#allocation3 + $0x48] sm:$0xff] %vm225_vm0, %v4784_v56 }
  0x65   : > { %556 = vrot.lane.b32.xlu0 %v4699_v20, %s4417_s24  ;;  %411 = vst.msk [vmem:[#allocation3 + $0x58] sm:$0xff] %vm225_vm0, %v4786_v57 }
  0x66   : > { %6864 = vst [vmem:[#allocation11_spill] sm:$0xff] %v4797_v59 }
  0x67   : > { %554 = vrot.lane.b32.xlu2 %v4752_v39, %s4417_s24  ;;  %407 = vst.msk [vmem:[#allocation3 + $0x38] sm:$0xff] %vm225_vm0, %v4789_v58 }
  0x68   : > { %6865 = vst [vmem:[#allocation12_spill] sm:$0xff] %v4801_v60 }
  0x69   : > { %6866 = vst [vmem:[#allocation13_spill] sm:$0xff] %v4808_v2 }
  0x6a   : > { %412 = vst.msk [vmem:[#allocation3 + $0x60] sm:$0xff] %vm225_vm0, %v4810_v4 }
  0x6b   : > { %558 = vrot.lane.b32.xlu1 %v4735_v0, %s4417_s24  ;;  %414 = vst.msk [vmem:[#allocation3 + $0x70] sm:$0xff] %vm225_vm0, %v4812_v5  ;;  %v4950_v0 = vld [vmem:[#allocation2 + $0x128] sm:$0xff] }
  0x6c   : > { %6867 = vst [vmem:[#allocation14_spill] sm:$0xff] %v4823_v21 }
  0x6d   : > { %691 = vrot.lane.b32.xlu0 %v626_v27, %s4418_s25  ;;  %410 = vst.msk [vmem:[#allocation3 + $0x50] sm:$0xff] %vm225_vm0, %v4815_v6  ;;  %v4837_v27 = vld [vmem:[#allocation2 + $0xb0] sm:$0xff] }
  0x6e   : > { %6868 = vst [vmem:[#allocation15_spill] sm:$0xff] %v4827_v23 }
  0x6f   : > { %689 = vrot.lane.b32.xlu2 %v625_v49, %s4418_s25  ;;  %6869 = vst [vmem:[#allocation16_spill] sm:$0xff] %v4835_v25 }
  0x70   : > { %415 = vst.msk [vmem:[#allocation3 + $0x78] sm:$0xff] %vm225_vm0, %v4837_v27 }
  0x71   : > { %417 = vst.msk [vmem:[#allocation3 + $0x88] sm:$0xff] %vm225_vm0, %v4839_v29 }
  0x72   : > { %413 = vst.msk [vmem:[#allocation3 + $0x68] sm:$0xff] %vm225_vm0, %v4842_v33 }
  0x73   : > { %693 = vrot.lane.b32.xlu1 %v4754_v40, %s4418_s25  ;;  %v4923_v40 = vld [vmem:[#allocation2 + $0x108] sm:$0xff]  ;;  %425 = vst.msk [vmem:[#allocation3 + $0xc8] sm:$0xff] %vm225_vm0, %v4950_v0 }
  0x74   : > { %422 = vst.msk [vmem:[#allocation3 + $0xb0] sm:$0xff] %vm225_vm0, %v4923_v40 }
  0x75   : > { %697 = vrot.lane.b32.xlu0 %v4739_v32, %s4418_s25  ;;  %v4947_v32 = vld [vmem:[#allocation2 + $0x158] sm:$0xff]  ;;  %431 = vst.msk [vmem:[#allocation3 + $0xf8] sm:$0xff] %vm225_vm0, %v4992_v19 }
  0x76   : > { %429 = vst.msk [vmem:[#allocation3 + $0xe8] sm:$0xff] %vm225_vm0, %v4947_v32 }
  0x77   : > { %695 = vrot.lane.b32.xlu2 %v4797_v59, %s4418_s25 }
  0x79   : > { %v505_v42 = vpop.permute.xlu2 %504 }
  0x7a   : > { %597 = vst.msk [vmem:[#allocation3 + $0x20] sm:$0xff] %vm592_vm3, %v505_v42  ;;  %v4850_v42 = vld [vmem:[#allocation2 + $0x6a] sm:$0xff] }
  0x7b   : > { %699 = vrot.lane.b32.xlu1 %v4777_v50, %s4418_s25  ;;  %6870 = vst [vmem:[#allocation17_spill] sm:$0xff] %v4850_v42 }
  0x7d   : > { %703 = vrot.lane.b32.xlu0 %v4760_v41, %s4418_s25  ;;  %v4920_v41 = vld [vmem:[#allocation2 + $0x138] sm:$0xff] }
  0x7e   : > { %426 = vst.msk [vmem:[#allocation3 + $0xd0] sm:$0xff] %vm225_vm0, %v4920_v41 }
  0x7f   : > { %701 = vrot.lane.b32.xlu2 %v4823_v21, %s4418_s25  ;;  %v4976_v21 = vld [vmem:[#allocation2 + $0x150] sm:$0xff] }
  0x80   : > { %428 = vst.msk [vmem:[#allocation3 + $0xe0] sm:$0xff] %vm225_vm0, %v4976_v21 }
  0x81   : > { %v507_v55 = vpop.permute.xlu2 %506 }
  0x82   : > { %598 = vst.msk [vmem:[#allocation3 + $0x28] sm:$0xff] %vm592_vm3, %v507_v55  ;;  %v4854_v55 = vld [vmem:[#allocation2 + $0xaa] sm:$0xff] }
  0x83   : > { %705 = vrot.lane.b32.xlu1 %v4801_v60, %s4418_s25  ;;  %6871 = vst [vmem:[#allocation18_spill] sm:$0xff] %v4854_v55  ;;  %v4893_v60 = vld [vmem:[#allocation2 + $0x110] sm:$0xff] }
  0x84   : > { %423 = vst.msk [vmem:[#allocation3 + $0xb8] sm:$0xff] %vm225_vm0, %v4893_v60 }
  0x85   : > { %709 = vrot.lane.b32.xlu0 %v4782_v51, %s4418_s25  ;;  %v4896_v51 = vld [vmem:[#allocation2 + $0xe0] sm:$0xff] }
  0x86   : > { %419 = vst.msk [vmem:[#allocation3 + $0x98] sm:$0xff] %vm225_vm0, %v4896_v51 }
  0x87   : > { %v497_v1 = vpop.permute.xlu0 %496  ;;  %707 = vrot.lane.b32.xlu2 %v4850_v42, %s4418_s25  ;;  %v4945_v42 = vld [vmem:[#allocation2 + $0x140] sm:$0xff] }
  0x88   : > { %593 = vst.msk [vmem:[#allocation3] sm:$0xff] %vm592_vm3, %v497_v1 }
  0x89   : > { %v513_v3 = vpop.permute.xlu2 %512  ;;  %427 = vst.msk [vmem:[#allocation3 + $0xd8] sm:$0xff] %vm225_vm0, %v4945_v42 }
  0x8a   : > { %601 = vst.msk [vmem:[#allocation3 + $0x40] sm:$0xff] %vm592_vm3, %v513_v3  ;;  %v4862_v3 = vld [vmem:[#allocation2 + $0xe2] sm:$0xff] }
  0x8b   : > { %711 = vrot.lane.b32.xlu1 %v4827_v23, %s4418_s25  ;;  %6872 = vst [vmem:[#allocation19_spill] sm:$0xff] %v4862_v3 }
  0x8d   : > { %715 = vrot.lane.b32.xlu0 %v4808_v2, %s4418_s25  ;;  %v501_v22 = vpop.permute.xlu1 %500  ;;  %v4891_v2 = vld [vmem:[#allocation2 + $0xf8] sm:$0xff] }
  0x8e   : > { %595 = vst.msk [vmem:[#allocation3 + $0x10] sm:$0xff] %vm592_vm3, %v501_v22 }
  0x8f   : > { %v499_v24 = vpop.permute.xlu0 %498  ;;  %421 = vst.msk [vmem:[#allocation3 + $0xa8] sm:$0xff] %vm225_vm0, %v4891_v2 }
  0x90   : > { %594 = vst.msk [vmem:[#allocation3 + $0x8] sm:$0xff] %vm592_vm3, %v499_v24  ;;  %v4864_v24 = vld [vmem:[#allocation2 + $0xd8] sm:$0xff] }
  0x91   : > { %v519_v26 = vpop.permute.xlu2 %518  ;;  %418 = vst.msk [vmem:[#allocation3 + $0x90] sm:$0xff] %vm225_vm0, %v4864_v24 }
  0x92   : > { %604 = vst.msk [vmem:[#allocation3 + $0x58] sm:$0xff] %vm592_vm3, %v519_v26  ;;  %v4866_v26 = vld [vmem:[#allocation2 + $0xf0] sm:$0xff] }
  0x93   : > { %717 = vrot.lane.b32.xlu1 %v4854_v55, %s4418_s25  ;;  %420 = vst.msk [vmem:[#allocation3 + $0xa0] sm:$0xff] %vm225_vm0, %v4866_v26  ;;  %v4881_v55 = vld [vmem:[#allocation2 + $0xca] sm:$0xff] }
  0x94   : > { %6874 = vst [vmem:[#allocation21_spill] sm:$0xff] %v4881_v55 }
  0x95   : > { %721 = vrot.lane.b32.xlu0 %v4835_v25, %s4418_s25  ;;  %v503_v49 = vpop.permute.xlu1 %502  ;;  %v4869_v25 = vld [vmem:[#allocation2 + $0xc0] sm:$0xff] }
  0x96   : > { %596 = vst.msk [vmem:[#allocation3 + $0x18] sm:$0xff] %vm592_vm3, %v503_v49  ;;  %v4877_v49 = vld [vmem:[#allocation2 + $0x92] sm:$0xff] }
  0x97   : > { %v509_v1 = vpop.permute.xlu0 %508  ;;  %6873 = vst [vmem:[#allocation20_spill] sm:$0xff] %v4877_v49  ;;  %713 = vrot.lane.b32.xlu2 %v4877_v49, %s4418_s25  ;;  %v4918_v49 = vld [vmem:[#allocation2 + $0x120] sm:$0xff] }
  0x98   : > { %599 = vst.msk [vmem:[#allocation3 + $0x30] sm:$0xff] %vm592_vm3, %v509_v1 }
  0x99   : > { %v525_v22 = vpop.permute.xlu2 %524  ;;  %416 = vst.msk [vmem:[#allocation3 + $0x80] sm:$0xff] %vm225_vm0, %v4869_v25 }
  0x9a   : > { %607 = vst.msk [vmem:[#allocation3 + $0x70] sm:$0xff] %vm592_vm3, %v525_v22 }
  0x9b   : > { %723 = vrot.lane.b32.xlu1 %v4881_v55, %s4418_s25  ;;  %v4908_v55 = vld [vmem:[#allocation2 + $0xf2] sm:$0xff]  ;;  %424 = vst.msk [vmem:[#allocation3 + $0xc0] sm:$0xff] %vm225_vm0, %v4918_v49 }
  0x9c   : > { %6877 = vst [vmem:[#allocation24_spill] sm:$0xff] %v4908_v55 }
  0x9d   : > { %727 = vrot.lane.b32.xlu0 %v4862_v3, %s4418_s25  ;;  %v511_v1 = vpop.permute.xlu1 %510  ;;  %v4889_v3 = vld [vmem:[#allocation2 + $0x10a] sm:$0xff] }
  0x9e   : > { %600 = vst.msk [vmem:[#allocation3 + $0x38] sm:$0xff] %vm592_vm3, %v511_v1  ;;  %v4904_v1 = vld [vmem:[#allocation2 + $0xb2] sm:$0xff] }
  0x9f   : > { %v515_v22 = vpop.permute.xlu0 %514  ;;  %6875 = vst [vmem:[#allocation22_spill] sm:$0xff] %v4889_v3  ;;  %719 = vrot.lane.b32.xlu2 %v4904_v1, %s4418_s25 }
  0xa0   : > { %602 = vst.msk [vmem:[#allocation3 + $0x48] sm:$0xff] %vm592_vm3, %v515_v22 }
  0xa1   : > { %v531_v23 = vpop.permute.xlu2 %530  ;;  %6876 = vst [vmem:[#allocation23_spill] sm:$0xff] %v4904_v1 }
  0xa2   : > { %610 = vst.msk [vmem:[#allocation3 + $0x88] sm:$0xff] %vm592_vm3, %v531_v23 }
  0xa3   : > { %729 = vrot.lane.b32.xlu1 %v4908_v55, %s4418_s25  ;;  %v4935_v55 = vld [vmem:[#allocation2 + $0x112] sm:$0xff] }
  0xa4   : > { %6880 = vst [vmem:[#allocation27_spill] sm:$0xff] %v4935_v55 }
  0xa5   : > { %733 = vrot.lane.b32.xlu0 %v4889_v3, %s4418_s25  ;;  %v517_v22 = vpop.permute.xlu1 %516  ;;  %v4916_v3 = vld [vmem:[#allocation2 + $0x12a] sm:$0xff] }
  0xa6   : > { %603 = vst.msk [vmem:[#allocation3 + $0x50] sm:$0xff] %vm592_vm3, %v517_v22  ;;  %v4931_v22 = vld [vmem:[#allocation2 + $0xda] sm:$0xff] }
  0xa7   : > { %v521_v23 = vpop.permute.xlu0 %520  ;;  %6878 = vst [vmem:[#allocation25_spill] sm:$0xff] %v4916_v3  ;;  %725 = vrot.lane.b32.xlu2 %v4931_v22, %s4418_s25 }
  0xa8   : > { %605 = vst.msk [vmem:[#allocation3 + $0x60] sm:$0xff] %vm592_vm3, %v521_v23 }
  0xa9   : > { %v537_v50 = vpop.permute.xlu2 %536  ;;  %6879 = vst [vmem:[#allocation26_spill] sm:$0xff] %v4931_v22  ;;  %v4972_v22 = vld [vmem:[#allocation2 + $0x168] sm:$0xff] }
  0xaa   : > { %613 = vst.msk [vmem:[#allocation3 + $0xa0] sm:$0xff] %vm592_vm3, %v537_v50 }
  0xab   : > { %735 = vrot.lane.b32.xlu1 %v4935_v55, %s4418_s25  ;;  %v4962_v55 = vld [vmem:[#allocation2 + $0x13a] sm:$0xff]  ;;  %430 = vst.msk [vmem:[#allocation3 + $0xf0] sm:$0xff] %vm225_vm0, %v4972_v22 }
  0xac   : > { %6883 = vst [vmem:[#allocation30_spill] sm:$0xff] %v4962_v55 }
  0xad   : > { %739 = vrot.lane.b32.xlu0 %v4916_v3, %s4418_s25  ;;  %v523_v23 = vpop.permute.xlu1 %522  ;;  %v4943_v3 = vld [vmem:[#allocation2 + $0x152] sm:$0xff] }
  0xae   : > { %606 = vst.msk [vmem:[#allocation3 + $0x68] sm:$0xff] %vm592_vm3, %v523_v23  ;;  %v4958_v23 = vld [vmem:[#allocation2 + $0xfa] sm:$0xff] }
  0xaf   : > { %v527_v50 = vpop.permute.xlu0 %526  ;;  %6881 = vst [vmem:[#allocation28_spill] sm:$0xff] %v4943_v3  ;;  %731 = vrot.lane.b32.xlu2 %v4958_v23, %s4418_s25 }
  0xb0   : > { %608 = vst.msk [vmem:[#allocation3 + $0x78] sm:$0xff] %vm592_vm3, %v527_v50 }
  0xb1   : > { %v543_v1 = vpop.permute.xlu2 %542  ;;  %6882 = vst [vmem:[#allocation29_spill] sm:$0xff] %v4958_v23  ;;  %v4984_v23 = vld [vmem:[#allocation2 + $0x15a] sm:$0xff] }
  0xb2   : > { %616 = vst.msk [vmem:[#allocation3 + $0xb8] sm:$0xff] %vm592_vm3, %v543_v1 }
  0xb3   : > { %741 = vrot.lane.b32.xlu1 %v4962_v55, %s4418_s25  ;;  %6886 = vst [vmem:[#allocation33_spill] sm:$0xff] %v4984_v23 }
  0xb5   : > { %745 = vrot.lane.b32.xlu0 %v4943_v3, %s4418_s25  ;;  %v529_v50 = vpop.permute.xlu1 %528  ;;  %v4970_v3 = vld [vmem:[#allocation2 + $0x172] sm:$0xff] }
  0xb6   : > { %609 = vst.msk [vmem:[#allocation3 + $0x80] sm:$0xff] %vm592_vm3, %v529_v50  ;;  %v4982_v50 = vld [vmem:[#allocation2 + $0x122] sm:$0xff] }
  0xb7   : > { %v533_v1 = vpop.permute.xlu0 %532  ;;  %6884 = vst [vmem:[#allocation31_spill] sm:$0xff] %v4970_v3  ;;  %737 = vrot.lane.b32.xlu2 %v4982_v50, %s4418_s25 }
  0xb8   : > { %611 = vst.msk [vmem:[#allocation3 + $0x90] sm:$0xff] %vm592_vm3, %v533_v1 }
  0xb9   : > { %6885 = vst [vmem:[#allocation32_spill] sm:$0xff] %v4982_v50 }
  0xbb   : > { %747 = vrot.lane.b32.xlu1 %v4984_v23, %s4418_s25 }
  0xbd   : > { %751 = vrot.lane.b32.xlu0 %v4970_v3, %s4418_s25  ;;  %v535_v1 = vpop.permute.xlu1 %534  ;;  %v4998_v3 = vld [vmem:[#allocation2 + $0x142] sm:$0xff] }
  0xbe   : > { %612 = vst.msk [vmem:[#allocation3 + $0x98] sm:$0xff] %vm592_vm3, %v535_v1 }
  0xbf   : > { %v539_v55 = vpop.permute.xlu0 %538  ;;  %743 = vrot.lane.b32.xlu2 %v4998_v3, %s4418_s25 }
  0xc0   : > { %614 = vst.msk [vmem:[#allocation3 + $0xa8] sm:$0xff] %vm592_vm3, %v539_v55  ;;  %v549_v55 = vpop.permute.xlu2 %548 }
  0xc1   : > { %619 = vst.msk [vmem:[#allocation3 + $0xd0] sm:$0xff] %vm592_vm3, %v549_v55 }
  0xc3   : > { %882 = vrot.lane.b32.xlu1 %v4744_v38, %s4419_s26 }
  0xc5   : > { %886 = vrot.lane.b32.xlu0 %v4724_v30, %s4419_s26  ;;  %v541_v1 = vpop.permute.xlu1 %540  ;;  %v5009_v30 = vld [vmem:[#allocation2 + $0x16a] sm:$0xff] }
  0xc6   : > { %615 = vst.msk [vmem:[#allocation3 + $0xb0] sm:$0xff] %vm592_vm3, %v541_v1 }
  0xc7   : > { %v545_v59 = vpop.permute.xlu0 %544  ;;  %749 = vrot.lane.b32.xlu2 %v5009_v30, %s4418_s25 }
  0xc8   : > { %617 = vst.msk [vmem:[#allocation3 + $0xc0] sm:$0xff] %vm592_vm3, %v545_v59  ;;  %v555_v38 = vpop.permute.xlu2 %554 }
  0xc9   : > { %622 = vst.msk [vmem:[#allocation3 + $0xe8] sm:$0xff] %vm592_vm3, %v555_v38  ;;  %v301_v38 = vld [vmem:[%s4480_s23 + $0xf0] sm:$0xff] }
  0xcb   : > { %888 = vrot.lane.b32.xlu1 %v4741_v37, %s4419_s26 }
  0xcd   : > { %892 = vrot.lane.b32.xlu0 %v4789_v58, %s4419_s26  ;;  %v547_v23 = vpop.permute.xlu1 %546 }
  0xce   : > { %618 = vst.msk [vmem:[#allocation3 + $0xc8] sm:$0xff] %vm592_vm3, %v547_v23 }
  0xcf   : > { %v551_v50 = vpop.permute.xlu0 %550  ;;  %884 = vrot.lane.b32.xlu2 %v4767_v48, %s4419_s26 }
  0xd0   : > { %620 = vst.msk [vmem:[#allocation3 + $0xd8] sm:$0xff] %vm592_vm3, %v551_v50  ;;  %v690_v37 = vpop.permute.xlu2 %689 }
  0xd1   : > { %786 = vst.msk [vmem:[#allocation3] sm:$0xff] %vm785_vm4, %v690_v37 }
  0xd3   : > { %894 = vrot.lane.b32.xlu1 %v4764_v47, %s4419_s26 }
  0xd5   : > { %898 = vrot.lane.b32.xlu0 %v4815_v6, %s4419_s26  ;;  %v553_v59 = vpop.permute.xlu1 %552 }
  0xd6   : > { %621 = vst.msk [vmem:[#allocation3 + $0xe0] sm:$0xff] %vm592_vm3, %v553_v59  ;;  %v333_v59 = vmax.f32 %v301_v38, 0.0 }
  0xd7   : > { %v557_v1 = vpop.permute.xlu0 %556  ;;  %890 = vrot.lane.b32.xlu2 %v4762_v46, %s4419_s26 }
  0xd8   : > { %623 = vst.msk [vmem:[#allocation3 + $0xf0] sm:$0xff] %vm592_vm3, %v557_v1  ;;  %v696_v48 = vpop.permute.xlu2 %695 }
  0xd9   : > { %789 = vst.msk [vmem:[#allocation3 + $0x18] sm:$0xff] %vm785_vm4, %v696_v48 }
  0xda   : > { %366 = vst.msk [vmem:[#allocation2 + $0x181] sm:$0xff] %vm225_vm0, %v333_v59 }
  0xdb   : > { %900 = vrot.lane.b32.xlu1 %v4786_v57, %s4419_s26 }
  0xdd   : > { %904 = vrot.lane.b32.xlu0 %v4842_v33, %s4419_s26  ;;  %v559_v47 = vpop.permute.xlu1 %558 }
  0xde   : > { %624 = vst.msk [vmem:[#allocation3 + $0xf8] sm:$0xff] %vm592_vm3, %v559_v47  ;;  %v302_v47 = vld [vmem:[%s4480_s23 + $0xf8] sm:$0xff] }
  0xdf   : > { %v692_v23 = vpop.permute.xlu0 %691  ;;  %896 = vrot.lane.b32.xlu2 %v4784_v56, %s4419_s26 }
  0xe0   : > { %787 = vst.msk [vmem:[#allocation3 + $0x8] sm:$0xff] %vm785_vm4, %v692_v23  ;;  %v702_v46 = vpop.permute.xlu2 %701 }
  0xe1   : > { %792 = vst.msk [vmem:[#allocation3 + $0x30] sm:$0xff] %vm785_vm4, %v702_v46 }
  0xe3   : > { %906 = vrot.lane.b32.xlu1 %v4812_v5, %s4419_s26 }
  0xe5   : > { %910 = vrot.lane.b32.xlu0 %v4869_v25, %s4419_s26  ;;  %v694_v57 = vpop.permute.xlu1 %693 }
  0xe6   : > { %788 = vst.msk [vmem:[#allocation3 + $0x10] sm:$0xff] %vm785_vm4, %v694_v57 }
  0xe7   : > { %v698_v50 = vpop.permute.xlu0 %697  ;;  %902 = vrot.lane.b32.xlu2 %v4810_v4, %s4419_s26 }
  0xe8   : > { %790 = vst.msk [vmem:[#allocation3 + $0x20] sm:$0xff] %vm785_vm4, %v698_v50  ;;  %v708_v5 = vpop.permute.xlu2 %707  ;;  %v334_v50 = vmax.f32 %v302_v47, 0.0 }
  0xe9   : > { %795 = vst.msk [vmem:[#allocation3 + $0x48] sm:$0xff] %vm785_vm4, %v708_v5  ;;  %v5096_v5 = vld [vmem:[#allocation2 + $0x180] sm:$0xff] }
  0xea   : > { %367 = vst.msk [vmem:[#allocation2 + $0x189] sm:$0xff] %vm225_vm0, %v334_v50 }
  0xeb   : > { %912 = vrot.lane.b32.xlu1 %v4839_v29, %s4419_s26 }
  0xed   : > { %916 = vrot.lane.b32.xlu0 %v4896_v51, %s4419_s26  ;;  %v700_v1 = vpop.permute.xlu1 %699 }
  0xee   : > { %791 = vst.msk [vmem:[#allocation3 + $0x28] sm:$0xff] %vm785_vm4, %v700_v1 }
  0xef   : > { %v704_v55 = vpop.permute.xlu0 %703  ;;  %908 = vrot.lane.b32.xlu2 %v4837_v27, %s4419_s26 }
  0xf0   : > { %793 = vst.msk [vmem:[#allocation3 + $0x38] sm:$0xff] %vm785_vm4, %v704_v55 }
  0xf1   : > { %v714_v29 = vpop.permute.xlu2 %713  ;;  %v5116_v47 = vld [vmem:[#allocation2 + $0x188] sm:$0xff] }
  0xf2   : > { %798 = vst.msk [vmem:[#allocation3 + $0x60] sm:$0xff] %vm785_vm4, %v714_v29 }
  0xf3   : > { %918 = vrot.lane.b32.xlu1 %v4866_v26, %s4419_s26 }
  0xf5   : > { %922 = vrot.lane.b32.xlu0 %v4923_v40, %s4419_s26  ;;  %v706_v23 = vpop.permute.xlu1 %705 }
  0xf6   : > { %794 = vst.msk [vmem:[#allocation3 + $0x40] sm:$0xff] %vm785_vm4, %v706_v23 }
  0xf7   : > { %v710_v37 = vpop.permute.xlu0 %709  ;;  %914 = vrot.lane.b32.xlu2 %v4864_v24, %s4419_s26 }
  0xf8   : > { %796 = vst.msk [vmem:[#allocation3 + $0x50] sm:$0xff] %vm785_vm4, %v710_v37 }
  0xf9   : > { %v720_v26 = vpop.permute.xlu2 %719 }
  0xfa   : > { %801 = vst.msk [vmem:[#allocation3 + $0x78] sm:$0xff] %vm785_vm4, %v720_v26 }
  0xfb   : > { %924 = vrot.lane.b32.xlu1 %v4893_v60, %s4419_s26 }
  0xfd   : > { %928 = vrot.lane.b32.xlu0 %v4950_v0, %s4419_s26  ;;  %v712_v46 = vpop.permute.xlu1 %711 }
  0xfe   : > { %797 = vst.msk [vmem:[#allocation3 + $0x58] sm:$0xff] %vm785_vm4, %v712_v46 }
  0xff   : > { %v716_v48 = vpop.permute.xlu0 %715  ;;  %920 = vrot.lane.b32.xlu2 %v4891_v2, %s4419_s26 }
 0x100   : > { %799 = vst.msk [vmem:[#allocation3 + $0x68] sm:$0xff] %vm785_vm4, %v716_v48 }
 0x101   : > { %v726_v60 = vpop.permute.xlu2 %725 }
 0x102   : > { %804 = vst.msk [vmem:[#allocation3 + $0x90] sm:$0xff] %vm785_vm4, %v726_v60  ;;  %v5201_v60 = vld [vmem:[#allocation2 + $0x189] sm:$0xff] }
 0x103   : > { %930 = vrot.lane.b32.xlu1 %v4920_v41, %s4419_s26 }
 0x105   : > { %934 = vrot.lane.b32.xlu0 %v4976_v21, %s4419_s26  ;;  %v718_v55 = vpop.permute.xlu1 %717 }
 0x106   : > { %800 = vst.msk [vmem:[#allocation3 + $0x70] sm:$0xff] %vm785_vm4, %v718_v55 }
 0x107   : > { %v722_v57 = vpop.permute.xlu0 %721  ;;  %926 = vrot.lane.b32.xlu2 %v4918_v49, %s4419_s26 }
 0x108   : > { %802 = vst.msk [vmem:[#allocation3 + $0x80] sm:$0xff] %vm785_vm4, %v722_v57  ;;  %v6887_v57 = vld [vmem:[#allocation11_spill] sm:$0xff] }
 0x109   : > { %v732_v59 = vpop.permute.xlu2 %731 }
 0x10a   : > { %807 = vst.msk [vmem:[#allocation3 + $0xa8] sm:$0xff] %vm785_vm4, %v732_v59  ;;  %v6889_v59 = vld [vmem:[#allocation14_spill] sm:$0xff] }
 0x10b   : > { %936 = vrot.lane.b32.xlu1 %v4947_v32, %s4419_s26 }
 0x10d   : > { %940 = vrot.lane.b32.xlu0 %v4992_v19, %s4419_s26  ;;  %v724_v41 = vpop.permute.xlu1 %723 }
 0x10e   : > { %803 = vst.msk [vmem:[#allocation3 + $0x88] sm:$0xff] %vm785_vm4, %v724_v41 }
 0x10f   : > { %v728_v38 = vpop.permute.xlu0 %727  ;;  %932 = vrot.lane.b32.xlu2 %v4945_v42, %s4419_s26 }
 0x110   : > { %805 = vst.msk [vmem:[#allocation3 + $0x98] sm:$0xff] %vm785_vm4, %v728_v38 }
 0x111   : > { %v738_v37 = vpop.permute.xlu2 %737 }
 0x112   : > { %810 = vst.msk [vmem:[#allocation3 + $0xc0] sm:$0xff] %vm785_vm4, %v738_v37  ;;  %v6891_v37 = vld [vmem:[#allocation6_spill] sm:$0xff] }
 0x113   : > { %942 = vrot.lane.b32.xlu1 %v5096_v5, %s4419_s26 }
 0x115   : > { %1075 = vrot.lane.b32.xlu0 %v4505_v28, %s4420_s27  ;;  %v730_v29 = vpop.permute.xlu1 %729 }
 0x116   : > { %806 = vst.msk [vmem:[#allocation3 + $0xa0] sm:$0xff] %vm785_vm4, %v730_v29 }
 0x117   : > { %v734_v1 = vpop.permute.xlu0 %733  ;;  %938 = vrot.lane.b32.xlu2 %v4972_v22, %s4419_s26 }
 0x118   : > { %808 = vst.msk [vmem:[#allocation3 + $0xb0] sm:$0xff] %vm785_vm4, %v734_v1  ;;  %v6890_v1 = vld [vmem:[#allocation5_spill] sm:$0xff] }
 0x119   : > { %v744_v23 = vpop.permute.xlu2 %743 }
 0x11a   : > { %813 = vst.msk [vmem:[#allocation3 + $0xd8] sm:$0xff] %vm785_vm4, %v744_v23  ;;  %v6892_v23 = vld [vmem:[#allocation17_spill] sm:$0xff] }
 0x11b   : > { %1077 = vrot.lane.b32.xlu1 %v4521_v35, %s4420_s27 }
 0x11d   : > { %1081 = vrot.lane.b32.xlu0 %v4534_v43, %s4420_s27  ;;  %v736_v48 = vpop.permute.xlu1 %735 }
 0x11e   : > { %809 = vst.msk [vmem:[#allocation3 + $0xb8] sm:$0xff] %vm785_vm4, %v736_v48 }
 0x11f   : > { %v740_v28 = vpop.permute.xlu0 %739  ;;  %944 = vrot.lane.b32.xlu2 %v5116_v47, %s4419_s26 }
 0x120   : > { %811 = vst.msk [vmem:[#allocation3 + $0xc8] sm:$0xff] %vm785_vm4, %v740_v28 }
 0x121   : > { %v750_v35 = vpop.permute.xlu2 %749 }
 0x122   : > { %816 = vst.msk [vmem:[#allocation3 + $0xf0] sm:$0xff] %vm785_vm4, %v750_v35  ;;  %v6894_v35 = vld [vmem:[#allocation8_spill] sm:$0xff] }
 0x123   : > { %1083 = vrot.lane.b32.xlu1 %v4524_v36, %s4420_s27 }
 0x125   : > { %1087 = vrot.lane.b32.xlu0 %v4552_v52, %s4420_s27  ;;  %v742_v50 = vpop.permute.xlu1 %741 }
 0x126   : > { %812 = vst.msk [vmem:[#allocation3 + $0xd0] sm:$0xff] %vm785_vm4, %v742_v50 }
 0x127   : > { %v746_v43 = vpop.permute.xlu0 %745  ;;  %1079 = vrot.lane.b32.xlu2 %v4515_v34, %s4420_s27 }
 0x128   : > { %814 = vst.msk [vmem:[#allocation3 + $0xe0] sm:$0xff] %vm785_vm4, %v746_v43  ;;  %v6893_v43 = vld [vmem:[#allocation7_spill] sm:$0xff] }
 0x129   : > { %v885_v36 = vpop.permute.xlu2 %884 }
 0x12a   : > { %980 = vst.msk [vmem:[#allocation3 + $0x8] sm:$0xff] %vm978_vm5, %v885_v36  ;;  %v6895_v36 = vld [vmem:[#allocation20_spill] sm:$0xff] }
 0x12b   : > { %1089 = vrot.lane.b32.xlu1 %v4541_v44, %s4420_s27 }
 0x12d   : > { %1093 = vrot.lane.b32.xlu0 %v4570_v61, %s4420_s27  ;;  %v748_v26 = vpop.permute.xlu1 %747 }
 0x12e   : > { %815 = vst.msk [vmem:[#allocation3 + $0xe8] sm:$0xff] %vm785_vm4, %v748_v26 }
 0x12f   : > { %v752_v52 = vpop.permute.xlu0 %751  ;;  %1085 = vrot.lane.b32.xlu2 %v4543_v45, %s4420_s27 }
 0x130   : > { %817 = vst.msk [vmem:[#allocation3 + $0xf8] sm:$0xff] %vm785_vm4, %v752_v52 }
 0x131   : > { %v891_v34 = vpop.permute.xlu2 %890 }
 0x132   : > { %983 = vst.msk [vmem:[#allocation3 + $0x20] sm:$0xff] %vm978_vm5, %v891_v34  ;;  %v6897_v34 = vld [vmem:[#allocation10_spill] sm:$0xff] }
 0x133   : > { %1095 = vrot.lane.b32.xlu1 %v4559_v53, %s4420_s27 }
 0x135   : > { %1099 = vrot.lane.b32.xlu0 %v4588_v7, %s4420_s27  ;;  %v883_v44 = vpop.permute.xlu1 %882 }
 0x136   : > { %979 = vst.msk [vmem:[#allocation3] sm:$0xff] %vm978_vm5, %v883_v44 }
 0x137   : > { %v887_v61 = vpop.permute.xlu0 %886  ;;  %1091 = vrot.lane.b32.xlu2 %v4561_v54, %s4420_s27 }
 0x138   : > { %981 = vst.msk [vmem:[#allocation3 + $0x10] sm:$0xff] %vm978_vm5, %v887_v61  ;;  %v6896_v61 = vld [vmem:[#allocation9_spill] sm:$0xff] }
 0x139   : > { %v897_v45 = vpop.permute.xlu2 %896 }
 0x13a   : > { %986 = vst.msk [vmem:[#allocation3 + $0x38] sm:$0xff] %vm978_vm5, %v897_v45  ;;  %v6898_v45 = vld [vmem:[#allocation23_spill] sm:$0xff] }
 0x13b   : > { %1101 = vrot.lane.b32.xlu1 %v4577_v62, %s4420_s27 }
 0x13d   : > { %1105 = vrot.lane.b32.xlu0 %v4603_v10, %s4420_s27  ;;  %v889_v53 = vpop.permute.xlu1 %888 }
 0x13e   : > { %982 = vst.msk [vmem:[#allocation3 + $0x18] sm:$0xff] %vm978_vm5, %v889_v53 }
 0x13f   : > { %v893_v46 = vpop.permute.xlu0 %892  ;;  %1097 = vrot.lane.b32.xlu2 %v4579_v63, %s4420_s27 }
 0x140   : > { %984 = vst.msk [vmem:[#allocation3 + $0x28] sm:$0xff] %vm978_vm5, %v893_v46 }
 0x141   : > { %v903_v54 = vpop.permute.xlu2 %902 }
 0x142   : > { %989 = vst.msk [vmem:[#allocation3 + $0x50] sm:$0xff] %vm978_vm5, %v903_v54  ;;  %v6900_v54 = vld [vmem:[#allocation13_spill] sm:$0xff] }
 0x143   : > { %1107 = vrot.lane.b32.xlu1 %v4597_v9, %s4420_s27 }
 0x145   : > { %1111 = vrot.lane.b32.xlu0 %v4631_v13, %s4420_s27  ;;  %v895_v62 = vpop.permute.xlu1 %894 }
 0x146   : > { %985 = vst.msk [vmem:[#allocation3 + $0x30] sm:$0xff] %vm978_vm5, %v895_v62 }
 0x147   : > { %v899_v7 = vpop.permute.xlu0 %898  ;;  %1103 = vrot.lane.b32.xlu2 %v4595_v8, %s4420_s27 }
 0x148   : > { %987 = vst.msk [vmem:[#allocation3 + $0x40] sm:$0xff] %vm978_vm5, %v899_v7  ;;  %v6899_v7 = vld [vmem:[#allocation12_spill] sm:$0xff] }
 0x149   : > { %v909_v63 = vpop.permute.xlu2 %908 }
 0x14a   : > { %992 = vst.msk [vmem:[#allocation3 + $0x68] sm:$0xff] %vm978_vm5, %v909_v63  ;;  %v6901_v63 = vld [vmem:[#allocation26_spill] sm:$0xff] }
 0x14b   : > { %1113 = vrot.lane.b32.xlu1 %v4619_v12, %s4420_s27 }
 0x14d   : > { %1117 = vrot.lane.b32.xlu0 %v4659_v16, %s4420_s27  ;;  %v901_v9 = vpop.permute.xlu1 %900 }
 0x14e   : > { %988 = vst.msk [vmem:[#allocation3 + $0x48] sm:$0xff] %vm978_vm5, %v901_v9 }
 0x14f   : > { %v905_v10 = vpop.permute.xlu0 %904  ;;  %1109 = vrot.lane.b32.xlu2 %v4615_v11, %s4420_s27  ;;  %v5186_v11 = vld [vmem:[#allocation2 + $0x181] sm:$0xff] }
 0x150   : > { %990 = vst.msk [vmem:[#allocation3 + $0x58] sm:$0xff] %vm978_vm5, %v905_v10 }
 0x151   : > { %v915_v8 = vpop.permute.xlu2 %914 }
 0x152   : > { %995 = vst.msk [vmem:[#allocation3 + $0x80] sm:$0xff] %vm978_vm5, %v915_v8  ;;  %v6903_v8 = vld [vmem:[#allocation16_spill] sm:$0xff] }
 0x153   : > { %1119 = vrot.lane.b32.xlu1 %v4647_v15, %s4420_s27 }
 0x155   : > { %1123 = vrot.lane.b32.xlu0 %v4731_v31, %s4420_s27  ;;  %v907_v12 = vpop.permute.xlu1 %906 }
 0x156   : > { %991 = vst.msk [vmem:[#allocation3 + $0x60] sm:$0xff] %vm978_vm5, %v907_v12 }
 0x157   : > { %v911_v13 = vpop.permute.xlu0 %910  ;;  %1115 = vrot.lane.b32.xlu2 %v4643_v14, %s4420_s27 }
 0x158   : > { %993 = vst.msk [vmem:[#allocation3 + $0x70] sm:$0xff] %vm978_vm5, %v911_v13  ;;  %v6902_v13 = vld [vmem:[#allocation15_spill] sm:$0xff] }
 0x159   : > { %v921_v15 = vpop.permute.xlu2 %920 }
 0x15a   : > { %998 = vst.msk [vmem:[#allocation3 + $0x98] sm:$0xff] %vm978_vm5, %v921_v15  ;;  %v6904_v15 = vld [vmem:[#allocation29_spill] sm:$0xff] }
 0x15b   : > { %1125 = vrot.lane.b32.xlu1 %v4675_v18, %s4420_s27 }
 0x15d   : > { %1129 = vrot.lane.b32.xlu0 %v4752_v39, %s4420_s27  ;;  %v913_v31 = vpop.permute.xlu1 %912 }
 0x15e   : > { %994 = vst.msk [vmem:[#allocation3 + $0x78] sm:$0xff] %vm978_vm5, %v913_v31 }
 0x15f   : > { %v917_v16 = vpop.permute.xlu0 %916  ;;  %1121 = vrot.lane.b32.xlu2 %v4671_v17, %s4420_s27  ;;  %v6888_v17 = vld [vmem:[#allocation4_spill] sm:$0xff] }
 0x160   : > { %996 = vst.msk [vmem:[#allocation3 + $0x88] sm:$0xff] %vm978_vm5, %v917_v16 }
 0x161   : > { %v927_v14 = vpop.permute.xlu2 %926 }
 0x162   : > { %1001 = vst.msk [vmem:[#allocation3 + $0xb0] sm:$0xff] %vm978_vm5, %v927_v14  ;;  %v6906_v14 = vld [vmem:[#allocation19_spill] sm:$0xff] }
 0x163   : > { %1131 = vrot.lane.b32.xlu1 %v4699_v20, %s4420_s27 }
 0x165   : > { %1135 = vrot.lane.b32.xlu0 %v5186_v11, %s4420_s27  ;;  %v919_v18 = vpop.permute.xlu1 %918 }
 0x166   : > { %997 = vst.msk [vmem:[#allocation3 + $0x90] sm:$0xff] %vm978_vm5, %v919_v18 }
 0x167   : > { %v923_v39 = vpop.permute.xlu0 %922  ;;  %1127 = vrot.lane.b32.xlu2 %v6888_v17, %s4420_s27 }
 0x168   : > { %999 = vst.msk [vmem:[#allocation3 + $0xa0] sm:$0xff] %vm978_vm5, %v923_v39  ;;  %v6905_v39 = vld [vmem:[#allocation18_spill] sm:$0xff] }
 0x169   : > { %v933_v20 = vpop.permute.xlu2 %932 }
 0x16a   : > { %1004 = vst.msk [vmem:[#allocation3 + $0xc8] sm:$0xff] %vm978_vm5, %v933_v20  ;;  %v6908_v20 = vld [vmem:[#allocation21_spill] sm:$0xff] }
 0x16b   : > { %1137 = vrot.lane.b32.xlu1 %v5201_v60, %s4420_s27 }
 0x16d   : > { %1270 = vrot.lane.b32.xlu0 %v6887_v57, %s4421_s28  ;;  %v925_v38 = vpop.permute.xlu1 %924 }
 0x16e   : > { %1000 = vst.msk [vmem:[#allocation3 + $0xa8] sm:$0xff] %vm978_vm5, %v925_v38  ;;  %v6909_v38 = vld [vmem:[#allocation22_spill] sm:$0xff] }
 0x16f   : > { %v929_v55 = vpop.permute.xlu0 %928  ;;  %1133 = vrot.lane.b32.xlu2 %v6890_v1, %s4420_s27 }
 0x170   : > { %1002 = vst.msk [vmem:[#allocation3 + $0xb8] sm:$0xff] %vm978_vm5, %v929_v55  ;;  %v6907_v55 = vld [vmem:[#allocation32_spill] sm:$0xff] }
 0x171   : > { %v939_v29 = vpop.permute.xlu2 %938 }
 0x172   : > { %1007 = vst.msk [vmem:[#allocation3 + $0xe0] sm:$0xff] %vm978_vm5, %v939_v29  ;;  %v6911_v29 = vld [vmem:[#allocation25_spill] sm:$0xff] }
 0x173   : > { %1272 = vrot.lane.b32.xlu1 %v6891_v37, %s4421_s28  ;;  %v6910_v37 = vld [vmem:[#allocation24_spill] sm:$0xff] }
 0x175   : > { %1276 = vrot.lane.b32.xlu0 %v6889_v59, %s4421_s28  ;;  %v931_v28 = vpop.permute.xlu1 %930 }
 0x176   : > { %1003 = vst.msk [vmem:[#allocation3 + $0xc0] sm:$0xff] %vm978_vm5, %v931_v28 }
 0x177   : > { %v935_v41 = vpop.permute.xlu0 %934  ;;  %1268 = vrot.lane.b32.xlu2 %v6893_v43, %s4421_s28  ;;  %v6913_v43 = vld [vmem:[#allocation28_spill] sm:$0xff] }
 0x178   : > { %1005 = vst.msk [vmem:[#allocation3 + $0xd0] sm:$0xff] %vm978_vm5, %v935_v41 }
 0x179   : > { %v945_v50 = vpop.permute.xlu2 %944 }
 0x17a   : > { %1010 = vst.msk [vmem:[#allocation3 + $0xf8] sm:$0xff] %vm978_vm5, %v945_v50 }
 0x17b   : > { %1278 = vrot.lane.b32.xlu1 %v6894_v35, %s4421_s28  ;;  %v5289_v35 = vld [vmem:[#allocation2 + $0x18a] sm:$0xff] }
 0x17d   : > { %1282 = vrot.lane.b32.xlu0 %v6892_v23, %s4421_s28  ;;  %v937_v52 = vpop.permute.xlu1 %936 }
 0x17e   : > { %1006 = vst.msk [vmem:[#allocation3 + $0xd8] sm:$0xff] %vm978_vm5, %v937_v52 }
 0x17f   : > { %v941_v48 = vpop.permute.xlu0 %940  ;;  %1274 = vrot.lane.b32.xlu2 %v6896_v61, %s4421_s28  ;;  %v1400_v61 = vld [vmem:[#allocation2 + $0x48] sm:$0xff] }
 0x180   : > { %1008 = vst.msk [vmem:[#allocation3 + $0xe8] sm:$0xff] %vm978_vm5, %v941_v48 }
 0x181   : > { %v1080_v44 = vpop.permute.xlu2 %1079 }
 0x182   : > { %1174 = vst.msk [vmem:[#allocation3 + $0x10] sm:$0xff] %vm1171_vm6, %v1080_v44 }
 0x183   : > { %1284 = vrot.lane.b32.xlu1 %v6897_v34, %s4421_s28 }
 0x185   : > { %1288 = vrot.lane.b32.xlu0 %v6895_v36, %s4421_s28  ;;  %v943_v46 = vpop.permute.xlu1 %942  ;;  %v6914_v36 = vld [vmem:[#allocation30_spill] sm:$0xff] }
 0x186   : > { %1009 = vst.msk [vmem:[#allocation3 + $0xf0] sm:$0xff] %vm978_vm5, %v943_v46  ;;  %v1398_v46 = vld [vmem:[#allocation2 + $0x30] sm:$0xff] }
 0x187   : > { %v1076_v26 = vpop.permute.xlu0 %1075  ;;  %1280 = vrot.lane.b32.xlu2 %v6899_v7, %s4421_s28 }
 0x188   : > { %1172 = vst.msk [vmem:[#allocation3] sm:$0xff] %vm1171_vm6, %v1076_v26  ;;  %v6915_v26 = vld [vmem:[#allocation31_spill] sm:$0xff] }
 0x189   : > { %v1086_v62 = vpop.permute.xlu2 %1085 }
 0x18a   : > { %1177 = vst.msk [vmem:[#allocation3 + $0x28] sm:$0xff] %vm1171_vm6, %v1086_v62  ;;  %v5311_v62 = vld [vmem:[#allocation2 + $0x182] sm:$0xff] }
 0x18b   : > { %1290 = vrot.lane.b32.xlu1 %v6900_v54, %s4421_s28 }
 0x18d   : > { %1294 = vrot.lane.b32.xlu0 %v6898_v45, %s4421_s28  ;;  %v1078_v10 = vpop.permute.xlu1 %1077 }
 0x18e   : > { %1173 = vst.msk [vmem:[#allocation3 + $0x8] sm:$0xff] %vm1171_vm6, %v1078_v10 }
 0x18f   : > { %v1082_v53 = vpop.permute.xlu0 %1081  ;;  %1286 = vrot.lane.b32.xlu2 %v6902_v13, %s4421_s28 }
 0x190   : > { %1175 = vst.msk [vmem:[#allocation3 + $0x18] sm:$0xff] %vm1171_vm6, %v1082_v53  ;;  %v6916_v53 = vld [vmem:[#allocation33_spill] sm:$0xff] }
 0x191   : > { %v1092_v12 = vpop.permute.xlu2 %1091 }
 0x192   : > { %1180 = vst.msk [vmem:[#allocation3 + $0x40] sm:$0xff] %vm1171_vm6, %v1092_v12 }
 0x193   : > { %1296 = vrot.lane.b32.xlu1 %v6903_v8, %s4421_s28 }
 0x195   : > { %1300 = vrot.lane.b32.xlu0 %v6901_v63, %s4421_s28  ;;  %v1084_v16 = vpop.permute.xlu1 %1083 }
 0x196   : > { %1176 = vst.msk [vmem:[#allocation3 + $0x20] sm:$0xff] %vm1171_vm6, %v1084_v16 }
 0x197   : > { %v1088_v9 = vpop.permute.xlu0 %1087  ;;  %1292 = vrot.lane.b32.xlu2 %v6905_v39, %s4421_s28  ;;  %v1408_v39 = vld [vmem:[#allocation2 + $0xa8] sm:$0xff] }
 0x198   : > { %1178 = vst.msk [vmem:[#allocation3 + $0x30] sm:$0xff] %vm1171_vm6, %v1088_v9 }
 0x199   : > { %v1098_v18 = vpop.permute.xlu2 %1097 }
 0x19a   : > { %1183 = vst.msk [vmem:[#allocation3 + $0x58] sm:$0xff] %vm1171_vm6, %v1098_v18  ;;  %v1411_v18 = vld [vmem:[#allocation2 + $0xc8] sm:$0xff] }
 0x19b   : > { %1302 = vrot.lane.b32.xlu1 %v6906_v14, %s4421_s28 }
 0x19d   : > { %1306 = vrot.lane.b32.xlu0 %v6904_v15, %s4421_s28  ;;  %v1090_v57 = vpop.permute.xlu1 %1089  ;;  %v1405_v15 = vld [vmem:[#allocation2 + $0x80] sm:$0xff] }
 0x19e   : > { %1179 = vst.msk [vmem:[#allocation3 + $0x38] sm:$0xff] %vm1171_vm6, %v1090_v57 }
 0x19f   : > { %v1094_v31 = vpop.permute.xlu0 %1093  ;;  %1298 = vrot.lane.b32.xlu2 %v6908_v20, %s4421_s28  ;;  %v1417_v20 = vld [vmem:[#allocation2 + $0x110] sm:$0xff] }
 0x1a0   : > { %1181 = vst.msk [vmem:[#allocation3 + $0x48] sm:$0xff] %vm1171_vm6, %v1094_v31 }
 0x1a1   : > { %v1104_v59 = vpop.permute.xlu2 %1103 }
 0x1a2   : > { %1186 = vst.msk [vmem:[#allocation3 + $0x70] sm:$0xff] %vm1171_vm6, %v1104_v59  ;;  %v1420_v59 = vld [vmem:[#allocation2 + $0x138] sm:$0xff] }
 0x1a3   : > { %1308 = vrot.lane.b32.xlu1 %v6909_v38, %s4421_s28 }
 0x1a5   : > { %1312 = vrot.lane.b32.xlu0 %v6907_v55, %s4421_s28  ;;  %v1096_v41 = vpop.permute.xlu1 %1095  ;;  %v1414_v55 = vld [vmem:[#allocation2 + $0xf0] sm:$0xff] }
 0x1a6   : > { %1182 = vst.msk [vmem:[#allocation3 + $0x50] sm:$0xff] %vm1171_vm6, %v1096_v41  ;;  %v1591_v41 = vld [vmem:[#allocation2 + $0x31] sm:$0xff] }
 0x1a7   : > { %v1100_v17 = vpop.permute.xlu0 %1099  ;;  %1304 = vrot.lane.b32.xlu2 %v6910_v37, %s4421_s28 }
 0x1a8   : > { %1184 = vst.msk [vmem:[#allocation3 + $0x60] sm:$0xff] %vm1171_vm6, %v1100_v17 }
 0x1a9   : > { %v1110_v28 = vpop.permute.xlu2 %1109 }
 0x1aa   : > { %1189 = vst.msk [vmem:[#allocation3 + $0x88] sm:$0xff] %vm1171_vm6, %v1110_v28 }
 0x1ab   : > { %1314 = vrot.lane.b32.xlu1 %v6911_v29, %s4421_s28 }
 0x1ad   : > { %1318 = vrot.lane.b32.xlu0 %v4998_v3, %s4421_s28  ;;  %v1102_v23 = vpop.permute.xlu1 %1101  ;;  %v6912_v3 = vld [vmem:[#allocation27_spill] sm:$0xff] }
 0x1ae   : > { %1185 = vst.msk [vmem:[#allocation3 + $0x68] sm:$0xff] %vm1171_vm6, %v1102_v23  ;;  %v1592_v23 = vld [vmem:[#allocation2 + $0x39] sm:$0xff] }
 0x1af   : > { %v1106_v1 = vpop.permute.xlu0 %1105  ;;  %1310 = vrot.lane.b32.xlu2 %v6912_v3, %s4421_s28 }
 0x1b0   : > { %1187 = vst.msk [vmem:[#allocation3 + $0x78] sm:$0xff] %vm1171_vm6, %v1106_v1 }
 0x1b1   : > { %v1116_v50 = vpop.permute.xlu2 %1115 }
 0x1b2   : > { %1192 = vst.msk [vmem:[#allocation3 + $0xa0] sm:$0xff] %vm1171_vm6, %v1116_v50  ;;  %v1429_v50 = vld [vmem:[#allocation2 + $0x1a0] sm:$0xff] }
 0x1b3   : > { %1320 = vrot.lane.b32.xlu1 %v6913_v43, %s4421_s28 }
 0x1b5   : > { %1324 = vrot.lane.b32.xlu0 %v5009_v30, %s4421_s28  ;;  %v1108_v52 = vpop.permute.xlu1 %1107 }
 0x1b6   : > { %1188 = vst.msk [vmem:[#allocation3 + $0x80] sm:$0xff] %vm1171_vm6, %v1108_v52  ;;  %v1595_v52 = vld [vmem:[#allocation2 + $0x61] sm:$0xff] }
 0x1b7   : > { %v1112_v48 = vpop.permute.xlu0 %1111  ;;  %1316 = vrot.lane.b32.xlu2 %v6914_v36, %s4421_s28 }
 0x1b8   : > { %1190 = vst.msk [vmem:[#allocation3 + $0x90] sm:$0xff] %vm1171_vm6, %v1112_v48 }
 0x1b9   : > { %v1122_v34 = vpop.permute.xlu2 %1121 }
 0x1ba   : > { %1195 = vst.msk [vmem:[#allocation3 + $0xb8] sm:$0xff] %vm1171_vm6, %v1122_v34  ;;  %v1598_v34 = vld [vmem:[#allocation2 + $0x81] sm:$0xff] }
 0x1bb   : > { %1326 = vrot.lane.b32.xlu1 %v6915_v26, %s4421_s28 }
 0x1bd   : > { %1330 = vrot.lane.b32.xlu0 %v5289_v35, %s4421_s28  ;;  %v1114_v44 = vpop.permute.xlu1 %1113 }
 0x1be   : > { %1191 = vst.msk [vmem:[#allocation3 + $0x98] sm:$0xff] %vm1171_vm6, %v1114_v44 }
 0x1bf   : > { %v1118_v30 = vpop.permute.xlu0 %1117  ;;  %1322 = vrot.lane.b32.xlu2 %v6916_v53, %s4421_s28 }
 0x1c0   : > { %1193 = vst.msk [vmem:[#allocation3 + $0xa8] sm:$0xff] %vm1171_vm6, %v1118_v30 }
 0x1c1   : > { %v1128_v7 = vpop.permute.xlu2 %1127 }
 0x1c2   : > { %1198 = vst.msk [vmem:[#allocation3 + $0xd0] sm:$0xff] %vm1171_vm6, %v1128_v7  ;;  %v1596_v7 = vld [vmem:[#allocation2 + $0x69] sm:$0xff] }
 0x1c3   : > { %1462 = vrot.lane.b32.xlu1 %v1398_v46, %s4422_s29  ;;  %v1603_v46 = vld [vmem:[#allocation2 + $0xc1] sm:$0xff] }
 0x1c5   : > { %1466 = vrot.lane.b32.xlu0 %v1400_v61, %s4422_s29  ;;  %v1120_v54 = vpop.permute.xlu1 %1119  ;;  %v1593_v61 = vld [vmem:[#allocation2 + $0x49] sm:$0xff] }
 0x1c6   : > { %1194 = vst.msk [vmem:[#allocation3 + $0xb0] sm:$0xff] %vm1171_vm6, %v1120_v54  ;;  %v1601_v54 = vld [vmem:[#allocation2 + $0xa9] sm:$0xff] }
 0x1c7   : > { %v1124_v45 = vpop.permute.xlu0 %1123  ;;  %1328 = vrot.lane.b32.xlu2 %v5311_v62, %s4421_s28 }
 0x1c8   : > { %1196 = vst.msk [vmem:[#allocation3 + $0xc0] sm:$0xff] %vm1171_vm6, %v1124_v45 }
 0x1c9   : > { %v1134_v63 = vpop.permute.xlu2 %1133 }
 0x1ca   : > { %1201 = vst.msk [vmem:[#allocation3 + $0xe8] sm:$0xff] %vm1171_vm6, %v1134_v63  ;;  %v1606_v63 = vld [vmem:[#allocation2 + $0xe1] sm:$0xff] }
 0x1cb   : > { %1468 = vrot.lane.b32.xlu1 %v4789_v58, %s4422_s29 }
 0x1cd   : > { %1472 = vrot.lane.b32.xlu0 %v4784_v56, %s4422_s29  ;;  %v1126_v9 = vpop.permute.xlu1 %1125  ;;  %v1399_v56 = vld [vmem:[#allocation2 + $0x38] sm:$0xff] }
 0x1ce   : > { %1197 = vst.msk [vmem:[#allocation3 + $0xc8] sm:$0xff] %vm1171_vm6, %v1126_v9 }
 0x1cf   : > { %v1130_v10 = vpop.permute.xlu0 %1129  ;;  %1464 = vrot.lane.b32.xlu2 %v1399_v56, %s4422_s29 }
 0x1d0   : > { %1199 = vst.msk [vmem:[#allocation3 + $0xd8] sm:$0xff] %vm1171_vm6, %v1130_v10 }
 0x1d1   : > { %v1269_v58 = vpop.permute.xlu2 %1268 }
 0x1d2   : > { %1365 = vst.msk [vmem:[#allocation3] sm:$0xff] %vm1364_vm7, %v1269_v58  ;;  %v1604_v58 = vld [vmem:[#allocation2 + $0xc9] sm:$0xff] }
 0x1d3   : > { %1474 = vrot.lane.b32.xlu1 %v4815_v6, %s4422_s29 }
 0x1d5   : > { %1478 = vrot.lane.b32.xlu0 %v4810_v4, %s4422_s29  ;;  %v1132_v8 = vpop.permute.xlu1 %1131  ;;  %v1402_v4 = vld [vmem:[#allocation2 + $0x60] sm:$0xff] }
 0x1d6   : > { %1200 = vst.msk [vmem:[#allocation3 + $0xe0] sm:$0xff] %vm1171_vm6, %v1132_v8 }
 0x1d7   : > { %v1136_v13 = vpop.permute.xlu0 %1135  ;;  %1470 = vrot.lane.b32.xlu2 %v1402_v4, %s4422_s29  ;;  %v1609_v4 = vld [vmem:[#allocation2 + $0x109] sm:$0xff] }
 0x1d8   : > { %1202 = vst.msk [vmem:[#allocation3 + $0xf0] sm:$0xff] %vm1171_vm6, %v1136_v13  ;;  %v1599_v13 = vld [vmem:[#allocation2 + $0x91] sm:$0xff] }
 0x1d9   : > { %v1275_v16 = vpop.permute.xlu2 %1274 }
 0x1da   : > { %1368 = vst.msk [vmem:[#allocation3 + $0x18] sm:$0xff] %vm1364_vm7, %v1275_v16 }
 0x1db   : > { %1480 = vrot.lane.b32.xlu1 %v4842_v33, %s4422_s29 }
 0x1dd   : > { %1484 = vrot.lane.b32.xlu0 %v4837_v27, %s4422_s29  ;;  %v1138_v6 = vpop.permute.xlu1 %1137 }
 0x1de   : > { %1203 = vst.msk [vmem:[#allocation3 + $0xf8] sm:$0xff] %vm1171_vm6, %v1138_v6  ;;  %v1602_v6 = vld [vmem:[#allocation2 + $0xb1] sm:$0xff] }
 0x1df   : > { %v1271_v12 = vpop.permute.xlu0 %1270  ;;  %1476 = vrot.lane.b32.xlu2 %v1405_v15, %s4422_s29  ;;  %v1607_v15 = vld [vmem:[#allocation2 + $0xf1] sm:$0xff] }
 0x1e0   : > { %1366 = vst.msk [vmem:[#allocation3 + $0x8] sm:$0xff] %vm1364_vm7, %v1271_v12 }
 0x1e1   : > { %v1281_v31 = vpop.permute.xlu2 %1280 }
 0x1e2   : > { %1371 = vst.msk [vmem:[#allocation3 + $0x30] sm:$0xff] %vm1364_vm7, %v1281_v31  ;;  %v1612_v31 = vld [vmem:[#allocation2 + $0x129] sm:$0xff] }
 0x1e3   : > { %1486 = vrot.lane.b32.xlu1 %v4869_v25, %s4422_s29 }
 0x1e5   : > { %1490 = vrot.lane.b32.xlu0 %v4864_v24, %s4422_s29  ;;  %v1273_v33 = vpop.permute.xlu1 %1272 }
 0x1e6   : > { %1367 = vst.msk [vmem:[#allocation3 + $0x10] sm:$0xff] %vm1364_vm7, %v1273_v33 }
 0x1e7   : > { %v1277_v27 = vpop.permute.xlu0 %1276  ;;  %1482 = vrot.lane.b32.xlu2 %v1408_v39, %s4422_s29 }
 0x1e8   : > { %1369 = vst.msk [vmem:[#allocation3 + $0x20] sm:$0xff] %vm1364_vm7, %v1277_v27 }
 0x1e9   : > { %v1287_v14 = vpop.permute.xlu2 %1286 }
 0x1ea   : > { %1374 = vst.msk [vmem:[#allocation3 + $0x48] sm:$0xff] %vm1364_vm7, %v1287_v14  ;;  %v1610_v14 = vld [vmem:[#allocation2 + $0x111] sm:$0xff] }
 0x1eb   : > { %1492 = vrot.lane.b32.xlu1 %v4896_v51, %s4422_s29 }
 0x1ed   : > { %1496 = vrot.lane.b32.xlu0 %v4891_v2, %s4422_s29  ;;  %v1279_v25 = vpop.permute.xlu1 %1278 }
 0x1ee   : > { %1370 = vst.msk [vmem:[#allocation3 + $0x28] sm:$0xff] %vm1364_vm7, %v1279_v25 }
 0x1ef   : > { %v1283_v24 = vpop.permute.xlu0 %1282  ;;  %1488 = vrot.lane.b32.xlu2 %v1411_v18, %s4422_s29  ;;  %v1615_v18 = vld [vmem:[#allocation2 + $0x151] sm:$0xff] }
 0x1f0   : > { %1372 = vst.msk [vmem:[#allocation3 + $0x38] sm:$0xff] %vm1364_vm7, %v1283_v24  ;;  %v1605_v24 = vld [vmem:[#allocation2 + $0xd9] sm:$0xff] }
 0x1f1   : > { %v1293_v57 = vpop.permute.xlu2 %1292 }
 0x1f2   : > { %1377 = vst.msk [vmem:[#allocation3 + $0x60] sm:$0xff] %vm1364_vm7, %v1293_v57 }
 0x1f3   : > { %1498 = vrot.lane.b32.xlu1 %v4923_v40, %s4422_s29 }
 0x1f5   : > { %1502 = vrot.lane.b32.xlu0 %v4918_v49, %s4422_s29  ;;  %v1285_v51 = vpop.permute.xlu1 %1284 }
 0x1f6   : > { %1373 = vst.msk [vmem:[#allocation3 + $0x40] sm:$0xff] %vm1364_vm7, %v1285_v51  ;;  %v1608_v51 = vld [vmem:[#allocation2 + $0xf9] sm:$0xff] }
 0x1f7   : > { %v1289_v2 = vpop.permute.xlu0 %1288  ;;  %1494 = vrot.lane.b32.xlu2 %v1414_v55, %s4422_s29  ;;  %v1613_v55 = vld [vmem:[#allocation2 + $0x139] sm:$0xff] }
 0x1f8   : > { %1375 = vst.msk [vmem:[#allocation3 + $0x50] sm:$0xff] %vm1364_vm7, %v1289_v2 }
 0x1f9   : > { %v1299_v17 = vpop.permute.xlu2 %1298 }
 0x1fa   : > { %1380 = vst.msk [vmem:[#allocation3 + $0x78] sm:$0xff] %vm1364_vm7, %v1299_v17  ;;  %v1618_v17 = vld [vmem:[#allocation2 + $0x171] sm:$0xff] }
 0x1fb   : > { %1504 = vrot.lane.b32.xlu1 %v4950_v0, %s4422_s29 }
 0x1fd   : > { %1508 = vrot.lane.b32.xlu0 %v4945_v42, %s4422_s29  ;;  %v1291_v40 = vpop.permute.xlu1 %1290 }
 0x1fe   : > { %1376 = vst.msk [vmem:[#allocation3 + $0x58] sm:$0xff] %vm1364_vm7, %v1291_v40 }
 0x1ff   : > { %v1295_v49 = vpop.permute.xlu0 %1294  ;;  %1500 = vrot.lane.b32.xlu2 %v1417_v20, %s4422_s29 }
 0x200   : > { %1378 = vst.msk [vmem:[#allocation3 + $0x68] sm:$0xff] %vm1364_vm7, %v1295_v49 }
 0x201   : > { %v1305_v38 = vpop.permute.xlu2 %1304 }
 0x202   : > { %1383 = vst.msk [vmem:[#allocation3 + $0x90] sm:$0xff] %vm1364_vm7, %v1305_v38  ;;  %v1616_v38 = vld [vmem:[#allocation2 + $0x159] sm:$0xff] }
 0x203   : > { %1510 = vrot.lane.b32.xlu1 %v4976_v21, %s4422_s29 }
 0x205   : > { %1514 = vrot.lane.b32.xlu0 %v4972_v22, %s4422_s29  ;;  %v1297_v0 = vpop.permute.xlu1 %1296 }
 0x206   : > { %1379 = vst.msk [vmem:[#allocation3 + $0x70] sm:$0xff] %vm1364_vm7, %v1297_v0 }
 0x207   : > { %v1301_v42 = vpop.permute.xlu0 %1300  ;;  %1506 = vrot.lane.b32.xlu2 %v1420_v59, %s4422_s29  ;;  %v1621_v59 = vld [vmem:[#allocation2 + $0x199] sm:$0xff] }
 0x208   : > { %1381 = vst.msk [vmem:[#allocation3 + $0x80] sm:$0xff] %vm1364_vm7, %v1301_v42  ;;  %v1611_v42 = vld [vmem:[#allocation2 + $0x121] sm:$0xff] }
 0x209   : > { %v1311_v21 = vpop.permute.xlu2 %1310 }
 0x20a   : > { %1386 = vst.msk [vmem:[#allocation3 + $0xa8] sm:$0xff] %vm1364_vm7, %v1311_v21  ;;  %v1614_v21 = vld [vmem:[#allocation2 + $0x141] sm:$0xff] }
 0x20b   : > { %1516 = vrot.lane.b32.xlu1 %v4992_v19, %s4422_s29  ;;  %v1594_v19 = vld [vmem:[#allocation2 + $0x51] sm:$0xff] }
 0x20d   : > { %1520 = vrot.lane.b32.xlu0 %v5116_v47, %s4422_s29  ;;  %v1303_v1 = vpop.permute.xlu1 %1302  ;;  %v1428_v47 = vld [vmem:[#allocation2 + $0x198] sm:$0xff] }
 0x20e   : > { %1382 = vst.msk [vmem:[#allocation3 + $0x88] sm:$0xff] %vm1364_vm7, %v1303_v1 }
 0x20f   : > { %v1307_v22 = vpop.permute.xlu0 %1306  ;;  %1512 = vrot.lane.b32.xlu2 %v4947_v32, %s4422_s29  ;;  %v1597_v32 = vld [vmem:[#allocation2 + $0x79] sm:$0xff] }
 0x210   : > { %1384 = vst.msk [vmem:[#allocation3 + $0x98] sm:$0xff] %vm1364_vm7, %v1307_v22 }
 0x211   : > { %v1317_v29 = vpop.permute.xlu2 %1316 }
 0x212   : > { %1389 = vst.msk [vmem:[#allocation3 + $0xc0] sm:$0xff] %vm1364_vm7, %v1317_v29  ;;  %v1617_v29 = vld [vmem:[#allocation2 + $0x169] sm:$0xff] }
 0x213   : > { %1522 = vrot.lane.b32.xlu1 %v1428_v47, %s4422_s29  ;;  %v1785_v47 = vld [vmem:[#allocation2 + $0x3a] sm:$0xff] }
 0x215   : > { %1655 = vrot.lane.b32.xlu0 %v1591_v41, %s4423_s30  ;;  %v1309_v28 = vpop.permute.xlu1 %1308 }
 0x216   : > { %1385 = vst.msk [vmem:[#allocation3 + $0xa0] sm:$0xff] %vm1364_vm7, %v1309_v28  ;;  %v1622_v28 = vld [vmem:[#allocation2 + $0x1a1] sm:$0xff] }
 0x217   : > { %v1313_v37 = vpop.permute.xlu0 %1312  ;;  %1518 = vrot.lane.b32.xlu2 %v5096_v5, %s4422_s29  ;;  %v1600_v5 = vld [vmem:[#allocation2 + $0x99] sm:$0xff] }
 0x218   : > { %1387 = vst.msk [vmem:[#allocation3 + $0xb0] sm:$0xff] %vm1364_vm7, %v1313_v37 }
 0x219   : > { %v1323_v3 = vpop.permute.xlu2 %1322 }
 0x21a   : > { %1392 = vst.msk [vmem:[#allocation3 + $0xd8] sm:$0xff] %vm1364_vm7, %v1323_v3  ;;  %v1786_v3 = vld [vmem:[#allocation2 + $0x4a] sm:$0xff] }
 0x21b   : > { %1657 = vrot.lane.b32.xlu1 %v1592_v23, %s4423_s30 }
 0x21d   : > { %1661 = vrot.lane.b32.xlu0 %v1594_v19, %s4423_s30  ;;  %v1315_v43 = vpop.permute.xlu1 %1314 }
 0x21e   : > { %1388 = vst.msk [vmem:[#allocation3 + $0xb8] sm:$0xff] %vm1364_vm7, %v1315_v43 }
 0x21f   : > { %v1319_v48 = vpop.permute.xlu0 %1318  ;;  %1524 = vrot.lane.b32.xlu2 %v1429_v50, %s4422_s29  ;;  %v1791_v50 = vld [vmem:[#allocation2 + $0x82] sm:$0xff] }
 0x220   : > { %1390 = vst.msk [vmem:[#allocation3 + $0xc8] sm:$0xff] %vm1364_vm7, %v1319_v48 }
 0x221   : > { %v1329_v36 = vpop.permute.xlu2 %1328 }
 0x222   : > { %1395 = vst.msk [vmem:[#allocation3 + $0xf0] sm:$0xff] %vm1364_vm7, %v1329_v36  ;;  %v1789_v36 = vld [vmem:[#allocation2 + $0x6a] sm:$0xff] }
 0x223   : > { %1663 = vrot.lane.b32.xlu1 %v1595_v52, %s4423_s30 }
 0x225   : > { %1667 = vrot.lane.b32.xlu0 %v1597_v32, %s4423_s30  ;;  %v1321_v26 = vpop.permute.xlu1 %1320 }
 0x226   : > { %1391 = vst.msk [vmem:[#allocation3 + $0xd0] sm:$0xff] %vm1364_vm7, %v1321_v26 }
 0x227   : > { %v1325_v30 = vpop.permute.xlu0 %1324  ;;  %1659 = vrot.lane.b32.xlu2 %v1593_v61, %s4423_s30 }
 0x228   : > { %1393 = vst.msk [vmem:[#allocation3 + $0xe0] sm:$0xff] %vm1364_vm7, %v1325_v30 }
 0x229   : > { %v1465_v45 = vpop.permute.xlu2 %1464 }
 0x22a   : > { %1560 = vst.msk [vmem:[#allocation3 + $0x8] sm:$0xff] %vm1558_vm8, %v1465_v45 }
 0x22b   : > { %1669 = vrot.lane.b32.xlu1 %v1598_v34, %s4423_s30 }
 0x22d   : > { %1673 = vrot.lane.b32.xlu0 %v1600_v5, %s4423_s30  ;;  %v1327_v53 = vpop.permute.xlu1 %1326  ;;  %v1784_v5 = vld [vmem:[#allocation2 + $0x32] sm:$0xff] }
 0x22e   : > { %1394 = vst.msk [vmem:[#allocation3 + $0xe8] sm:$0xff] %vm1364_vm7, %v1327_v53  ;;  %v1797_v53 = vld [vmem:[#allocation2 + $0xca] sm:$0xff] }
 0x22f   : > { %v1331_v44 = vpop.permute.xlu0 %1330  ;;  %1665 = vrot.lane.b32.xlu2 %v1596_v7, %s4423_s30 }
 0x230   : > { %1396 = vst.msk [vmem:[#allocation3 + $0xf8] sm:$0xff] %vm1364_vm7, %v1331_v44  ;;  %v1787_v44 = vld [vmem:[#allocation2 + $0x52] sm:$0xff] }
 0x231   : > { %v1471_v9 = vpop.permute.xlu2 %1470 }
 0x232   : > { %1563 = vst.msk [vmem:[#allocation3 + $0x20] sm:$0xff] %vm1558_vm8, %v1471_v9 }
 0x233   : > { %1675 = vrot.lane.b32.xlu1 %v1601_v54, %s4423_s30 }
 0x235   : > { %1679 = vrot.lane.b32.xlu0 %v1603_v46, %s4423_s30  ;;  %v1463_v56 = vpop.permute.xlu1 %1462  ;;  %v1792_v46 = vld [vmem:[#allocation2 + $0x92] sm:$0xff] }
 0x236   : > { %1559 = vst.msk [vmem:[#allocation3] sm:$0xff] %vm1558_vm8, %v1463_v56  ;;  %v1800_v56 = vld [vmem:[#allocation2 + $0xf2] sm:$0xff] }
 0x237   : > { %v1467_v10 = vpop.permute.xlu0 %1466  ;;  %1671 = vrot.lane.b32.xlu2 %v1599_v13, %s4423_s30 }
 0x238   : > { %1561 = vst.msk [vmem:[#allocation3 + $0x10] sm:$0xff] %vm1558_vm8, %v1467_v10  ;;  %v1790_v10 = vld [vmem:[#allocation2 + $0x7a] sm:$0xff] }
 0x239   : > { %v1477_v12 = vpop.permute.xlu2 %1476 }
 0x23a   : > { %1566 = vst.msk [vmem:[#allocation3 + $0x38] sm:$0xff] %vm1558_vm8, %v1477_v12 }
 0x23b   : > { %1681 = vrot.lane.b32.xlu1 %v1604_v58, %s4423_s30 }
 0x23d   : > { %1685 = vrot.lane.b32.xlu0 %v1606_v63, %s4423_s30  ;;  %v1469_v16 = vpop.permute.xlu1 %1468  ;;  %v1795_v63 = vld [vmem:[#allocation2 + $0xb2] sm:$0xff] }
 0x23e   : > { %1562 = vst.msk [vmem:[#allocation3 + $0x18] sm:$0xff] %vm1558_vm8, %v1469_v16  ;;  %v1803_v16 = vld [vmem:[#allocation2 + $0x112] sm:$0xff] }
 0x23f   : > { %v1473_v8 = vpop.permute.xlu0 %1472  ;;  %1677 = vrot.lane.b32.xlu2 %v1602_v6, %s4423_s30 }
 0x240   : > { %1564 = vst.msk [vmem:[#allocation3 + $0x28] sm:$0xff] %vm1558_vm8, %v1473_v8  ;;  %v1793_v8 = vld [vmem:[#allocation2 + $0x9a] sm:$0xff] }
 0x241   : > { %v1483_v33 = vpop.permute.xlu2 %1482 }
 0x242   : > { %1569 = vst.msk [vmem:[#allocation3 + $0x50] sm:$0xff] %vm1558_vm8, %v1483_v33 }
 0x243   : > { %1687 = vrot.lane.b32.xlu1 %v1607_v15, %s4423_s30 }
 0x245   : > { %1691 = vrot.lane.b32.xlu0 %v1609_v4, %s4423_s30  ;;  %v1475_v39 = vpop.permute.xlu1 %1474  ;;  %v1798_v4 = vld [vmem:[#allocation2 + $0xda] sm:$0xff] }
 0x246   : > { %1565 = vst.msk [vmem:[#allocation3 + $0x30] sm:$0xff] %vm1558_vm8, %v1475_v39 }
 0x247   : > { %v1479_v27 = vpop.permute.xlu0 %1478  ;;  %1683 = vrot.lane.b32.xlu2 %v1605_v24, %s4423_s30 }
 0x248   : > { %1567 = vst.msk [vmem:[#allocation3 + $0x40] sm:$0xff] %vm1558_vm8, %v1479_v27  ;;  %v1796_v27 = vld [vmem:[#allocation2 + $0xc2] sm:$0xff] }
 0x249   : > { %v1489_v2 = vpop.permute.xlu2 %1488 }
 0x24a   : > { %1572 = vst.msk [vmem:[#allocation3 + $0x68] sm:$0xff] %vm1558_vm8, %v1489_v2  ;;  %v1804_v2 = vld [vmem:[#allocation2 + $0x122] sm:$0xff] }
 0x24b   : > { %1693 = vrot.lane.b32.xlu1 %v1610_v14, %s4423_s30  ;;  %v1806_v14 = vld [vmem:[#allocation2 + $0x13a] sm:$0xff] }
 0x24d   : > { %1697 = vrot.lane.b32.xlu0 %v1612_v31, %s4423_s30  ;;  %v1481_v57 = vpop.permute.xlu1 %1480  ;;  %v1801_v31 = vld [vmem:[#allocation2 + $0xfa] sm:$0xff] }
 0x24e   : > { %1568 = vst.msk [vmem:[#allocation3 + $0x48] sm:$0xff] %vm1558_vm8, %v1481_v57 }
 0x24f   : > { %v1485_v25 = vpop.permute.xlu0 %1484  ;;  %1689 = vrot.lane.b32.xlu2 %v1608_v51, %s4423_s30 }
 0x250   : > { %1570 = vst.msk [vmem:[#allocation3 + $0x58] sm:$0xff] %vm1558_vm8, %v1485_v25  ;;  %v1799_v25 = vld [vmem:[#allocation2 + $0xe2] sm:$0xff] }
 0x251   : > { %v1495_v40 = vpop.permute.xlu2 %1494 }
 0x252   : > { %1575 = vst.msk [vmem:[#allocation3 + $0x80] sm:$0xff] %vm1558_vm8, %v1495_v40 }
 0x253   : > { %1699 = vrot.lane.b32.xlu1 %v1613_v55, %s4423_s30  ;;  %v1802_v55 = vld [vmem:[#allocation2 + $0x10a] sm:$0xff] }
 0x255   : > { %1703 = vrot.lane.b32.xlu0 %v1615_v18, %s4423_s30  ;;  %v1487_v20 = vpop.permute.xlu1 %1486 }
 0x256   : > { %1571 = vst.msk [vmem:[#allocation3 + $0x60] sm:$0xff] %vm1558_vm8, %v1487_v20 }
 0x257   : > { %v1491_v49 = vpop.permute.xlu0 %1490  ;;  %1695 = vrot.lane.b32.xlu2 %v1611_v42, %s4423_s30  ;;  %v2013_v42 = vld [vmem:[%s6786_s1 + $0x20] sm:$0xf] }
 0x258   : > { %1573 = vst.msk [vmem:[#allocation3 + $0x70] sm:$0xff] %vm1558_vm8, %v1491_v49  ;;  %4309 = vmatpush.msk.msra.mxu0 %vm2115_vm10, %v2013_v42  ;;  %4379 = vmatpush.msk.msra.mxu2 %vm2115_vm10, %v2013_v42 }
 0x259   : > { %v1501_v22 = vpop.permute.xlu2 %1500 }
 0x25a   : > { %1578 = vst.msk [vmem:[#allocation3 + $0x98] sm:$0xff] %vm1558_vm8, %v1501_v22 }
 0x25b   : > { %1705 = vrot.lane.b32.xlu1 %v1616_v38, %s4423_s30  ;;  %v1805_v38 = vld [vmem:[#allocation2 + $0x12a] sm:$0xff] }
 0x25d   : > { %1709 = vrot.lane.b32.xlu0 %v1618_v17, %s4423_s30  ;;  %v1493_v41 = vpop.permute.xlu1 %1492  ;;  %v1807_v17 = vld [vmem:[#allocation2 + $0x142] sm:$0xff] }
 0x25e   : > { %1574 = vst.msk [vmem:[#allocation3 + $0x78] sm:$0xff] %vm1558_vm8, %v1493_v41  ;;  %v2012_v41 = vld [vmem:[%s6786_s1 + $0x18] sm:$0xff] }
 0x25f   : > { %v1497_v0 = vpop.permute.xlu0 %1496  ;;  %1701 = vrot.lane.b32.xlu2 %v1614_v21, %s4423_s30  ;;  %v2011_v21 = vld [vmem:[%s6786_s1 + $0x10] sm:$0xff]  ;;  %2131 = vmatpush.msra.mxu0 %v2012_v41 }
 0x260   : > { %1576 = vst.msk [vmem:[#allocation3 + $0x88] sm:$0xff] %vm1558_vm8, %v1497_v0  ;;  %4380 = vmatpush.msra.mxu2 %v2012_v41 }
 0x261   : > { %v1507_v37 = vpop.permute.xlu2 %1506  ;;  %2132 = vmatpush.msra.mxu0 %v2011_v21 }
 0x262   : > { %1581 = vst.msk [vmem:[#allocation3 + $0xb0] sm:$0xff] %vm1558_vm8, %v1507_v37  ;;  %v2010_v37 = vld [vmem:[%s6786_s1 + $0x8] sm:$0xff]  ;;  %4381 = vmatpush.msra.mxu2 %v2011_v21 }
 0x263   : > { %1711 = vrot.lane.b32.xlu1 %v5186_v11, %s4423_s30  ;;  %v1788_v11 = vld [vmem:[#allocation2 + $0x62] sm:$0xff]  ;;  %2133 = vmatpush.msra.mxu0 %v2010_v37 }
 0x264   : > { %4382 = vmatpush.msra.mxu2 %v2010_v37  ;;  %v1815_v37 = vld [vmem:[#allocation2 + $0x1a2] sm:$0xff] }
 0x265   : > { %1715 = vrot.lane.b32.xlu0 %v1621_v59, %s4423_s30  ;;  %v1499_v19 = vpop.permute.xlu1 %1498 }
 0x266   : > { %1577 = vst.msk [vmem:[#allocation3 + $0x90] sm:$0xff] %vm1558_vm8, %v1499_v19  ;;  %v2009_v19 = vld [vmem:[%s6786_s1] sm:$0xff] }
 0x267   : > { %v1503_v1 = vpop.permute.xlu0 %1502  ;;  %1707 = vrot.lane.b32.xlu2 %v1617_v29, %s4423_s30  ;;  %2134 = vmatpush.msra.mxu0 %v2009_v19 }
 0x268   : > { %1579 = vst.msk [vmem:[#allocation3 + $0xa0] sm:$0xff] %vm1558_vm8, %v1503_v1  ;;  %v1809_v1 = vld [vmem:[#allocation2 + $0x15a] sm:$0xff]  ;;  %4383 = vmatpush.msra.mxu2 %v2009_v19 }
 0x269   : > { %v1513_v48 = vpop.permute.xlu2 %1512 }
 0x26a   : > { %1584 = vst.msk [vmem:[#allocation3 + $0xc8] sm:$0xff] %vm1558_vm8, %v1513_v48 }
 0x26b   : > { %1717 = vrot.lane.b32.xlu1 %v1622_v28, %s4423_s30 }
 0x26d   : > { %1850 = vrot.lane.b32.xlu0 %v1785_v47, %s4424_s6  ;;  %v1505_v32 = vpop.permute.xlu1 %1504 }
 0x26e   : > { %1580 = vst.msk [vmem:[#allocation3 + $0xa8] sm:$0xff] %vm1558_vm8, %v1505_v32 }
 0x26f   : > { %v1509_v23 = vpop.permute.xlu0 %1508  ;;  %1713 = vrot.lane.b32.xlu2 %v5201_v60, %s4423_s30  ;;  %v1794_v60 = vld [vmem:[#allocation2 + $0xaa] sm:$0xff] }
 0x270   : > { %1582 = vst.msk [vmem:[#allocation3 + $0xb8] sm:$0xff] %vm1558_vm8, %v1509_v23  ;;  %v1810_v23 = vld [vmem:[#allocation2 + $0x16a] sm:$0xff] }
 0x271   : > { %v1519_v52 = vpop.permute.xlu2 %1518 }
 0x272   : > { %1587 = vst.msk [vmem:[#allocation3 + $0xe0] sm:$0xff] %vm1558_vm8, %v1519_v52 }
 0x273   : > { %1852 = vrot.lane.b32.xlu1 %v1786_v3, %s4424_s6  ;;  %v1808_v3 = vld [vmem:[#allocation2 + $0x152] sm:$0xff] }
 0x275   : > { %1856 = vrot.lane.b32.xlu0 %v1788_v11, %s4424_s6  ;;  %v1511_v30 = vpop.permute.xlu1 %1510 }
 0x276   : > { %1583 = vst.msk [vmem:[#allocation3 + $0xc0] sm:$0xff] %vm1558_vm8, %v1511_v30 }
 0x277   : > { %v1515_v43 = vpop.permute.xlu0 %1514  ;;  %1848 = vrot.lane.b32.xlu2 %v1784_v5, %s4424_s6 }
 0x278   : > { %1585 = vst.msk [vmem:[#allocation3 + $0xd0] sm:$0xff] %vm1558_vm8, %v1515_v43 }
 0x279   : > { %v1525_v61 = vpop.permute.xlu2 %1524 }
 0x27a   : > { %1590 = vst.msk [vmem:[#allocation3 + $0xf8] sm:$0xff] %vm1558_vm8, %v1525_v61  ;;  %v1811_v61 = vld [vmem:[#allocation2 + $0x172] sm:$0xff] }
 0x27b   : > { %1858 = vrot.lane.b32.xlu1 %v1789_v36, %s4424_s6 }
 0x27d   : > { %1862 = vrot.lane.b32.xlu0 %v1791_v50, %s4424_s6  ;;  %v1517_v34 = vpop.permute.xlu1 %1516 }
 0x27e   : > { %1586 = vst.msk [vmem:[#allocation3 + $0xd8] sm:$0xff] %vm1558_vm8, %v1517_v34 }
 0x27f   : > { %v1521_v26 = vpop.permute.xlu0 %1520  ;;  %1854 = vrot.lane.b32.xlu2 %v1787_v44, %s4424_s6 }
 0x280   : > { %1588 = vst.msk [vmem:[#allocation3 + $0xe8] sm:$0xff] %vm1558_vm8, %v1521_v26 }
 0x281   : > { %v1660_v7 = vpop.permute.xlu2 %1659 }
 0x282   : > { %1754 = vst.msk [vmem:[#allocation3 + $0x10] sm:$0xff] %vm1751_vm9, %v1660_v7 }
 0x283   : > { %1864 = vrot.lane.b32.xlu1 %v1792_v46, %s4424_s6 }
 0x285   : > { %1868 = vrot.lane.b32.xlu0 %v1794_v60, %s4424_s6  ;;  %v1523_v54 = vpop.permute.xlu1 %1522 }
 0x286   : > { %1589 = vst.msk [vmem:[#allocation3 + $0xf0] sm:$0xff] %vm1558_vm8, %v1523_v54 }
 0x287   : > { %v1656_v45 = vpop.permute.xlu0 %1655  ;;  %1860 = vrot.lane.b32.xlu2 %v1790_v10, %s4424_s6 }
 0x288   : > { %1752 = vst.msk [vmem:[#allocation3] sm:$0xff] %vm1751_vm9, %v1656_v45 }
 0x289   : > { %v1666_v13 = vpop.permute.xlu2 %1665 }
 0x28a   : > { %1757 = vst.msk [vmem:[#allocation3 + $0x28] sm:$0xff] %vm1751_vm9, %v1666_v13 }
 0x28b   : > { %1870 = vrot.lane.b32.xlu1 %v1795_v63, %s4424_s6 }
 0x28d   : > { %1874 = vrot.lane.b32.xlu0 %v1797_v53, %s4424_s6  ;;  %v1658_v58 = vpop.permute.xlu1 %1657 }
 0x28e   : > { %1753 = vst.msk [vmem:[#allocation3 + $0x8] sm:$0xff] %vm1751_vm9, %v1658_v58 }
 0x28f   : > { %v1662_v9 = vpop.permute.xlu0 %1661  ;;  %1866 = vrot.lane.b32.xlu2 %v1793_v8, %s4424_s6 }
 0x290   : > { %1755 = vst.msk [vmem:[#allocation3 + $0x18] sm:$0xff] %vm1751_vm9, %v1662_v9 }
 0x291   : > { %v1672_v6 = vpop.permute.xlu2 %1671 }
 0x292   : > { %1760 = vst.msk [vmem:[#allocation3 + $0x40] sm:$0xff] %vm1751_vm9, %v1672_v6 }
 0x293   : > { %1876 = vrot.lane.b32.xlu1 %v1798_v4, %s4424_s6 }
 0x295   : > { %1880 = vrot.lane.b32.xlu0 %v1800_v56, %s4424_s6  ;;  %v1664_v15 = vpop.permute.xlu1 %1663 }
 0x296   : > { %1756 = vst.msk [vmem:[#allocation3 + $0x20] sm:$0xff] %vm1751_vm9, %v1664_v15 }
 0x297   : > { %v1668_v12 = vpop.permute.xlu0 %1667  ;;  %1872 = vrot.lane.b32.xlu2 %v1796_v27, %s4424_s6 }
 0x298   : > { %1758 = vst.msk [vmem:[#allocation3 + $0x30] sm:$0xff] %vm1751_vm9, %v1668_v12 }
 0x299   : > { %v1678_v39 = vpop.permute.xlu2 %1677 }
 0x29a   : > { %1763 = vst.msk [vmem:[#allocation3 + $0x58] sm:$0xff] %vm1751_vm9, %v1678_v39 }
 0x29b   : > { %1882 = vrot.lane.b32.xlu1 %v1801_v31, %s4424_s6 }
 0x29d   : > { %1886 = vrot.lane.b32.xlu0 %v1803_v16, %s4424_s6  ;;  %v1670_v24 = vpop.permute.xlu1 %1669 }
 0x29e   : > { %1759 = vst.msk [vmem:[#allocation3 + $0x38] sm:$0xff] %vm1751_vm9, %v1670_v24 }
 0x29f   : > { %v1674_v33 = vpop.permute.xlu0 %1673  ;;  %1878 = vrot.lane.b32.xlu2 %v1799_v25, %s4424_s6 }
 0x2a0   : > { %1761 = vst.msk [vmem:[#allocation3 + $0x48] sm:$0xff] %vm1751_vm9, %v1674_v33 }
 0x2a1   : > { %v1684_v57 = vpop.permute.xlu2 %1683 }
 0x2a2   : > { %1766 = vst.msk [vmem:[#allocation3 + $0x70] sm:$0xff] %vm1751_vm9, %v1684_v57 }
 0x2a3   : > { %1888 = vrot.lane.b32.xlu1 %v1804_v2, %s4424_s6 }
 0x2a5   : > { %1892 = vrot.lane.b32.xlu0 %v1806_v14, %s4424_s6  ;;  %v1676_v51 = vpop.permute.xlu1 %1675 }
 0x2a6   : > { %1762 = vst.msk [vmem:[#allocation3 + $0x50] sm:$0xff] %vm1751_vm9, %v1676_v51 }
 0x2a7   : > { %v1680_v18 = vpop.permute.xlu0 %1679  ;;  %1884 = vrot.lane.b32.xlu2 %v1802_v55, %s4424_s6 }
 0x2a8   : > { %1764 = vst.msk [vmem:[#allocation3 + $0x60] sm:$0xff] %vm1751_vm9, %v1680_v18 }
 0x2a9   : > { %v1690_v40 = vpop.permute.xlu2 %1689 }
 0x2aa   : > { %1769 = vst.msk [vmem:[#allocation3 + $0x88] sm:$0xff] %vm1751_vm9, %v1690_v40 }
 0x2ab   : > { %1894 = vrot.lane.b32.xlu1 %v1807_v17, %s4424_s6 }
 0x2ad   : > { %v1682_v20 = vpop.permute.xlu1 %1681  ;;  %1898 = vrot.lane.b32.xlu0 %v1809_v1, %s4424_s6 }
 0x2ae   : > { %1765 = vst.msk [vmem:[#allocation3 + $0x68] sm:$0xff] %vm1751_vm9, %v1682_v20 }
 0x2af   : > { %v1686_v49 = vpop.permute.xlu0 %1685  ;;  %1890 = vrot.lane.b32.xlu2 %v1805_v38, %s4424_s6 }
 0x2b0   : > { %1767 = vst.msk [vmem:[#allocation3 + $0x78] sm:$0xff] %vm1751_vm9, %v1686_v49 }
 0x2b1   : > { %v1696_v59 = vpop.permute.xlu2 %1695 }
 0x2b2   : > { %1772 = vst.msk [vmem:[#allocation3 + $0xa0] sm:$0xff] %vm1751_vm9, %v1696_v59 }
 0x2b3   : > { %1900 = vrot.lane.b32.xlu1 %v1810_v23, %s4424_s6  ;;  %v1814_v23 = vld [vmem:[#allocation2 + $0x19a] sm:$0xff] }
 0x2b5   : > { %v1688_v22 = vpop.permute.xlu1 %1687  ;;  %1904 = vrot.lane.b32.xlu0 %v5311_v62, %s4424_s6 }
 0x2b6   : > { %1768 = vst.msk [vmem:[#allocation3 + $0x80] sm:$0xff] %vm1751_vm9, %v1688_v22 }
 0x2b7   : > { %v1692_v0 = vpop.permute.xlu0 %1691  ;;  %1896 = vrot.lane.b32.xlu2 %v1808_v3, %s4424_s6 }
 0x2b8   : > { %1770 = vst.msk [vmem:[#allocation3 + $0x90] sm:$0xff] %vm1751_vm9, %v1692_v0 }
 0x2b9   : > { %v1702_v29 = vpop.permute.xlu2 %1701 }
 0x2ba   : > { %1775 = vst.msk [vmem:[#allocation3 + $0xb8] sm:$0xff] %vm1751_vm9, %v1702_v29 }
 0x2bb   : > { %1906 = vrot.lane.b32.xlu1 %v5289_v35, %s4424_s6 }
 0x2bd   : > { %v1694_v28 = vpop.permute.xlu1 %1693  ;;  %1910 = vrot.lane.b32.xlu0 %v1815_v37, %s4424_s6 }
 0x2be   : > { %1771 = vst.msk [vmem:[#allocation3 + $0x98] sm:$0xff] %vm1751_vm9, %v1694_v28 }
 0x2bf   : > { %v1698_v47 = vpop.permute.xlu0 %1697  ;;  %1902 = vrot.lane.b32.xlu2 %v1811_v61, %s4424_s6 }
 0x2c0   : > { %1773 = vst.msk [vmem:[#allocation3 + $0xa8] sm:$0xff] %vm1751_vm9, %v1698_v47 }
 0x2c1   : > { %v1708_v48 = vpop.permute.xlu2 %1707 }
 0x2c2   : > { %1778 = vst.msk [vmem:[#allocation3 + $0xd0] sm:$0xff] %vm1751_vm9, %v1708_v48 }
 0x2c5   : > { %v1700_v32 = vpop.permute.xlu1 %1699 }
 0x2c6   : > { %1774 = vst.msk [vmem:[#allocation3 + $0xb0] sm:$0xff] %vm1751_vm9, %v1700_v32 }
 0x2c7   : > { %v1704_v11 = vpop.permute.xlu0 %1703  ;;  %1908 = vrot.lane.b32.xlu2 %v1814_v23, %s4424_s6 }
 0x2c8   : > { %1776 = vst.msk [vmem:[#allocation3 + $0xc0] sm:$0xff] %vm1751_vm9, %v1704_v11  ;;  %v2360_v11 = vld [vmem:[#allocation2 + $0x1] sm:$0xff] }
 0x2c9   : > { %v1714_v50 = vpop.permute.xlu2 %1713  ;;  %2424 = vrot.lane.b32.xlu1 %v2360_v11, %s4417_s24 }
 0x2ca   : > { %1781 = vst.msk [vmem:[#allocation3 + $0xe8] sm:$0xff] %vm1751_vm9, %v1714_v50 }
 0x2cd   : > { %v1706_v62 = vpop.permute.xlu1 %1705 }
 0x2ce   : > { %1777 = vst.msk [vmem:[#allocation3 + $0xc8] sm:$0xff] %vm1751_vm9, %v1706_v62 }
 0x2cf   : > { %v1710_v43 = vpop.permute.xlu0 %1709 }
 0x2d0   : > { %1779 = vst.msk [vmem:[#allocation3 + $0xd8] sm:$0xff] %vm1751_vm9, %v1710_v43  ;;  %v2361_v43 = vld [vmem:[#allocation2 + $0x9] sm:$0xff] }
 0x2d1   : > { %v1849_v30 = vpop.permute.xlu2 %1848  ;;  %2426 = vrot.lane.b32.xlu2 %v2361_v43, %s4417_s24 }
 0x2d2   : > { %1945 = vst.msk [vmem:[#allocation3] sm:$0xff] %vm1944_vm11, %v1849_v30 }
 0x2d5   : > { %v1712_v5 = vpop.permute.xlu1 %1711 }
 0x2d6   : > { %1780 = vst.msk [vmem:[#allocation3 + $0xe0] sm:$0xff] %vm1751_vm9, %v1712_v5 }
 0x2d7   : > { %v1716_v52 = vpop.permute.xlu0 %1715 }
 0x2d8   : > { %1782 = vst.msk [vmem:[#allocation3 + $0xf0] sm:$0xff] %vm1751_vm9, %v1716_v52  ;;  %v5611_v52 = vld [vmem:[%s6787_s2] ss:$0 sm:$0xff] }
 0x2d9   : > { %v1977_v36 = vld [vmem:[#allocation3] sm:$0xff]  ;;  %v1855_v26 = vpop.permute.xlu2 %1854 }
 0x2da   : > { %4310 = vmatmul.msk.f32.vlgmr.msra.gmra.mxu0 %vm2018_vm12, %v1977_v36  ;;  %1948 = vst.msk [vmem:[#allocation3 + $0x18] sm:$0xff] %vm1944_vm11, %v1855_v26 }
 0x2dd   : > { %v1718_v60 = vpop.permute.xlu1 %1717 }
 0x2de   : > { %1783 = vst.msk [vmem:[#allocation3 + $0xf8] sm:$0xff] %vm1751_vm9, %v1718_v60 }
 0x2df   : > { %v1851_v35 = vpop.permute.xlu0 %1850 }
 0x2e0   : > { %1946 = vst.msk [vmem:[#allocation3 + $0x8] sm:$0xff] %vm1944_vm11, %v1851_v35 }
 0x2e1   : > { %v1861_v46 = vpop.permute.xlu2 %1860  ;;  %v1980_v9 = vld [vmem:[#allocation3 + $0x18] sm:$0xff] }
 0x2e2   : > { %1951 = vst.msk [vmem:[#allocation3 + $0x30] sm:$0xff] %vm1944_vm11, %v1861_v46 }
 0x2e5   : > { %v1853_v45 = vpop.permute.xlu1 %1852 }
 0x2e6   : > { %1947 = vst.msk [vmem:[#allocation3 + $0x10] sm:$0xff] %vm1944_vm11, %v1853_v45 }
 0x2e7   : > { %v1857_v34 = vpop.permute.xlu0 %1856  ;;  %v1978_v44 = vld [vmem:[#allocation3 + $0x8] sm:$0xff] }
 0x2e8   : > { %1949 = vst.msk [vmem:[#allocation3 + $0x20] sm:$0xff] %vm1944_vm11, %v1857_v34  ;;  %4311 = vmatmul.msk.f32.gmra.mxu0 %vm2018_vm12, %v1978_v44 }
 0x2e9   : > { %v1867_v7 = vpop.permute.xlu2 %1866  ;;  %v1983_v14 = vld [vmem:[#allocation3 + $0x30] sm:$0xff] }
 0x2ea   : > { %1954 = vst.msk [vmem:[#allocation3 + $0x48] sm:$0xff] %vm1944_vm11, %v1867_v7 }
 0x2ed   : > { %v1859_v54 = vpop.permute.xlu1 %1858  ;;  %v1979_v10 = vld [vmem:[#allocation3 + $0x10] sm:$0xff] }
 0x2ee   : > { %1950 = vst.msk [vmem:[#allocation3 + $0x28] sm:$0xff] %vm1944_vm11, %v1859_v54 }
 0x2ef   : > { %v1863_v53 = vpop.permute.xlu0 %1862  ;;  %v1981_v12 = vld [vmem:[#allocation3 + $0x20] sm:$0xff] }
 0x2f0   : > { %1952 = vst.msk [vmem:[#allocation3 + $0x38] sm:$0xff] %vm1944_vm11, %v1863_v53  ;;  %4312 = vmatmul.msk.f32.gmra.mxu0 %vm2018_vm12, %v1979_v10 }
 0x2f1   : > { %v1873_v56 = vpop.permute.xlu2 %1872  ;;  %v1986_v20 = vld [vmem:[#allocation3 + $0x48] sm:$0xff] }
 0x2f2   : > { %1957 = vst.msk [vmem:[#allocation3 + $0x60] sm:$0xff] %vm1944_vm11, %v1873_v56 }
 0x2f5   : > { %v1865_v13 = vpop.permute.xlu1 %1864  ;;  %v1982_v27 = vld [vmem:[#allocation3 + $0x28] sm:$0xff] }
 0x2f6   : > { %1953 = vst.msk [vmem:[#allocation3 + $0x40] sm:$0xff] %vm1944_vm11, %v1865_v13 }
 0x2f7   : > { %v1869_v63 = vpop.permute.xlu0 %1868  ;;  %v1984_v18 = vld [vmem:[#allocation3 + $0x38] sm:$0xff] }
 0x2f8   : > { %1955 = vst.msk [vmem:[#allocation3 + $0x50] sm:$0xff] %vm1944_vm11, %v1869_v63  ;;  %4313 = vmatmul.msk.f32.gmra.mxu0 %vm2018_vm12, %v1980_v9 }
 0x2f9   : > { %v1879_v8 = vpop.permute.xlu2 %1878  ;;  %v1989_v1 = vld [vmem:[#allocation3 + $0x60] sm:$0xff] }
 0x2fa   : > { %1960 = vst.msk [vmem:[#allocation3 + $0x78] sm:$0xff] %vm1944_vm11, %v1879_v8 }
 0x2fd   : > { %v1871_v4 = vpop.permute.xlu1 %1870  ;;  %v1985_v55 = vld [vmem:[#allocation3 + $0x40] sm:$0xff] }
 0x2fe   : > { %1956 = vst.msk [vmem:[#allocation3 + $0x58] sm:$0xff] %vm1944_vm11, %v1871_v4 }
 0x2ff   : > { %v1875_v58 = vpop.permute.xlu0 %1874  ;;  %v1987_v0 = vld [vmem:[#allocation3 + $0x50] sm:$0xff] }
 0x300   : > { %1958 = vst.msk [vmem:[#allocation3 + $0x68] sm:$0xff] %vm1944_vm11, %v1875_v58  ;;  %4314 = vmatmul.msk.f32.gmra.mxu0 %vm2018_vm12, %v1981_v12 }
 0x301   : > { %v1885_v6 = vpop.permute.xlu2 %1884  ;;  %v1992_v62 = vld [vmem:[#allocation3 + $0x78] sm:$0xff] }
 0x302   : > { %1963 = vst.msk [vmem:[#allocation3 + $0x90] sm:$0xff] %vm1944_vm11, %v1885_v6 }
 0x305   : > { %v1877_v15 = vpop.permute.xlu1 %1876  ;;  %v1988_v41 = vld [vmem:[#allocation3 + $0x58] sm:$0xff] }
 0x306   : > { %1959 = vst.msk [vmem:[#allocation3 + $0x70] sm:$0xff] %vm1944_vm11, %v1877_v15 }
 0x307   : > { %v1881_v16 = vpop.permute.xlu0 %1880  ;;  %v1990_v29 = vld [vmem:[#allocation3 + $0x68] sm:$0xff] }
 0x308   : > { %1961 = vst.msk [vmem:[#allocation3 + $0x80] sm:$0xff] %vm1944_vm11, %v1881_v16  ;;  %4315 = vmatmul.msk.f32.gmra.mxu0 %vm2018_vm12, %v1982_v27 }
 0x309   : > { %v1891_v39 = vpop.permute.xlu2 %1890  ;;  %v1995_v51 = vld [vmem:[#allocation3 + $0x90] sm:$0xff] }
 0x30a   : > { %1966 = vst.msk [vmem:[#allocation3 + $0xa8] sm:$0xff] %vm1944_vm11, %v1891_v39 }
 0x30d   : > { %v1883_v24 = vpop.permute.xlu1 %1882  ;;  %v1991_v32 = vld [vmem:[#allocation3 + $0x70] sm:$0xff] }
 0x30e   : > { %1962 = vst.msk [vmem:[#allocation3 + $0x88] sm:$0xff] %vm1944_vm11, %v1883_v24 }
 0x30f   : > { %v1993_v31 = vld [vmem:[#allocation3 + $0x80] sm:$0xff]  ;;  %v1887_v33 = vpop.permute.xlu0 %1886 }
 0x310   : > { %4326 = vmatmul.msk.f32.vlgmr.msra.gmra.mxu2 %vm2018_vm12, %v1993_v31  ;;  %1964 = vst.msk [vmem:[#allocation3 + $0x98] sm:$0xff] %vm1944_vm11, %v1887_v33  ;;  %4316 = vmatmul.msk.f32.gmra.mxu0 %vm2018_vm12, %v1983_v14 }
 0x311   : > { %v1897_v17 = vpop.permute.xlu2 %1896  ;;  %v1998_v22 = vld [vmem:[#allocation3 + $0xa8] sm:$0xff] }
 0x312   : > { %1969 = vst.msk [vmem:[#allocation3 + $0xc0] sm:$0xff] %vm1944_vm11, %v1897_v17 }
 0x315   : > { %v1994_v2 = vld [vmem:[#allocation3 + $0x88] sm:$0xff]  ;;  %v1889_v57 = vpop.permute.xlu1 %1888 }
 0x316   : > { %1965 = vst.msk [vmem:[#allocation3 + $0xa0] sm:$0xff] %vm1944_vm11, %v1889_v57 }
 0x317   : > { %v1893_v25 = vpop.permute.xlu0 %1892  ;;  %v1996_v40 = vld [vmem:[#allocation3 + $0x98] sm:$0xff] }
 0x318   : > { %1967 = vst.msk [vmem:[#allocation3 + $0xb0] sm:$0xff] %vm1944_vm11, %v1893_v25  ;;  %4317 = vmatmul.msk.f32.gmra.mxu0 %vm2018_vm12, %v1984_v18  ;;  %4327 = vmatmul.msk.f32.gmra.mxu2 %vm2018_vm12, %v1994_v2 }
 0x319   : > { %v1903_v47 = vpop.permute.xlu2 %1902  ;;  %v2001_v48 = vld [vmem:[#allocation3 + $0xc0] sm:$0xff] }
 0x31a   : > { %1972 = vst.msk [vmem:[#allocation3 + $0xd8] sm:$0xff] %vm1944_vm11, %v1903_v47 }
 0x31d   : > { %v1895_v49 = vpop.permute.xlu1 %1894  ;;  %v1997_v38 = vld [vmem:[#allocation3 + $0xa0] sm:$0xff] }
 0x31e   : > { %1968 = vst.msk [vmem:[#allocation3 + $0xb8] sm:$0xff] %vm1944_vm11, %v1895_v49 }
 0x31f   : > { %v1899_v42 = vpop.permute.xlu0 %1898  ;;  %v1999_v21 = vld [vmem:[#allocation3 + $0xb0] sm:$0xff] }
 0x320   : > { %4318 = vmatmul.msk.f32.gmra.mxu0 %vm2018_vm12, %v1985_v55  ;;  %4328 = vmatmul.msk.f32.gmra.mxu2 %vm2018_vm12, %v1995_v51  ;;  %1970 = vst.msk [vmem:[#allocation3 + $0xc8] sm:$0xff] %vm1944_vm11, %v1899_v42 }
 0x321   : > { %v2004_v61 = vld [vmem:[#allocation3 + $0xd8] sm:$0xff]  ;;  %v1909_v11 = vpop.permute.xlu2 %1908 }
 0x322   : > { %1975 = vst.msk [vmem:[#allocation3 + $0xf0] sm:$0xff] %vm1944_vm11, %v1909_v11 }
 0x325   : > { %v1901_v59 = vpop.permute.xlu1 %1900  ;;  %v2000_v19 = vld [vmem:[#allocation3 + $0xb8] sm:$0xff] }
 0x326   : > { %1971 = vst.msk [vmem:[#allocation3 + $0xd0] sm:$0xff] %vm1944_vm11, %v1901_v59 }
 0x327   : > { %v1905_v28 = vpop.permute.xlu0 %1904  ;;  %v2002_v50 = vld [vmem:[#allocation3 + $0xc8] sm:$0xff] }
 0x328   : > { %4319 = vmatmul.msk.f32.gmra.mxu0 %vm2018_vm12, %v1986_v20  ;;  %4329 = vmatmul.msk.f32.gmra.mxu2 %vm2018_vm12, %v1996_v40  ;;  %1973 = vst.msk [vmem:[#allocation3 + $0xe0] sm:$0xff] %vm1944_vm11, %v1905_v28 }
 0x32d   : > { %v1907_v3 = vpop.permute.xlu1 %1906  ;;  %v2003_v35 = vld [vmem:[#allocation3 + $0xd0] sm:$0xff] }
 0x32e   : > { %1974 = vst.msk [vmem:[#allocation3 + $0xe8] sm:$0xff] %vm1944_vm11, %v1907_v3 }
 0x32f   : > { %v2005_v53 = vld [vmem:[#allocation3 + $0xe0] sm:$0xff] }
 0x330   : > { %4320 = vmatmul.msk.f32.gmra.mxu0 %vm2018_vm12, %v1987_v0  ;;  %4330 = vmatmul.msk.f32.gmra.mxu2 %vm2018_vm12, %v1997_v38 }
 0x335   : > { %v2006_v56 = vld [vmem:[#allocation3 + $0xe8] sm:$0xff] }
 0x338   : > { %4321 = vmatmul.msk.f32.gmra.mxu0 %vm2018_vm12, %v1988_v41  ;;  %4331 = vmatmul.msk.f32.gmra.mxu2 %vm2018_vm12, %v1998_v22 }
 0x340   : > { %4322 = vmatmul.msk.f32.gmra.mxu0 %vm2018_vm12, %v1989_v1  ;;  %4332 = vmatmul.msk.f32.gmra.mxu2 %vm2018_vm12, %v1999_v21 }
 0x348   : > { %4323 = vmatmul.msk.f32.gmra.mxu0 %vm2018_vm12, %v1990_v29  ;;  %4333 = vmatmul.msk.f32.gmra.mxu2 %vm2018_vm12, %v2000_v19 }
 0x350   : > { %4324 = vmatmul.msk.f32.gmra.mxu0 %vm2018_vm12, %v1991_v32  ;;  %4334 = vmatmul.msk.f32.gmra.mxu2 %vm2018_vm12, %v2001_v48 }
 0x357   : > { %v2136_v30 = vpop.f32.mrf.mxu0 }
 0x358   : > { %4325 = vmatmul.msk.f32.gmra.mxu0 %vm2018_vm12, %v1992_v62  ;;  %4335 = vmatmul.msk.f32.gmra.mxu2 %vm2018_vm12, %v2002_v50  ;;  %v2137_v5 = vadd.f32 %v5611_v52, %v2136_v30 }
 0x35a   : > { %v2232_v36 = vmax.f32 %v2137_v5, 0.0 }
 0x35c   : > { %2264 = vst.msk [vmem:[#allocation2 + $0x19] sm:$0xff] %vm225_vm0, %v2232_v36 }
 0x360   : > { %4336 = vmatmul.msk.f32.gmra.mxu2 %vm2018_vm12, %v2003_v35 }
 0x363   : > { %v5618_v44 = vld [vmem:[#allocation2 + $0x19] sm:$0xff] }
 0x364   : > { %v5620_v46 = vld [vmem:[#allocation2 + $0x18] sm:$0xff]  ;;  %2428 = vrot.lane.b32.xlu0 %v5618_v44, %s4417_s24 }
 0x365   : > { %v2139_v26 = vpop.f32.mrf.mxu0  ;;  %2330 = vst.msk [vmem:[#allocation3 + $0x10] sm:$0xff] %vm225_vm0, %v5620_v46 }
 0x366   : > { %v2140_v60 = vadd.f32 %v5611_v52, %v2139_v26 }
 0x368   : > { %v2233_v34 = vmax.f32 %v2140_v60, 0.0  ;;  %4337 = vmatmul.msk.f32.gmra.mxu2 %vm2018_vm12, %v2004_v61 }
 0x36a   : > { %2265 = vst.msk [vmem:[#allocation2 + $0x21] sm:$0xff] %vm225_vm0, %v2233_v34  ;;  %v2297_v34 = vld [vmem:[#allocation2 + $0x8] sm:$0xff] }
 0x36b   : > { %2329 = vst.msk [vmem:[#allocation3 + $0x8] sm:$0xff] %vm225_vm0, %v2297_v34 }
 0x36d   : > { %v2142_v45 = vpop.f32.mrf.mxu0 }
 0x36e   : > { %v2143_v7 = vadd.f32 %v5611_v52, %v2142_v45 }
 0x370   : > { %v2234_v54 = vmax.f32 %v2143_v7, 0.0  ;;  %4338 = vmatmul.msk.f32.gmra.mxu2 %vm2018_vm12, %v2005_v53  ;;  %v2427_v7 = vpop.permute.xlu2 %2426 }
 0x371   : > { %v5629_v10 = vld [vmem:[#allocation2 + $0x21] sm:$0xff]  ;;  %2521 = vst.msk [vmem:[#allocation3 + $0x8] sm:$0xff] %vm592_vm3, %v2427_v7 }
 0x372   : > { %v5631_v63 = vld [vmem:[#allocation2 + $0x20] sm:$0xff]  ;;  %2430 = vrot.lane.b32.xlu1 %v5629_v10, %s4417_s24  ;;  %2266 = vst.msk [vmem:[#allocation2 + $0x31] sm:$0xff] %vm225_vm0, %v2234_v54 }
 0x373   : > { %2331 = vst.msk [vmem:[#allocation3 + $0x18] sm:$0xff] %vm225_vm0, %v5631_v63 }
 0x375   : > { %v2145_v9 = vpop.f32.mrf.mxu0 }
 0x376   : > { %v2146_v13 = vadd.f32 %v5611_v52, %v2145_v9 }
 0x378   : > { %v2235_v58 = vmax.f32 %v2146_v13, 0.0  ;;  %4339 = vmatmul.msk.f32.gmra.mxu2 %vm2018_vm12, %v2006_v56  ;;  %v1911_v13 = vpop.permute.xlu0 %1910 }
 0x379   : > { %v5640_v8 = vld [vmem:[#allocation2 + $0x31] sm:$0xff]  ;;  %1976 = vst.msk [vmem:[#allocation3 + $0xf8] sm:$0xff] %vm1944_vm11, %v1911_v13 }
 0x37a   : > { %v5642_v4 = vld [vmem:[#allocation2 + $0x30] sm:$0xff]  ;;  %2267 = vst.msk [vmem:[#allocation2 + $0x39] sm:$0xff] %vm225_vm0, %v2235_v58  ;;  %2432 = vrot.lane.b32.xlu2 %v5640_v8, %s4417_s24 }
 0x37b   : > { %2332 = vst.msk [vmem:[#allocation3 + $0x20] sm:$0xff] %vm225_vm0, %v5642_v4 }
 0x37d   : > { %v2148_v12 = vpop.f32.mrf.mxu0 }
 0x37e   : > { %v2149_v16 = vadd.f32 %v5611_v52, %v2148_v12 }
 0x380   : > { %v2236_v6 = vmax.f32 %v2149_v16, 0.0 }
 0x381   : > { %v5650_v15 = vld [vmem:[#allocation2 + $0x39] sm:$0xff] }
 0x382   : > { %v5652_v27 = vld [vmem:[#allocation2 + $0x38] sm:$0xff]  ;;  %2268 = vst.msk [vmem:[#allocation2 + $0x49] sm:$0xff] %vm225_vm0, %v2236_v6  ;;  %2434 = vrot.lane.b32.xlu0 %v5650_v15, %s4417_s24 }
 0x383   : > { %2333 = vst.msk [vmem:[#allocation3 + $0x28] sm:$0xff] %vm225_vm0, %v5652_v27 }
 0x385   : > { %v2151_v31 = vpop.f32.mrf.mxu0 }
 0x386   : > { %v2152_v33 = vadd.f32 %v5611_v52, %v2151_v31 }
 0x388   : > { %v2237_v39 = vmax.f32 %v2152_v33, 0.0 }
 0x389   : > { %v5660_v24 = vld [vmem:[#allocation2 + $0x49] sm:$0xff] }
 0x38a   : > { %v5662_v14 = vld [vmem:[#allocation2 + $0x48] sm:$0xff]  ;;  %2269 = vst.msk [vmem:[#allocation2 + $0x51] sm:$0xff] %vm225_vm0, %v2237_v39  ;;  %2436 = vrot.lane.b32.xlu1 %v5660_v24, %s4417_s24 }
 0x38b   : > { %2334 = vst.msk [vmem:[#allocation3 + $0x30] sm:$0xff] %vm225_vm0, %v5662_v14 }
 0x38d   : > { %v2154_v25 = vpop.f32.mrf.mxu0 }
 0x38e   : > { %v2155_v18 = vadd.f32 %v5611_v52, %v2154_v25 }
 0x390   : > { %v2238_v51 = vmax.f32 %v2155_v18, 0.0 }
 0x391   : > { %v5671_v55 = vld [vmem:[#allocation2 + $0x51] sm:$0xff] }
 0x392   : > { %v5673_v17 = vld [vmem:[#allocation2 + $0x50] sm:$0xff]  ;;  %2270 = vst.msk [vmem:[#allocation2 + $0x61] sm:$0xff] %vm225_vm0, %v2238_v51  ;;  %2438 = vrot.lane.b32.xlu2 %v5671_v55, %s4417_s24 }
 0x393   : > { %v2184_v2 = vpop.f32.mrf.mxu2  ;;  %2335 = vst.msk [vmem:[#allocation3 + $0x38] sm:$0xff] %vm225_vm0, %v5673_v17 }
 0x394   : > { %v2185_v57 = vadd.f32 %v5611_v52, %v2184_v2 }
 0x395   : > { %v2157_v40 = vpop.f32.mrf.mxu0 }
 0x396   : > { %v2248_v49 = vmax.f32 %v2185_v57, 0.0  ;;  %v2158_v20 = vadd.f32 %v5611_v52, %v2157_v40  ;;  %v2296_v40 = vld [vmem:[#allocation2] sm:$0xff] }
 0x397   : > { %2328 = vst.msk [vmem:[#allocation3] sm:$0xff] %vm225_vm0, %v2296_v40 }
 0x398   : > { %2280 = vst.msk [vmem:[#allocation2 + $0xd9] sm:$0xff] %vm225_vm0, %v2248_v49  ;;  %v2239_v42 = vmax.f32 %v2158_v20, 0.0 }
 0x399   : > { %v5682_v38 = vld [vmem:[#allocation2 + $0x61] sm:$0xff] }
 0x39a   : > { %v5684_v0 = vld [vmem:[#allocation2 + $0x60] sm:$0xff]  ;;  %2271 = vst.msk [vmem:[#allocation2 + $0x69] sm:$0xff] %vm225_vm0, %v2239_v42  ;;  %2440 = vrot.lane.b32.xlu0 %v5682_v38, %s4417_s24 }
 0x39b   : > { %v2187_v22 = vpop.f32.mrf.mxu2  ;;  %2336 = vst.msk [vmem:[#allocation3 + $0x40] sm:$0xff] %vm225_vm0, %v5684_v0 }
 0x39c   : > { %v2188_v41 = vadd.f32 %v5611_v52, %v2187_v22  ;;  %v2425_v22 = vpop.permute.xlu1 %2424 }
 0x39d   : > { %v2160_v21 = vpop.f32.mrf.mxu0  ;;  %2520 = vst.msk [vmem:[#allocation3] sm:$0xff] %vm592_vm3, %v2425_v22 }
 0x39e   : > { %v2249_v1 = vmax.f32 %v2188_v41, 0.0  ;;  %v2161_v47 = vadd.f32 %v5611_v52, %v2160_v21 }
 0x39f   : > { %v5689_v59 = vld [vmem:[#allocation2 + $0xd8] sm:$0xff] }
 0x3a0   : > { %2346 = vst.msk [vmem:[#allocation3 + $0x90] sm:$0xff] %vm225_vm0, %v5689_v59  ;;  %v2240_v37 = vmax.f32 %v2161_v47, 0.0 }
 0x3a1   : > { %2281 = vst.msk [vmem:[#allocation2 + $0xe1] sm:$0xff] %vm225_vm0, %v2249_v1  ;;  %v5698_v19 = vld [vmem:[#allocation2 + $0x69] sm:$0xff] }
 0x3a2   : > { %v5700_v29 = vld [vmem:[#allocation2 + $0x68] sm:$0xff]  ;;  %2272 = vst.msk [vmem:[#allocation2 + $0x79] sm:$0xff] %vm225_vm0, %v2240_v37  ;;  %2442 = vrot.lane.b32.xlu1 %v5698_v19, %s4417_s24 }
 0x3a3   : > { %v2190_v28 = vpop.f32.mrf.mxu2  ;;  %2337 = vst.msk [vmem:[#allocation3 + $0x48] sm:$0xff] %vm225_vm0, %v5700_v29 }
 0x3a4   : > { %v2191_v23 = vadd.f32 %v5611_v52, %v2190_v28 }
 0x3a5   : > { %v2163_v48 = vpop.f32.mrf.mxu0 }
 0x3a6   : > { %v2250_v32 = vmax.f32 %v2191_v23, 0.0  ;;  %v2164_v3 = vadd.f32 %v5611_v52, %v2163_v48 }
 0x3a8   : > { %2282 = vst.msk [vmem:[#allocation2 + $0xf1] sm:$0xff] %vm225_vm0, %v2250_v32  ;;  %v2241_v43 = vmax.f32 %v2164_v3, 0.0  ;;  %v5711_v50 = vld [vmem:[#allocation2 + $0xe0] sm:$0xff] }
 0x3a9   : > { %v5713_v62 = vld [vmem:[#allocation2 + $0x79] sm:$0xff]  ;;  %2347 = vst.msk [vmem:[#allocation3 + $0x98] sm:$0xff] %vm225_vm0, %v5711_v50 }
 0x3aa   : > { %v5715_v30 = vld [vmem:[#allocation2 + $0x78] sm:$0xff]  ;;  %2273 = vst.msk [vmem:[#allocation2 + $0x81] sm:$0xff] %vm225_vm0, %v2241_v43  ;;  %2444 = vrot.lane.b32.xlu2 %v5713_v62, %s4417_s24 }
 0x3ab   : > { %v2193_v5 = vpop.f32.mrf.mxu2  ;;  %2338 = vst.msk [vmem:[#allocation3 + $0x50] sm:$0xff] %vm225_vm0, %v5715_v30 }
 0x3ac   : > { %v2194_v35 = vadd.f32 %v5611_v52, %v2193_v5 }
 0x3ad   : > { %v2166_v36 = vpop.f32.mrf.mxu0 }
 0x3ae   : > { %v2251_v26 = vmax.f32 %v2194_v35, 0.0  ;;  %v2167_v60 = vadd.f32 %v5611_v52, %v2166_v36 }
 0x3af   : > { %v5736_v9 = vld [vmem:[#allocation2 + $0xf0] sm:$0xff] }
 0x3b0   : > { %2283 = vst.msk [vmem:[#allocation2 + $0xf9] sm:$0xff] %vm225_vm0, %v2251_v26  ;;  %v2242_v61 = vmax.f32 %v2167_v60, 0.0 }
 0x3b1   : > { %v5727_v45 = vld [vmem:[#allocation2 + $0x81] sm:$0xff]  ;;  %2348 = vst.msk [vmem:[#allocation3 + $0xa0] sm:$0xff] %vm225_vm0, %v5736_v9 }
 0x3b2   : > { %v5730_v53 = vld [vmem:[#allocation2 + $0x80] sm:$0xff]  ;;  %2274 = vst.msk [vmem:[#allocation2 + $0x91] sm:$0xff] %vm225_vm0, %v2242_v61  ;;  %2446 = vrot.lane.b32.xlu0 %v5727_v45, %s4417_s24 }
 0x3b3   : > { %v2196_v54 = vpop.f32.mrf.mxu2  ;;  %2339 = vst.msk [vmem:[#allocation3 + $0x58] sm:$0xff] %vm225_vm0, %v5730_v53 }
 0x3b4   : > { %v2197_v56 = vadd.f32 %v5611_v52, %v2196_v54 }
 0x3b5   : > { %v2169_v58 = vpop.f32.mrf.mxu0 }
 0x3b6   : > { %v2252_v12 = vmax.f32 %v2197_v56, 0.0  ;;  %v2170_v16 = vadd.f32 %v5611_v52, %v2169_v58 }
 0x3b7   : > { %v5746_v31 = vld [vmem:[#allocation2 + $0xf8] sm:$0xff] }
 0x3b8   : > { %2284 = vst.msk [vmem:[#allocation2 + $0x109] sm:$0xff] %vm225_vm0, %v2252_v12  ;;  %v2243_v6 = vmax.f32 %v2170_v16, 0.0 }
 0x3b9   : > { %v5748_v33 = vld [vmem:[#allocation2 + $0x91] sm:$0xff]  ;;  %2349 = vst.msk [vmem:[#allocation3 + $0xa8] sm:$0xff] %vm225_vm0, %v5746_v31 }
 0x3ba   : > { %v5750_v39 = vld [vmem:[#allocation2 + $0x90] sm:$0xff]  ;;  %2275 = vst.msk [vmem:[#allocation2 + $0x99] sm:$0xff] %vm225_vm0, %v2243_v6  ;;  %2448 = vrot.lane.b32.xlu1 %v5748_v33, %s4417_s24 }
 0x3bb   : > { %v2199_v25 = vpop.f32.mrf.mxu2  ;;  %2340 = vst.msk [vmem:[#allocation3 + $0x60] sm:$0xff] %vm225_vm0, %v5750_v39 }
 0x3bc   : > { %v2200_v18 = vadd.f32 %v5611_v52, %v2199_v25  ;;  %v5815_v25 = vld [vmem:[#allocation2 + $0xd9] sm:$0xff] }
 0x3bd   : > { %v2172_v2 = vpop.f32.mrf.mxu0 }
 0x3be   : > { %v2253_v57 = vmax.f32 %v2200_v18, 0.0  ;;  %v2173_v51 = vadd.f32 %v5611_v52, %v2172_v2 }
 0x3bf   : > { %v5770_v41 = vld [vmem:[#allocation2 + $0x108] sm:$0xff] }
 0x3c0   : > { %2285 = vst.msk [vmem:[#allocation2 + $0x111] sm:$0xff] %vm225_vm0, %v2253_v57  ;;  %v2244_v49 = vmax.f32 %v2173_v51, 0.0 }
 0x3c1   : > { %v5762_v20 = vld [vmem:[#allocation2 + $0x99] sm:$0xff]  ;;  %2350 = vst.msk [vmem:[#allocation3 + $0xb0] sm:$0xff] %vm225_vm0, %v5770_v41 }
 0x3c2   : > { %v5765_v42 = vld [vmem:[#allocation2 + $0x98] sm:$0xff]  ;;  %2276 = vst.msk [vmem:[#allocation2 + $0xa9] sm:$0xff] %vm225_vm0, %v2244_v49  ;;  %2450 = vrot.lane.b32.xlu2 %v5762_v20, %s4417_s24 }
 0x3c3   : > { %v2202_v21 = vpop.f32.mrf.mxu2  ;;  %2341 = vst.msk [vmem:[#allocation3 + $0x68] sm:$0xff] %vm225_vm0, %v5765_v42 }
 0x3c4   : > { %v2203_v1 = vadd.f32 %v5611_v52, %v2202_v21  ;;  %v5835_v21 = vld [vmem:[#allocation2 + $0xf9] sm:$0xff] }
 0x3c5   : > { %v2175_v47 = vpop.f32.mrf.mxu0 }
 0x3c6   : > { %v2254_v37 = vmax.f32 %v2203_v1, 0.0  ;;  %v2176_v28 = vadd.f32 %v5611_v52, %v2175_v47  ;;  %v5845_v47 = vld [vmem:[#allocation2 + $0xe1] sm:$0xff] }
 0x3c7   : > { %v5780_v11 = vld [vmem:[#allocation2 + $0x110] sm:$0xff] }
 0x3c8   : > { %2286 = vst.msk [vmem:[#allocation2 + $0x121] sm:$0xff] %vm225_vm0, %v2254_v37  ;;  %v2245_v23 = vmax.f32 %v2176_v28, 0.0 }
 0x3c9   : > { %v5782_v48 = vld [vmem:[#allocation2 + $0xa9] sm:$0xff]  ;;  %2351 = vst.msk [vmem:[#allocation3 + $0xb8] sm:$0xff] %vm225_vm0, %v5780_v11 }
 0x3ca   : > { %v5784_v32 = vld [vmem:[#allocation2 + $0xa8] sm:$0xff]  ;;  %2277 = vst.msk [vmem:[#allocation2 + $0xb1] sm:$0xff] %vm225_vm0, %v2245_v23  ;;  %2452 = vrot.lane.b32.xlu0 %v5782_v48, %s4417_s24 }
 0x3cb   : > { %v2205_v3 = vpop.f32.mrf.mxu2  ;;  %2342 = vst.msk [vmem:[#allocation3 + $0x70] sm:$0xff] %vm225_vm0, %v5784_v32 }
 0x3cc   : > { %v2206_v43 = vadd.f32 %v5611_v52, %v2205_v3 }
 0x3cd   : > { %v2178_v5 = vpop.f32.mrf.mxu0 }
 0x3ce   : > { %v2255_v35 = vmax.f32 %v2206_v43, 0.0  ;;  %v2179_v36 = vadd.f32 %v5611_v52, %v2178_v5  ;;  %v2007_v43 = vld [vmem:[#allocation3 + $0xf0] sm:$0xff] }
 0x3cf   : > { %v5795_v26 = vld [vmem:[#allocation2 + $0x120] sm:$0xff]  ;;  %4340 = vmatmul.msk.f32.gmra.mxu2 %vm2018_vm12, %v2007_v43 }
 0x3d0   : > { %2287 = vst.msk [vmem:[#allocation2 + $0x129] sm:$0xff] %vm225_vm0, %v2255_v35  ;;  %v2246_v60 = vmax.f32 %v2179_v36, 0.0  ;;  %v5859_v36 = vld [vmem:[#allocation2 + $0x121] sm:$0xff] }
 0x3d1   : > { %v5798_v61 = vld [vmem:[#allocation2 + $0xb1] sm:$0xff]  ;;  %2352 = vst.msk [vmem:[#allocation3 + $0xc0] sm:$0xff] %vm225_vm0, %v5795_v26 }
 0x3d2   : > { %2278 = vst.msk [vmem:[#allocation2 + $0xc1] sm:$0xff] %vm225_vm0, %v2246_v60  ;;  %2454 = vrot.lane.b32.xlu1 %v5798_v61, %s4417_s24  ;;  %v5805_v34 = vld [vmem:[#allocation2 + $0xb0] sm:$0xff] }
 0x3d3   : > { %v2208_v7 = vpop.f32.mrf.mxu2  ;;  %2343 = vst.msk [vmem:[#allocation3 + $0x78] sm:$0xff] %vm225_vm0, %v5805_v34  ;;  %v5861_v60 = vld [vmem:[#allocation2 + $0xf1] sm:$0xff] }
 0x3d4   : > { %v2209_v54 = vadd.f32 %v5611_v52, %v2208_v7  ;;  %v2433_v56 = vpop.permute.xlu2 %2432  ;;  %v5869_v7 = vld [vmem:[#allocation2 + $0x109] sm:$0xff] }
 0x3d5   : > { %2524 = vst.msk [vmem:[#allocation3 + $0x20] sm:$0xff] %vm592_vm3, %v2433_v56  ;;  %v2181_v13 = vpop.f32.mrf.mxu0 }
 0x3d6   : > { %v2256_v58 = vmax.f32 %v2209_v54, 0.0  ;;  %v2182_v12 = vadd.f32 %v5611_v52, %v2181_v13  ;;  %v2429_v51 = vpop.permute.xlu0 %2428 }
 0x3d7   : > { %v5813_v6 = vld [vmem:[#allocation2 + $0x128] sm:$0xff]  ;;  %2522 = vst.msk [vmem:[#allocation3 + $0x10] sm:$0xff] %vm592_vm3, %v2429_v51  ;;  %v5881_v51 = vld [vmem:[#allocation2 + $0x111] sm:$0xff] }
 0x3d8   : > { %2288 = vst.msk [vmem:[#allocation2 + $0x139] sm:$0xff] %vm225_vm0, %v2256_v58  ;;  %v2247_v16 = vmax.f32 %v2182_v12, 0.0  ;;  %v2008_v58 = vld [vmem:[#allocation3 + $0xf8] sm:$0xff] }
 0x3d9   : > { %v5817_v18 = vld [vmem:[#allocation2 + $0xc1] sm:$0xff]  ;;  %2353 = vst.msk [vmem:[#allocation3 + $0xc8] sm:$0xff] %vm225_vm0, %v5813_v6  ;;  %4341 = vmatmul.msk.f32.gmra.mxu2 %vm2018_vm12, %v2008_v58 }
 0x3da   : > { %v5819_v2 = vld [vmem:[#allocation2 + $0xc0] sm:$0xff]  ;;  %2279 = vst.msk [vmem:[#allocation2 + $0xc9] sm:$0xff] %vm225_vm0, %v2247_v16  ;;  %2460 = vrot.lane.b32.xlu1 %v5815_v25, %s4417_s24  ;;  %2456 = vrot.lane.b32.xlu2 %v5817_v18, %s4417_s24 }
 0x3db   : > { %v2211_v57 = vpop.f32.mrf.mxu2  ;;  %2344 = vst.msk [vmem:[#allocation3 + $0x80] sm:$0xff] %vm225_vm0, %v5819_v2 }
 0x3dc   : > { %v2212_v49 = vadd.f32 %v5611_v52, %v2211_v57 }
 0x3de   : > { %v2257_v40 = vmax.f32 %v2212_v49, 0.0  ;;  %v5889_v49 = vld [vmem:[#allocation2 + $0x129] sm:$0xff] }
 0x3df   : > { %v5832_v22 = vld [vmem:[#allocation2 + $0x138] sm:$0xff] }
 0x3e0   : > { %2289 = vst.msk [vmem:[#allocation2 + $0x141] sm:$0xff] %vm225_vm0, %v2257_v40 }
 0x3e1   : > { %v5837_v1 = vld [vmem:[#allocation2 + $0xc9] sm:$0xff]  ;;  %2354 = vst.msk [vmem:[#allocation3 + $0xd0] sm:$0xff] %vm225_vm0, %v5832_v22 }
 0x3e2   : > { %2466 = vrot.lane.b32.xlu1 %v5835_v21, %s4417_s24  ;;  %2458 = vrot.lane.b32.xlu0 %v5837_v1, %s4417_s24  ;;  %v5847_v37 = vld [vmem:[#allocation2 + $0xc8] sm:$0xff] }
 0x3e3   : > { %2462 = vrot.lane.b32.xlu2 %v5845_v47, %s4417_s24  ;;  %v2214_v28 = vpop.f32.mrf.mxu2  ;;  %2345 = vst.msk [vmem:[#allocation3 + $0x88] sm:$0xff] %vm225_vm0, %v5847_v37 }
 0x3e4   : > { %v2431_v23 = vpop.permute.xlu1 %2430  ;;  %v2215_v3 = vadd.f32 %v5611_v52, %v2214_v28 }
 0x3e5   : > { %2523 = vst.msk [vmem:[#allocation3 + $0x18] sm:$0xff] %vm592_vm3, %v2431_v23 }
 0x3e6   : > { %v2258_v5 = vmax.f32 %v2215_v3, 0.0 }
 0x3e7   : > { %v5857_v35 = vld [vmem:[#allocation2 + $0x140] sm:$0xff] }
 0x3e8   : > { %2290 = vst.msk [vmem:[#allocation2 + $0x151] sm:$0xff] %vm225_vm0, %v2258_v5  ;;  %v5879_v57 = vld [vmem:[#allocation2 + $0x141] sm:$0xff]  ;;  %v5898_v5 = vld [vmem:[#allocation2 + $0x139] sm:$0xff] }
 0x3e9   : > { %2355 = vst.msk [vmem:[#allocation3 + $0xd8] sm:$0xff] %vm225_vm0, %v5857_v35 }
 0x3ea   : > { %2472 = vrot.lane.b32.xlu1 %v5859_v36, %s4417_s24  ;;  %2464 = vrot.lane.b32.xlu0 %v5861_v60, %s4417_s24  ;;  %6917 = vst [vmem:[#allocation11_spill] sm:$0xff] %v5879_v57 }
 0x3eb   : > { %2468 = vrot.lane.b32.xlu2 %v5869_v7, %s4417_s24  ;;  %v2217_v54 = vpop.f32.mrf.mxu2 }
 0x3ec   : > { %v2218_v56 = vadd.f32 %v5611_v52, %v2217_v54  ;;  %v2439_v13 = vpop.permute.xlu2 %2438 }
 0x3ed   : > { %2527 = vst.msk [vmem:[#allocation3 + $0x38] sm:$0xff] %vm592_vm3, %v2439_v13 }
 0x3ee   : > { %v2259_v12 = vmax.f32 %v2218_v56, 0.0 }
 0x3ef   : > { %v5876_v16 = vld [vmem:[#allocation2 + $0x150] sm:$0xff] }
 0x3f0   : > { %2291 = vst.msk [vmem:[#allocation2 + $0x159] sm:$0xff] %vm225_vm0, %v2259_v12  ;;  %v5904_v54 = vld [vmem:[#allocation2 + $0x151] sm:$0xff] }
 0x3f1   : > { %2356 = vst.msk [vmem:[#allocation3 + $0xe0] sm:$0xff] %vm225_vm0, %v5876_v16 }
 0x3f2   : > { %2478 = vrot.lane.b32.xlu1 %v5879_v57, %s4417_s24  ;;  %2470 = vrot.lane.b32.xlu0 %v5881_v51, %s4417_s24  ;;  %6918 = vst [vmem:[#allocation4_spill] sm:$0xff] %v5904_v54  ;;  %v6016_v57 = vld [vmem:[#allocation2 + $0xf2] sm:$0xff] }
 0x3f3   : > { %2474 = vrot.lane.b32.xlu2 %v5889_v49, %s4417_s24  ;;  %v2220_v40 = vpop.f32.mrf.mxu2  ;;  %6941 = vst [vmem:[#allocation25_spill] sm:$0xff] %v6016_v57 }
 0x3f4   : > { %v2221_v28 = vadd.f32 %v5611_v52, %v2220_v40  ;;  %v2435_v23 = vpop.permute.xlu0 %2434 }
 0x3f5   : > { %2525 = vst.msk [vmem:[#allocation3 + $0x28] sm:$0xff] %vm592_vm3, %v2435_v23 }
 0x3f6   : > { %v2260_v3 = vmax.f32 %v2221_v28, 0.0 }
 0x3f7   : > { %v5896_v43 = vld [vmem:[#allocation2 + $0x158] sm:$0xff] }
 0x3f8   : > { %2292 = vst.msk [vmem:[#allocation2 + $0x169] sm:$0xff] %vm225_vm0, %v2260_v3  ;;  %v5917_v23 = vld [vmem:[#allocation2 + $0x159] sm:$0xff] }
 0x3f9   : > { %2357 = vst.msk [vmem:[#allocation3 + $0xe8] sm:$0xff] %vm225_vm0, %v5896_v43 }
 0x3fa   : > { %2476 = vrot.lane.b32.xlu0 %v5898_v5, %s4417_s24  ;;  %6920 = vst [vmem:[#allocation5_spill] sm:$0xff] %v5917_v23 }
 0x3fb   : > { %2480 = vrot.lane.b32.xlu2 %v5904_v54, %s4417_s24  ;;  %v2223_v56 = vpop.f32.mrf.mxu2  ;;  %v5937_v54 = vld [vmem:[#allocation2 + $0x1a] sm:$0xff] }
 0x3fc   : > { %v2224_v13 = vadd.f32 %v5611_v52, %v2223_v56  ;;  %v2437_v58 = vpop.permute.xlu1 %2436  ;;  %v2553_v56 = vld [vmem:[#allocation2 + $0xa] sm:$0xff]  ;;  %6923 = vst [vmem:[#allocation7_spill] sm:$0xff] %v5937_v54 }
 0x3fd   : > { %2526 = vst.msk [vmem:[#allocation3 + $0x30] sm:$0xff] %vm592_vm3, %v2437_v58  ;;  %v2552_v58 = vld [vmem:[#allocation2 + $0x2] sm:$0xff] }
 0x3fe   : > { %v2261_v12 = vmax.f32 %v2224_v13, 0.0 }
 0x3ff   : > { %v5910_v40 = vld [vmem:[#allocation2 + $0x169] sm:$0xff] }
 0x400   : > { %6919 = vst [vmem:[#allocation14_spill] sm:$0xff] %v5910_v40  ;;  %v5912_v28 = vld [vmem:[#allocation2 + $0x168] sm:$0xff]  ;;  %2484 = vrot.lane.b32.xlu1 %v5910_v40, %s4417_s24 }
 0x401   : > { %2293 = vst.msk [vmem:[#allocation2 + $0x171] sm:$0xff] %vm225_vm0, %v2261_v12 }
 0x402   : > { %2358 = vst.msk [vmem:[#allocation3 + $0xf0] sm:$0xff] %vm225_vm0, %v5912_v28  ;;  %2482 = vrot.lane.b32.xlu0 %v5917_v23, %s4417_s24  ;;  %v2581_v23 = vld [vmem:[#allocation2 + $0x15a] sm:$0xff] }
 0x404   : > { %v2445_v3 = vpop.permute.xlu2 %2444 }
 0x405   : > { %2530 = vst.msk [vmem:[#allocation3 + $0x50] sm:$0xff] %vm592_vm3, %v2445_v3  ;;  %v5935_v3 = vld [vmem:[#allocation2 + $0x32] sm:$0xff] }
 0x406   : > { %6922 = vst [vmem:[#allocation17_spill] sm:$0xff] %v5935_v3 }
 0x408   : > { %v5924_v13 = vld [vmem:[#allocation2 + $0x171] sm:$0xff]  ;;  %2618 = vrot.lane.b32.xlu1 %v2553_v56, %s4418_s25  ;;  %v5943_v56 = vld [vmem:[#allocation2 + $0x22] sm:$0xff] }
 0x409   : > { %6921 = vst [vmem:[#allocation6_spill] sm:$0xff] %v5924_v13  ;;  %2486 = vrot.lane.b32.xlu2 %v5924_v13, %s4417_s24  ;;  %v5929_v12 = vld [vmem:[#allocation2 + $0x170] sm:$0xff] }
 0x40a   : > { %2359 = vst.msk [vmem:[#allocation3 + $0xf8] sm:$0xff] %vm225_vm0, %v5929_v12  ;;  %2616 = vrot.lane.b32.xlu0 %v2552_v58, %s4418_s25  ;;  %v5948_v58 = vld [vmem:[#allocation2 + $0x52] sm:$0xff] }
 0x40b   : > { %6924 = vst [vmem:[#allocation8_spill] sm:$0xff] %v5943_v56 }
 0x40c   : > { %v2441_v40 = vpop.permute.xlu0 %2440  ;;  %6925 = vst [vmem:[#allocation20_spill] sm:$0xff] %v5948_v58 }
 0x40d   : > { %2528 = vst.msk [vmem:[#allocation3 + $0x40] sm:$0xff] %vm592_vm3, %v2441_v40  ;;  %v5950_v40 = vld [vmem:[#allocation2 + $0x3a] sm:$0xff] }
 0x40e   : > { %6926 = vst [vmem:[#allocation9_spill] sm:$0xff] %v5950_v40 }
 0x410   : > { %2624 = vrot.lane.b32.xlu1 %v5935_v3, %s4418_s25  ;;  %v5956_v3 = vld [vmem:[#allocation2 + $0x4a] sm:$0xff] }
 0x411   : > { %2620 = vrot.lane.b32.xlu2 %v5937_v54, %s4418_s25  ;;  %6927 = vst [vmem:[#allocation10_spill] sm:$0xff] %v5956_v3 }
 0x412   : > { %2622 = vrot.lane.b32.xlu0 %v5943_v56, %s4418_s25  ;;  %v5961_v56 = vld [vmem:[#allocation2 + $0x7a] sm:$0xff] }
 0x413   : > { %6928 = vst [vmem:[#allocation23_spill] sm:$0xff] %v5961_v56 }
 0x414   : > { %v2443_v13 = vpop.permute.xlu1 %2442 }
 0x415   : > { %2529 = vst.msk [vmem:[#allocation3 + $0x48] sm:$0xff] %vm592_vm3, %v2443_v13  ;;  %v5963_v13 = vld [vmem:[#allocation2 + $0x62] sm:$0xff] }
 0x416   : > { %6929 = vst [vmem:[#allocation12_spill] sm:$0xff] %v5963_v13 }
 0x418   : > { %2630 = vrot.lane.b32.xlu1 %v5948_v58, %s4418_s25  ;;  %v5969_v58 = vld [vmem:[#allocation2 + $0x6a] sm:$0xff] }
 0x419   : > { %2626 = vrot.lane.b32.xlu2 %v5950_v40, %s4418_s25  ;;  %6930 = vst [vmem:[#allocation13_spill] sm:$0xff] %v5969_v58 }
 0x41a   : > { %2628 = vrot.lane.b32.xlu0 %v5956_v3, %s4418_s25  ;;  %v5974_v3 = vld [vmem:[#allocation2 + $0x9a] sm:$0xff] }
 0x41b   : > { %6931 = vst [vmem:[#allocation26_spill] sm:$0xff] %v5974_v3 }
 0x41c   : > { %v2451_v54 = vpop.permute.xlu2 %2450 }
 0x41d   : > { %2533 = vst.msk [vmem:[#allocation3 + $0x68] sm:$0xff] %vm592_vm3, %v2451_v54  ;;  %v5976_v54 = vld [vmem:[#allocation2 + $0x82] sm:$0xff] }
 0x41e   : > { %6932 = vst [vmem:[#allocation15_spill] sm:$0xff] %v5976_v54 }
 0x420   : > { %2636 = vrot.lane.b32.xlu1 %v5961_v56, %s4418_s25  ;;  %v5982_v56 = vld [vmem:[#allocation2 + $0x92] sm:$0xff] }
 0x421   : > { %2632 = vrot.lane.b32.xlu2 %v5963_v13, %s4418_s25  ;;  %6933 = vst [vmem:[#allocation16_spill] sm:$0xff] %v5982_v56 }
 0x422   : > { %2634 = vrot.lane.b32.xlu0 %v5969_v58, %s4418_s25  ;;  %v5987_v58 = vld [vmem:[#allocation2 + $0xc2] sm:$0xff] }
 0x423   : > { %6934 = vst [vmem:[#allocation29_spill] sm:$0xff] %v5987_v58 }
 0x424   : > { %v2447_v40 = vpop.permute.xlu0 %2446 }
 0x425   : > { %2531 = vst.msk [vmem:[#allocation3 + $0x58] sm:$0xff] %vm592_vm3, %v2447_v40  ;;  %v5989_v40 = vld [vmem:[#allocation2 + $0xaa] sm:$0xff] }
 0x426   : > { %6935 = vst [vmem:[#allocation18_spill] sm:$0xff] %v5989_v40 }
 0x428   : > { %2642 = vrot.lane.b32.xlu1 %v5974_v3, %s4418_s25  ;;  %v5995_v3 = vld [vmem:[#allocation2 + $0xb2] sm:$0xff] }
 0x429   : > { %2638 = vrot.lane.b32.xlu2 %v5976_v54, %s4418_s25  ;;  %6936 = vst [vmem:[#allocation19_spill] sm:$0xff] %v5995_v3 }
 0x42a   : > { %2640 = vrot.lane.b32.xlu0 %v5982_v56, %s4418_s25  ;;  %v6000_v56 = vld [vmem:[#allocation2 + $0xe2] sm:$0xff] }
 0x42b   : > { %6937 = vst [vmem:[#allocation32_spill] sm:$0xff] %v6000_v56 }
 0x42c   : > { %v2449_v13 = vpop.permute.xlu1 %2448 }
 0x42d   : > { %2532 = vst.msk [vmem:[#allocation3 + $0x60] sm:$0xff] %vm592_vm3, %v2449_v13  ;;  %v6002_v13 = vld [vmem:[#allocation2 + $0xca] sm:$0xff] }
 0x42e   : > { %6938 = vst [vmem:[#allocation21_spill] sm:$0xff] %v6002_v13 }
 0x430   : > { %2648 = vrot.lane.b32.xlu1 %v5987_v58, %s4418_s25  ;;  %v6008_v58 = vld [vmem:[#allocation2 + $0xda] sm:$0xff] }
 0x431   : > { %2644 = vrot.lane.b32.xlu2 %v5989_v40, %s4418_s25  ;;  %6939 = vst [vmem:[#allocation22_spill] sm:$0xff] %v6008_v58 }
 0x432   : > { %2646 = vrot.lane.b32.xlu0 %v5995_v3, %s4418_s25 }
 0x434   : > { %v2457_v54 = vpop.permute.xlu2 %2456 }
 0x435   : > { %2536 = vst.msk [vmem:[#allocation3 + $0x80] sm:$0xff] %vm592_vm3, %v2457_v54  ;;  %v6014_v54 = vld [vmem:[#allocation2 + $0x10a] sm:$0xff] }
 0x436   : > { %6940 = vst [vmem:[#allocation24_spill] sm:$0xff] %v6014_v54 }
 0x438   : > { %2654 = vrot.lane.b32.xlu1 %v6000_v56, %s4418_s25  ;;  %v6022_v56 = vld [vmem:[#allocation2 + $0xfa] sm:$0xff] }
 0x439   : > { %2650 = vrot.lane.b32.xlu2 %v6002_v13, %s4418_s25  ;;  %6942 = vst [vmem:[#allocation27_spill] sm:$0xff] %v6022_v56 }
 0x43a   : > { %2652 = vrot.lane.b32.xlu0 %v6008_v58, %s4418_s25  ;;  %v6030_v58 = vld [vmem:[#allocation2 + $0x112] sm:$0xff] }
 0x43b   : > { %6944 = vst [vmem:[#allocation30_spill] sm:$0xff] %v6030_v58 }
 0x43c   : > { %v2453_v40 = vpop.permute.xlu0 %2452 }
 0x43d   : > { %2534 = vst.msk [vmem:[#allocation3 + $0x70] sm:$0xff] %vm592_vm3, %v2453_v40  ;;  %v2463_v3 = vpop.permute.xlu2 %2462 }
 0x43e   : > { %2539 = vst.msk [vmem:[#allocation3 + $0x98] sm:$0xff] %vm592_vm3, %v2463_v3  ;;  %v6028_v3 = vld [vmem:[#allocation2 + $0x12a] sm:$0xff] }
 0x43f   : > { %6943 = vst [vmem:[#allocation28_spill] sm:$0xff] %v6028_v3 }
 0x440   : > { %2660 = vrot.lane.b32.xlu1 %v6014_v54, %s4418_s25  ;;  %v6036_v54 = vld [vmem:[#allocation2 + $0x122] sm:$0xff] }
 0x441   : > { %2656 = vrot.lane.b32.xlu2 %v6016_v57, %s4418_s25  ;;  %6945 = vst [vmem:[#allocation31_spill] sm:$0xff] %v6036_v54 }
 0x442   : > { %2658 = vrot.lane.b32.xlu0 %v6022_v56, %s4418_s25  ;;  %v6044_v56 = vld [vmem:[#allocation2 + $0x13a] sm:$0xff] }
 0x443   : > { %6947 = vst [vmem:[#allocation34_spill] sm:$0xff] %v6044_v56 }
 0x444   : > { %v2455_v13 = vpop.permute.xlu1 %2454 }
 0x445   : > { %2535 = vst.msk [vmem:[#allocation3 + $0x78] sm:$0xff] %vm592_vm3, %v2455_v13  ;;  %v2469_v40 = vpop.permute.xlu2 %2468 }
 0x446   : > { %2542 = vst.msk [vmem:[#allocation3 + $0xb0] sm:$0xff] %vm592_vm3, %v2469_v40  ;;  %v6042_v40 = vld [vmem:[#allocation2 + $0x152] sm:$0xff] }
 0x447   : > { %6946 = vst [vmem:[#allocation33_spill] sm:$0xff] %v6042_v40 }
 0x448   : > { %2666 = vrot.lane.b32.xlu1 %v6028_v3, %s4418_s25  ;;  %v6050_v3 = vld [vmem:[#allocation2 + $0x142] sm:$0xff] }
 0x449   : > { %2662 = vrot.lane.b32.xlu2 %v6030_v58, %s4418_s25  ;;  %6948 = vst [vmem:[#allocation35_spill] sm:$0xff] %v6050_v3 }
 0x44a   : > { %2664 = vrot.lane.b32.xlu0 %v6036_v54, %s4418_s25  ;;  %v2583_v54 = vld [vmem:[#allocation2 + $0x172] sm:$0xff] }
 0x44c   : > { %v2461_v57 = vpop.permute.xlu1 %2460 }
 0x44d   : > { %2538 = vst.msk [vmem:[#allocation3 + $0x90] sm:$0xff] %vm592_vm3, %v2461_v57  ;;  %v2475_v13 = vpop.permute.xlu2 %2474 }
 0x44e   : > { %2545 = vst.msk [vmem:[#allocation3 + $0xc8] sm:$0xff] %vm592_vm3, %v2475_v13 }
 0x450   : > { %2672 = vrot.lane.b32.xlu1 %v6042_v40, %s4418_s25  ;;  %v2582_v40 = vld [vmem:[#allocation2 + $0x16a] sm:$0xff] }
 0x451   : > { %2668 = vrot.lane.b32.xlu2 %v6044_v56, %s4418_s25 }
 0x452   : > { %2670 = vrot.lane.b32.xlu0 %v6050_v3, %s4418_s25 }
 0x454   : > { %v2467_v58 = vpop.permute.xlu1 %2466  ;;  %v2459_v57 = vpop.permute.xlu0 %2458 }
 0x455   : > { %2541 = vst.msk [vmem:[#allocation3 + $0xa8] sm:$0xff] %vm592_vm3, %v2467_v58  ;;  %v2481_v13 = vpop.permute.xlu2 %2480 }
 0x456   : > { %2537 = vst.msk [vmem:[#allocation3 + $0x88] sm:$0xff] %vm592_vm3, %v2459_v57 }
 0x457   : > { %2548 = vst.msk [vmem:[#allocation3 + $0xe0] sm:$0xff] %vm592_vm3, %v2481_v13 }
 0x458   : > { %2678 = vrot.lane.b32.xlu1 %v2583_v54, %s4418_s25 }
 0x459   : > { %2674 = vrot.lane.b32.xlu2 %v2581_v23, %s4418_s25 }
 0x45a   : > { %2676 = vrot.lane.b32.xlu0 %v2582_v40, %s4418_s25 }
 0x45c   : > { %v2473_v56 = vpop.permute.xlu1 %2472  ;;  %v2465_v3 = vpop.permute.xlu0 %2464 }
 0x45d   : > { %2544 = vst.msk [vmem:[#allocation3 + $0xc0] sm:$0xff] %vm592_vm3, %v2473_v56 }
 0x45e   : > { %2540 = vst.msk [vmem:[#allocation3 + $0xa0] sm:$0xff] %vm592_vm3, %v2465_v3 }
 0x460   : > { %2812 = vrot.lane.b32.xlu1 %v5642_v4, %s4419_s26 }
 0x461   : > { %2808 = vrot.lane.b32.xlu2 %v5620_v46, %s4419_s26 }
 0x462   : > { %2810 = vrot.lane.b32.xlu0 %v5631_v63, %s4419_s26 }
 0x463   : > { %v2487_v58 = vpop.permute.xlu2 %2486 }
 0x464   : > { %2551 = vst.msk [vmem:[#allocation3 + $0xf8] sm:$0xff] %vm592_vm3, %v2487_v58  ;;  %v2479_v23 = vpop.permute.xlu1 %2478  ;;  %v2471_v54 = vpop.permute.xlu0 %2470 }
 0x465   : > { %2547 = vst.msk [vmem:[#allocation3 + $0xd8] sm:$0xff] %vm592_vm3, %v2479_v23 }
 0x466   : > { %2543 = vst.msk [vmem:[#allocation3 + $0xb8] sm:$0xff] %vm592_vm3, %v2471_v54 }
 0x468   : > { %2818 = vrot.lane.b32.xlu1 %v5673_v17, %s4419_s26  ;;  %v2226_v17 = vpop.f32.mrf.mxu2 }
 0x469   : > { %2814 = vrot.lane.b32.xlu2 %v5652_v27, %s4419_s26  ;;  %v2227_v56 = vadd.f32 %v5611_v52, %v2226_v17 }
 0x46a   : > { %2816 = vrot.lane.b32.xlu0 %v5662_v14, %s4419_s26 }
 0x46b   : > { %v2621_v46 = vpop.permute.xlu2 %2620 }
 0x46c   : > { %2714 = vst.msk [vmem:[#allocation3 + $0x10] sm:$0xff] %vm785_vm4, %v2621_v46  ;;  %v2477_v63 = vpop.permute.xlu0 %2476 }
 0x46d   : > { %2546 = vst.msk [vmem:[#allocation3 + $0xd0] sm:$0xff] %vm592_vm3, %v2477_v63 }
 0x470   : > { %2824 = vrot.lane.b32.xlu1 %v5715_v30, %s4419_s26  ;;  %v2229_v40 = vpop.f32.mrf.mxu2 }
 0x471   : > { %2820 = vrot.lane.b32.xlu2 %v5684_v0, %s4419_s26  ;;  %v2262_v0 = vmax.f32 %v2227_v56, 0.0  ;;  %v6949_v56 = vld [vmem:[#allocation5_spill] sm:$0xff] }
 0x472   : > { %v2485_v4 = vpop.permute.xlu1 %2484  ;;  %2822 = vrot.lane.b32.xlu0 %v5700_v29, %s4419_s26 }
 0x473   : > { %v2627_v27 = vpop.permute.xlu2 %2626  ;;  %2550 = vst.msk [vmem:[#allocation3 + $0xf0] sm:$0xff] %vm592_vm3, %v2485_v4 }
 0x474   : > { %2717 = vst.msk [vmem:[#allocation3 + $0x28] sm:$0xff] %vm785_vm4, %v2627_v27  ;;  %v2483_v14 = vpop.permute.xlu0 %2482 }
 0x475   : > { %2549 = vst.msk [vmem:[#allocation3 + $0xe8] sm:$0xff] %vm592_vm3, %v2483_v14 }
 0x476   : > { %2294 = vst.msk [vmem:[#allocation2 + $0x181] sm:$0xff] %vm225_vm0, %v2262_v0 }
 0x478   : > { %2830 = vrot.lane.b32.xlu1 %v5765_v42, %s4419_s26  ;;  %v2230_v42 = vadd.f32 %v5611_v52, %v2229_v40  ;;  %v6953_v40 = vld [vmem:[#allocation6_spill] sm:$0xff] }
 0x479   : > { %2826 = vrot.lane.b32.xlu2 %v5730_v53, %s4419_s26 }
 0x47a   : > { %v2619_v30 = vpop.permute.xlu1 %2618  ;;  %2828 = vrot.lane.b32.xlu0 %v5750_v39, %s4419_s26  ;;  %v2263_v53 = vmax.f32 %v2230_v42, 0.0 }
 0x47b   : > { %v2633_v29 = vpop.permute.xlu2 %2632  ;;  %2713 = vst.msk [vmem:[#allocation3 + $0x8] sm:$0xff] %vm785_vm4, %v2619_v30 }
 0x47c   : > { %2720 = vst.msk [vmem:[#allocation3 + $0x40] sm:$0xff] %vm785_vm4, %v2633_v29  ;;  %v2617_v3 = vpop.permute.xlu0 %2616 }
 0x47d   : > { %2712 = vst.msk [vmem:[#allocation3] sm:$0xff] %vm785_vm4, %v2617_v3  ;;  %v2774_v4 = vld [vmem:[#allocation2 + $0x180] sm:$0xff] }
 0x47e   : > { %2295 = vst.msk [vmem:[#allocation2 + $0x189] sm:$0xff] %vm225_vm0, %v2263_v53  ;;  %v6243_v29 = vld [vmem:[#allocation2 + $0x181] sm:$0xff] }
 0x47f   : > { %v6952_v3 = vld [vmem:[#allocation14_spill] sm:$0xff] }
 0x480   : > { %2836 = vrot.lane.b32.xlu1 %v5819_v2, %s4419_s26 }
 0x481   : > { %2832 = vrot.lane.b32.xlu2 %v5784_v32, %s4419_s26 }
 0x482   : > { %2834 = vrot.lane.b32.xlu0 %v5805_v34, %s4419_s26  ;;  %v2625_v39 = vpop.permute.xlu1 %2624 }
 0x483   : > { %v2639_v57 = vpop.permute.xlu2 %2638  ;;  %2716 = vst.msk [vmem:[#allocation3 + $0x20] sm:$0xff] %vm785_vm4, %v2625_v39 }
 0x484   : > { %2723 = vst.msk [vmem:[#allocation3 + $0x58] sm:$0xff] %vm785_vm4, %v2639_v57  ;;  %v2623_v13 = vpop.permute.xlu0 %2622 }
 0x485   : > { %2715 = vst.msk [vmem:[#allocation3 + $0x18] sm:$0xff] %vm785_vm4, %v2623_v13  ;;  %v6254_v57 = vld [vmem:[#allocation2 + $0x189] sm:$0xff] }
 0x486   : > { %v6954_v13 = vld [vmem:[#allocation8_spill] sm:$0xff] }
 0x488   : > { %2842 = vrot.lane.b32.xlu1 %v5711_v50, %s4419_s26 }
 0x489   : > { %2838 = vrot.lane.b32.xlu2 %v5847_v37, %s4419_s26 }
 0x48a   : > { %2840 = vrot.lane.b32.xlu0 %v5689_v59, %s4419_s26  ;;  %v2631_v52 = vpop.permute.xlu1 %2630 }
 0x48b   : > { %v2645_v32 = vpop.permute.xlu2 %2644  ;;  %2719 = vst.msk [vmem:[#allocation3 + $0x38] sm:$0xff] %vm785_vm4, %v2631_v52  ;;  %v6955_v52 = vld [vmem:[#allocation7_spill] sm:$0xff] }
 0x48c   : > { %2726 = vst.msk [vmem:[#allocation3 + $0x70] sm:$0xff] %vm785_vm4, %v2645_v32  ;;  %v2629_v34 = vpop.permute.xlu0 %2628 }
 0x48d   : > { %2718 = vst.msk [vmem:[#allocation3 + $0x30] sm:$0xff] %vm785_vm4, %v2629_v34 }
 0x490   : > { %2848 = vrot.lane.b32.xlu1 %v5770_v41, %s4419_s26 }
 0x491   : > { %2844 = vrot.lane.b32.xlu2 %v5736_v9, %s4419_s26 }
 0x492   : > { %2846 = vrot.lane.b32.xlu0 %v5746_v31, %s4419_s26  ;;  %v2637_v50 = vpop.permute.xlu1 %2636 }
 0x493   : > { %v2651_v59 = vpop.permute.xlu2 %2650  ;;  %2722 = vst.msk [vmem:[#allocation3 + $0x50] sm:$0xff] %vm785_vm4, %v2637_v50 }
 0x494   : > { %2729 = vst.msk [vmem:[#allocation3 + $0x88] sm:$0xff] %vm785_vm4, %v2651_v59  ;;  %v2635_v2 = vpop.permute.xlu0 %2634  ;;  %v6956_v59 = vld [vmem:[#allocation10_spill] sm:$0xff] }
 0x495   : > { %2721 = vst.msk [vmem:[#allocation3 + $0x48] sm:$0xff] %vm785_vm4, %v2635_v2  ;;  %v6957_v2 = vld [vmem:[#allocation17_spill] sm:$0xff] }
 0x498   : > { %2854 = vrot.lane.b32.xlu1 %v5813_v6, %s4419_s26 }
 0x499   : > { %2850 = vrot.lane.b32.xlu2 %v5780_v11, %s4419_s26 }
 0x49a   : > { %2852 = vrot.lane.b32.xlu0 %v5795_v26, %s4419_s26  ;;  %v2643_v37 = vpop.permute.xlu1 %2642 }
 0x49b   : > { %v2657_v58 = vpop.permute.xlu2 %2656  ;;  %2725 = vst.msk [vmem:[#allocation3 + $0x68] sm:$0xff] %vm785_vm4, %v2643_v37  ;;  %v6958_v37 = vld [vmem:[#allocation9_spill] sm:$0xff] }
 0x49c   : > { %2732 = vst.msk [vmem:[#allocation3 + $0xa0] sm:$0xff] %vm785_vm4, %v2657_v58  ;;  %v2641_v23 = vpop.permute.xlu0 %2640 }
 0x49d   : > { %2724 = vst.msk [vmem:[#allocation3 + $0x60] sm:$0xff] %vm785_vm4, %v2641_v23 }
 0x4a0   : > { %2860 = vrot.lane.b32.xlu1 %v5876_v16, %s4419_s26 }
 0x4a1   : > { %2856 = vrot.lane.b32.xlu2 %v5832_v22, %s4419_s26 }
 0x4a2   : > { %2858 = vrot.lane.b32.xlu0 %v5857_v35, %s4419_s26  ;;  %v2649_v6 = vpop.permute.xlu1 %2648 }
 0x4a3   : > { %v2663_v54 = vpop.permute.xlu2 %2662  ;;  %2728 = vst.msk [vmem:[#allocation3 + $0x80] sm:$0xff] %vm785_vm4, %v2649_v6 }
 0x4a4   : > { %2735 = vst.msk [vmem:[#allocation3 + $0xb8] sm:$0xff] %vm785_vm4, %v2663_v54  ;;  %v2647_v46 = vpop.permute.xlu0 %2646  ;;  %v6959_v54 = vld [vmem:[#allocation13_spill] sm:$0xff] }
 0x4a5   : > { %2727 = vst.msk [vmem:[#allocation3 + $0x78] sm:$0xff] %vm785_vm4, %v2647_v46  ;;  %v6960_v46 = vld [vmem:[#allocation20_spill] sm:$0xff] }
 0x4a8   : > { %2866 = vrot.lane.b32.xlu1 %v5929_v12, %s4419_s26  ;;  %v2775_v12 = vld [vmem:[#allocation2 + $0x188] sm:$0xff] }
 0x4a9   : > { %2862 = vrot.lane.b32.xlu2 %v5896_v43, %s4419_s26 }
 0x4aa   : > { %2864 = vrot.lane.b32.xlu0 %v5912_v28, %s4419_s26  ;;  %v2655_v16 = vpop.permute.xlu1 %2654 }
 0x4ab   : > { %v2669_v35 = vpop.permute.xlu2 %2668  ;;  %2731 = vst.msk [vmem:[#allocation3 + $0x98] sm:$0xff] %vm785_vm4, %v2655_v16  ;;  %v6961_v16 = vld [vmem:[#allocation12_spill] sm:$0xff] }
 0x4ac   : > { %2738 = vst.msk [vmem:[#allocation3 + $0xd0] sm:$0xff] %vm785_vm4, %v2669_v35  ;;  %v2653_v63 = vpop.permute.xlu0 %2652 }
 0x4ad   : > { %2730 = vst.msk [vmem:[#allocation3 + $0x90] sm:$0xff] %vm785_vm4, %v2653_v63 }
 0x4b0   : > { %3000 = vrot.lane.b32.xlu1 %v5618_v44, %s4420_s27 }
 0x4b1   : > { %2868 = vrot.lane.b32.xlu2 %v2774_v4, %s4419_s26 }
 0x4b2   : > { %2870 = vrot.lane.b32.xlu0 %v2775_v12, %s4419_s26  ;;  %v2661_v43 = vpop.permute.xlu1 %2660  ;;  %v6962_v12 = vld [vmem:[#allocation16_spill] sm:$0xff] }
 0x4b3   : > { %v2675_v28 = vpop.permute.xlu2 %2674  ;;  %2734 = vst.msk [vmem:[#allocation3 + $0xb0] sm:$0xff] %vm785_vm4, %v2661_v43  ;;  %v6963_v43 = vld [vmem:[#allocation23_spill] sm:$0xff] }
 0x4b4   : > { %2741 = vst.msk [vmem:[#allocation3 + $0xe8] sm:$0xff] %vm785_vm4, %v2675_v28  ;;  %v2659_v27 = vpop.permute.xlu0 %2658  ;;  %v6964_v28 = vld [vmem:[#allocation15_spill] sm:$0xff] }
 0x4b5   : > { %2733 = vst.msk [vmem:[#allocation3 + $0xa8] sm:$0xff] %vm785_vm4, %v2659_v27 }
 0x4b8   : > { %3006 = vrot.lane.b32.xlu1 %v5650_v15, %s4420_s27 }
 0x4b9   : > { %3002 = vrot.lane.b32.xlu2 %v5629_v10, %s4420_s27 }
 0x4ba   : > { %3004 = vrot.lane.b32.xlu0 %v5640_v8, %s4420_s27  ;;  %v2667_v44 = vpop.permute.xlu1 %2666 }
 0x4bb   : > { %v2809_v14 = vpop.permute.xlu2 %2808  ;;  %2737 = vst.msk [vmem:[#allocation3 + $0xc8] sm:$0xff] %vm785_vm4, %v2667_v44 }
 0x4bc   : > { %2904 = vst.msk [vmem:[#allocation3] sm:$0xff] %vm978_vm5, %v2809_v14  ;;  %v2665_v17 = vpop.permute.xlu0 %2664 }
 0x4bd   : > { %2736 = vst.msk [vmem:[#allocation3 + $0xc0] sm:$0xff] %vm785_vm4, %v2665_v17  ;;  %v6965_v17 = vld [vmem:[#allocation19_spill] sm:$0xff] }
 0x4c0   : > { %3012 = vrot.lane.b32.xlu1 %v5682_v38, %s4420_s27 }
 0x4c1   : > { %3008 = vrot.lane.b32.xlu2 %v5660_v24, %s4420_s27 }
 0x4c2   : > { %3010 = vrot.lane.b32.xlu0 %v5671_v55, %s4420_s27  ;;  %v2673_v10 = vpop.permute.xlu1 %2672 }
 0x4c3   : > { %v2815_v8 = vpop.permute.xlu2 %2814  ;;  %2740 = vst.msk [vmem:[#allocation3 + $0xe0] sm:$0xff] %vm785_vm4, %v2673_v10  ;;  %v6966_v10 = vld [vmem:[#allocation26_spill] sm:$0xff] }
 0x4c4   : > { %2907 = vst.msk [vmem:[#allocation3 + $0x18] sm:$0xff] %vm978_vm5, %v2815_v8  ;;  %v2671_v15 = vpop.permute.xlu0 %2670  ;;  %v6967_v8 = vld [vmem:[#allocation18_spill] sm:$0xff] }
 0x4c5   : > { %2739 = vst.msk [vmem:[#allocation3 + $0xd8] sm:$0xff] %vm785_vm4, %v2671_v15 }
 0x4c8   : > { %3018 = vrot.lane.b32.xlu1 %v5727_v45, %s4420_s27 }
 0x4c9   : > { %3014 = vrot.lane.b32.xlu2 %v5698_v19, %s4420_s27 }
 0x4ca   : > { %3016 = vrot.lane.b32.xlu0 %v5713_v62, %s4420_s27  ;;  %v2679_v24 = vpop.permute.xlu1 %2678 }
 0x4cb   : > { %v2821_v55 = vpop.permute.xlu2 %2820  ;;  %2743 = vst.msk [vmem:[#allocation3 + $0xf8] sm:$0xff] %vm785_vm4, %v2679_v24 }
 0x4cc   : > { %2910 = vst.msk [vmem:[#allocation3 + $0x30] sm:$0xff] %vm978_vm5, %v2821_v55  ;;  %v2677_v38 = vpop.permute.xlu0 %2676 }
 0x4cd   : > { %2742 = vst.msk [vmem:[#allocation3 + $0xf0] sm:$0xff] %vm785_vm4, %v2677_v38  ;;  %v6968_v38 = vld [vmem:[#allocation22_spill] sm:$0xff] }
 0x4d0   : > { %3024 = vrot.lane.b32.xlu1 %v5782_v48, %s4420_s27 }
 0x4d1   : > { %3020 = vrot.lane.b32.xlu2 %v5748_v33, %s4420_s27 }
 0x4d2   : > { %3022 = vrot.lane.b32.xlu0 %v5762_v20, %s4420_s27  ;;  %v2813_v19 = vpop.permute.xlu1 %2812 }
 0x4d3   : > { %v2827_v62 = vpop.permute.xlu2 %2826  ;;  %2906 = vst.msk [vmem:[#allocation3 + $0x10] sm:$0xff] %vm978_vm5, %v2813_v19  ;;  %v6969_v19 = vld [vmem:[#allocation29_spill] sm:$0xff] }
 0x4d4   : > { %2913 = vst.msk [vmem:[#allocation3 + $0x48] sm:$0xff] %vm978_vm5, %v2827_v62  ;;  %v2811_v45 = vpop.permute.xlu0 %2810  ;;  %v6970_v62 = vld [vmem:[#allocation21_spill] sm:$0xff] }
 0x4d5   : > { %2905 = vst.msk [vmem:[#allocation3 + $0x8] sm:$0xff] %vm978_vm5, %v2811_v45 }
 0x4d8   : > { %3030 = vrot.lane.b32.xlu1 %v5837_v1, %s4420_s27 }
 0x4d9   : > { %3026 = vrot.lane.b32.xlu2 %v5798_v61, %s4420_s27 }
 0x4da   : > { %3028 = vrot.lane.b32.xlu0 %v5817_v18, %s4420_s27  ;;  %v2819_v33 = vpop.permute.xlu1 %2818 }
 0x4db   : > { %v2833_v20 = vpop.permute.xlu2 %2832  ;;  %2909 = vst.msk [vmem:[#allocation3 + $0x28] sm:$0xff] %vm978_vm5, %v2819_v33 }
 0x4dc   : > { %2916 = vst.msk [vmem:[#allocation3 + $0x60] sm:$0xff] %vm978_vm5, %v2833_v20  ;;  %v2817_v48 = vpop.permute.xlu0 %2816 }
 0x4dd   : > { %2908 = vst.msk [vmem:[#allocation3 + $0x20] sm:$0xff] %vm978_vm5, %v2817_v48  ;;  %v6971_v48 = vld [vmem:[#allocation27_spill] sm:$0xff] }
 0x4e0   : > { %3036 = vrot.lane.b32.xlu1 %v5861_v60, %s4420_s27 }
 0x4e1   : > { %3032 = vrot.lane.b32.xlu2 %v5815_v25, %s4420_s27 }
 0x4e2   : > { %3034 = vrot.lane.b32.xlu0 %v5845_v47, %s4420_s27  ;;  %v2825_v61 = vpop.permute.xlu1 %2824 }
 0x4e3   : > { %v2839_v18 = vpop.permute.xlu2 %2838  ;;  %2912 = vst.msk [vmem:[#allocation3 + $0x40] sm:$0xff] %vm978_vm5, %v2825_v61  ;;  %v6972_v61 = vld [vmem:[#allocation32_spill] sm:$0xff] }
 0x4e4   : > { %2919 = vst.msk [vmem:[#allocation3 + $0x78] sm:$0xff] %vm978_vm5, %v2839_v18  ;;  %v2823_v1 = vpop.permute.xlu0 %2822  ;;  %v6973_v18 = vld [vmem:[#allocation25_spill] sm:$0xff] }
 0x4e5   : > { %2911 = vst.msk [vmem:[#allocation3 + $0x38] sm:$0xff] %vm978_vm5, %v2823_v1 }
 0x4e8   : > { %3042 = vrot.lane.b32.xlu1 %v5881_v51, %s4420_s27 }
 0x4e9   : > { %3038 = vrot.lane.b32.xlu2 %v5835_v21, %s4420_s27 }
 0x4ea   : > { %3040 = vrot.lane.b32.xlu0 %v5869_v7, %s4420_s27  ;;  %v2831_v25 = vpop.permute.xlu1 %2830 }
 0x4eb   : > { %v2845_v47 = vpop.permute.xlu2 %2844  ;;  %2915 = vst.msk [vmem:[#allocation3 + $0x58] sm:$0xff] %vm978_vm5, %v2831_v25 }
 0x4ec   : > { %2922 = vst.msk [vmem:[#allocation3 + $0x90] sm:$0xff] %vm978_vm5, %v2845_v47  ;;  %v2829_v60 = vpop.permute.xlu0 %2828 }
 0x4ed   : > { %2914 = vst.msk [vmem:[#allocation3 + $0x50] sm:$0xff] %vm978_vm5, %v2829_v60  ;;  %v6974_v60 = vld [vmem:[#allocation31_spill] sm:$0xff] }
 0x4f0   : > { %3048 = vrot.lane.b32.xlu1 %v5898_v5, %s4420_s27  ;;  %v6950_v5 = vld [vmem:[#allocation11_spill] sm:$0xff] }
 0x4f1   : > { %3044 = vrot.lane.b32.xlu2 %v5859_v36, %s4420_s27  ;;  %v6951_v36 = vld [vmem:[#allocation4_spill] sm:$0xff] }
 0x4f2   : > { %3046 = vrot.lane.b32.xlu0 %v5889_v49, %s4420_s27  ;;  %v2837_v21 = vpop.permute.xlu1 %2836 }
 0x4f3   : > { %v2851_v7 = vpop.permute.xlu2 %2850  ;;  %2918 = vst.msk [vmem:[#allocation3 + $0x70] sm:$0xff] %vm978_vm5, %v2837_v21  ;;  %v6975_v21 = vld [vmem:[#allocation24_spill] sm:$0xff] }
 0x4f4   : > { %2925 = vst.msk [vmem:[#allocation3 + $0xa8] sm:$0xff] %vm978_vm5, %v2851_v7  ;;  %v2835_v51 = vpop.permute.xlu0 %2834  ;;  %v6976_v7 = vld [vmem:[#allocation30_spill] sm:$0xff] }
 0x4f5   : > { %2917 = vst.msk [vmem:[#allocation3 + $0x68] sm:$0xff] %vm978_vm5, %v2835_v51 }
 0x4f8   : > { %3054 = vrot.lane.b32.xlu1 %v6949_v56, %s4420_s27 }
 0x4f9   : > { %3050 = vrot.lane.b32.xlu2 %v6950_v5, %s4420_s27 }
 0x4fa   : > { %3052 = vrot.lane.b32.xlu0 %v6951_v36, %s4420_s27  ;;  %v2843_v0 = vpop.permute.xlu1 %2842  ;;  %v6977_v36 = vld [vmem:[#allocation35_spill] sm:$0xff] }
 0x4fb   : > { %v2857_v49 = vpop.permute.xlu2 %2856  ;;  %2921 = vst.msk [vmem:[#allocation3 + $0x88] sm:$0xff] %vm978_vm5, %v2843_v0  ;;  %v6978_v0 = vld [vmem:[#allocation28_spill] sm:$0xff] }
 0x4fc   : > { %2928 = vst.msk [vmem:[#allocation3 + $0xc0] sm:$0xff] %vm978_vm5, %v2857_v49  ;;  %v2841_v30 = vpop.permute.xlu0 %2840  ;;  %v6979_v49 = vld [vmem:[#allocation34_spill] sm:$0xff] }
 0x4fd   : > { %2920 = vst.msk [vmem:[#allocation3 + $0x80] sm:$0xff] %vm978_vm5, %v2841_v30 }
 0x500   : > { %3060 = vrot.lane.b32.xlu1 %v6243_v29, %s4420_s27 }
 0x501   : > { %3056 = vrot.lane.b32.xlu2 %v6952_v3, %s4420_s27 }
 0x502   : > { %3058 = vrot.lane.b32.xlu0 %v6953_v40, %s4420_s27  ;;  %v2849_v42 = vpop.permute.xlu1 %2848 }
 0x503   : > { %v2863_v53 = vpop.permute.xlu2 %2862  ;;  %2924 = vst.msk [vmem:[#allocation3 + $0xa0] sm:$0xff] %vm978_vm5, %v2849_v42  ;;  %v3528_v42 = vld [vmem:[#allocation2 + $0xf1] sm:$0xff] }
 0x504   : > { %2931 = vst.msk [vmem:[#allocation3 + $0xd8] sm:$0xff] %vm978_vm5, %v2863_v53  ;;  %v2847_v39 = vpop.permute.xlu0 %2846  ;;  %v6980_v53 = vld [vmem:[#allocation33_spill] sm:$0xff] }
 0x505   : > { %2923 = vst.msk [vmem:[#allocation3 + $0x98] sm:$0xff] %vm978_vm5, %v2847_v39 }
 0x508   : > { %3194 = vrot.lane.b32.xlu1 %v6954_v13, %s4421_s28 }
 0x509   : > { %3062 = vrot.lane.b32.xlu2 %v6254_v57, %s4420_s27 }
 0x50a   : > { %3192 = vrot.lane.b32.xlu0 %v6955_v52, %s4421_s28  ;;  %v2855_v32 = vpop.permute.xlu1 %2854 }
 0x50b   : > { %v2869_v34 = vpop.permute.xlu2 %2868  ;;  %2927 = vst.msk [vmem:[#allocation3 + $0xb8] sm:$0xff] %vm978_vm5, %v2855_v32  ;;  %v3512_v32 = vld [vmem:[#allocation2 + $0x31] sm:$0xff] }
 0x50c   : > { %2934 = vst.msk [vmem:[#allocation3 + $0xf0] sm:$0xff] %vm978_vm5, %v2869_v34  ;;  %v2853_v50 = vpop.permute.xlu0 %2852  ;;  %v3320_v34 = vld [vmem:[#allocation2 + $0x30] sm:$0xff] }
 0x50d   : > { %2926 = vst.msk [vmem:[#allocation3 + $0xb0] sm:$0xff] %vm978_vm5, %v2853_v50 }
 0x510   : > { %3200 = vrot.lane.b32.xlu1 %v6956_v59, %s4421_s28 }
 0x511   : > { %3196 = vrot.lane.b32.xlu2 %v6957_v2, %s4421_s28  ;;  %v3529_v2 = vld [vmem:[#allocation2 + $0xf9] sm:$0xff] }
 0x512   : > { %3198 = vrot.lane.b32.xlu0 %v6958_v37, %s4421_s28  ;;  %v2861_v58 = vpop.permute.xlu1 %2860  ;;  %v3704_v37 = vld [vmem:[#allocation2 + $0x32] sm:$0xff] }
 0x513   : > { %v3003_v23 = vpop.permute.xlu2 %3002  ;;  %2930 = vst.msk [vmem:[#allocation3 + $0xd0] sm:$0xff] %vm978_vm5, %v2861_v58 }
 0x514   : > { %3097 = vst.msk [vmem:[#allocation3 + $0x8] sm:$0xff] %vm1171_vm6, %v3003_v23  ;;  %v2859_v6 = vpop.permute.xlu0 %2858 }
 0x515   : > { %2929 = vst.msk [vmem:[#allocation3 + $0xc8] sm:$0xff] %vm978_vm5, %v2859_v6 }
 0x518   : > { %3206 = vrot.lane.b32.xlu1 %v6959_v54, %s4421_s28  ;;  %v3513_v54 = vld [vmem:[#allocation2 + $0x39] sm:$0xff] }
 0x519   : > { %3202 = vrot.lane.b32.xlu2 %v6960_v46, %s4421_s28  ;;  %v3321_v46 = vld [vmem:[#allocation2 + $0x38] sm:$0xff] }
 0x51a   : > { %3204 = vrot.lane.b32.xlu0 %v6961_v16, %s4421_s28  ;;  %v2867_v35 = vpop.permute.xlu1 %2866 }
 0x51b   : > { %v3009_v63 = vpop.permute.xlu2 %3008  ;;  %2933 = vst.msk [vmem:[#allocation3 + $0xe8] sm:$0xff] %vm978_vm5, %v2867_v35 }
 0x51c   : > { %3100 = vst.msk [vmem:[#allocation3 + $0x20] sm:$0xff] %vm1171_vm6, %v3009_v63  ;;  %v2865_v4 = vpop.permute.xlu0 %2864  ;;  %v3530_v63 = vld [vmem:[#allocation2 + $0x109] sm:$0xff] }
 0x51d   : > { %2932 = vst.msk [vmem:[#allocation3 + $0xe0] sm:$0xff] %vm978_vm5, %v2865_v4  ;;  %v3705_v4 = vld [vmem:[#allocation2 + $0x3a] sm:$0xff] }
 0x520   : > { %3212 = vrot.lane.b32.xlu1 %v6962_v12, %s4421_s28 }
 0x521   : > { %3208 = vrot.lane.b32.xlu2 %v6963_v43, %s4421_s28 }
 0x522   : > { %3210 = vrot.lane.b32.xlu0 %v6964_v28, %s4421_s28  ;;  %v3001_v27 = vpop.permute.xlu1 %3000 }
 0x523   : > { %v3015_v44 = vpop.permute.xlu2 %3014  ;;  %3096 = vst.msk [vmem:[#allocation3] sm:$0xff] %vm1171_vm6, %v3001_v27  ;;  %v3514_v27 = vld [vmem:[#allocation2 + $0x49] sm:$0xff] }
 0x524   : > { %3103 = vst.msk [vmem:[#allocation3 + $0x38] sm:$0xff] %vm1171_vm6, %v3015_v44  ;;  %v2871_v14 = vpop.permute.xlu0 %2870  ;;  %v3322_v44 = vld [vmem:[#allocation2 + $0x48] sm:$0xff] }
 0x525   : > { %2935 = vst.msk [vmem:[#allocation3 + $0xf8] sm:$0xff] %vm978_vm5, %v2871_v14 }
 0x528   : > { %3218 = vrot.lane.b32.xlu1 %v6965_v17, %s4421_s28 }
 0x529   : > { %3214 = vrot.lane.b32.xlu2 %v6966_v10, %s4421_s28  ;;  %v3531_v10 = vld [vmem:[#allocation2 + $0x111] sm:$0xff] }
 0x52a   : > { %3216 = vrot.lane.b32.xlu0 %v6967_v8, %s4421_s28  ;;  %v3007_v15 = vpop.permute.xlu1 %3006  ;;  %v3706_v8 = vld [vmem:[#allocation2 + $0x4a] sm:$0xff] }
 0x52b   : > { %v3021_v24 = vpop.permute.xlu2 %3020  ;;  %3099 = vst.msk [vmem:[#allocation3 + $0x18] sm:$0xff] %vm1171_vm6, %v3007_v15 }
 0x52c   : > { %3106 = vst.msk [vmem:[#allocation3 + $0x50] sm:$0xff] %vm1171_vm6, %v3021_v24  ;;  %v3005_v55 = vpop.permute.xlu0 %3004 }
 0x52d   : > { %3098 = vst.msk [vmem:[#allocation3 + $0x10] sm:$0xff] %vm1171_vm6, %v3005_v55 }
 0x530   : > { %3224 = vrot.lane.b32.xlu1 %v6968_v38, %s4421_s28  ;;  %v3515_v38 = vld [vmem:[#allocation2 + $0x51] sm:$0xff] }
 0x531   : > { %3220 = vrot.lane.b32.xlu2 %v6969_v19, %s4421_s28  ;;  %v3323_v19 = vld [vmem:[#allocation2 + $0x50] sm:$0xff] }
 0x532   : > { %3222 = vrot.lane.b32.xlu0 %v6970_v62, %s4421_s28  ;;  %v3013_v45 = vpop.permute.xlu1 %3012 }
 0x533   : > { %v3027_v33 = vpop.permute.xlu2 %3026  ;;  %3102 = vst.msk [vmem:[#allocation3 + $0x30] sm:$0xff] %vm1171_vm6, %v3013_v45 }
 0x534   : > { %3109 = vst.msk [vmem:[#allocation3 + $0x68] sm:$0xff] %vm1171_vm6, %v3027_v33  ;;  %v3011_v20 = vpop.permute.xlu0 %3010  ;;  %v3532_v33 = vld [vmem:[#allocation2 + $0x121] sm:$0xff] }
 0x535   : > { %3101 = vst.msk [vmem:[#allocation3 + $0x28] sm:$0xff] %vm1171_vm6, %v3011_v20  ;;  %v3707_v20 = vld [vmem:[#allocation2 + $0x52] sm:$0xff] }
 0x538   : > { %3230 = vrot.lane.b32.xlu1 %v6971_v48, %s4421_s28 }
 0x539   : > { %3226 = vrot.lane.b32.xlu2 %v6972_v61, %s4421_s28 }
 0x53a   : > { %3228 = vrot.lane.b32.xlu0 %v6973_v18, %s4421_s28  ;;  %v3019_v1 = vpop.permute.xlu1 %3018 }
 0x53b   : > { %v3033_v25 = vpop.permute.xlu2 %3032  ;;  %3105 = vst.msk [vmem:[#allocation3 + $0x48] sm:$0xff] %vm1171_vm6, %v3019_v1  ;;  %v3516_v1 = vld [vmem:[#allocation2 + $0x61] sm:$0xff] }
 0x53c   : > { %3112 = vst.msk [vmem:[#allocation3 + $0x80] sm:$0xff] %vm1171_vm6, %v3033_v25  ;;  %v3017_v47 = vpop.permute.xlu0 %3016  ;;  %v3724_v25 = vld [vmem:[#allocation2 + $0x122] sm:$0xff] }
 0x53d   : > { %3104 = vst.msk [vmem:[#allocation3 + $0x40] sm:$0xff] %vm1171_vm6, %v3017_v47  ;;  %v3324_v47 = vld [vmem:[#allocation2 + $0x60] sm:$0xff] }
 0x540   : > { %3236 = vrot.lane.b32.xlu1 %v6974_v60, %s4421_s28 }
 0x541   : > { %3232 = vrot.lane.b32.xlu2 %v6975_v21, %s4421_s28 }
 0x542   : > { %3234 = vrot.lane.b32.xlu0 %v6976_v7, %s4421_s28  ;;  %v3025_v51 = vpop.permute.xlu1 %3024 }
 0x543   : > { %v3039_v56 = vpop.permute.xlu2 %3038  ;;  %3108 = vst.msk [vmem:[#allocation3 + $0x60] sm:$0xff] %vm1171_vm6, %v3025_v51  ;;  %v3341_v51 = vld [vmem:[#allocation2 + $0x128] sm:$0xff] }
 0x544   : > { %3115 = vst.msk [vmem:[#allocation3 + $0x98] sm:$0xff] %vm1171_vm6, %v3039_v56  ;;  %v3023_v5 = vpop.permute.xlu0 %3022  ;;  %v3708_v56 = vld [vmem:[#allocation2 + $0x62] sm:$0xff] }
 0x545   : > { %3107 = vst.msk [vmem:[#allocation3 + $0x58] sm:$0xff] %vm1171_vm6, %v3023_v5 }
 0x548   : > { %3242 = vrot.lane.b32.xlu1 %v6977_v36, %s4421_s28 }
 0x549   : > { %3238 = vrot.lane.b32.xlu2 %v6978_v0, %s4421_s28 }
 0x54a   : > { %3240 = vrot.lane.b32.xlu0 %v6979_v49, %s4421_s28  ;;  %v3031_v30 = vpop.permute.xlu1 %3030  ;;  %v3517_v49 = vld [vmem:[#allocation2 + $0x69] sm:$0xff] }
 0x54b   : > { %v3045_v3 = vpop.permute.xlu2 %3044  ;;  %3111 = vst.msk [vmem:[#allocation3 + $0x78] sm:$0xff] %vm1171_vm6, %v3031_v30  ;;  %v3725_v30 = vld [vmem:[#allocation2 + $0x12a] sm:$0xff] }
 0x54c   : > { %3118 = vst.msk [vmem:[#allocation3 + $0xb0] sm:$0xff] %vm1171_vm6, %v3045_v3  ;;  %v3029_v40 = vpop.permute.xlu0 %3028  ;;  %v3932_v3 = vld [vmem:[%s6788_s3 + $0x20] sm:$0xf] }
 0x54d   : > { %3110 = vst.msk [vmem:[#allocation3 + $0x70] sm:$0xff] %vm1171_vm6, %v3029_v40  ;;  %v3931_v40 = vld [vmem:[%s6788_s3 + $0x18] sm:$0xff]  ;;  %4384 = vmatpush.msk.msra.mxu3 %vm2115_vm10, %v3932_v3  ;;  %4342 = vmatpush.msk.msra.mxu1 %vm2115_vm10, %v3932_v3  ;;  %v3346_v3 = vld [vmem:[#allocation2 + $0x168] sm:$0xff] }
 0x54f   : > { %4385 = vmatpush.msra.mxu3 %v3931_v40  ;;  %4048 = vmatpush.msra.mxu1 %v3931_v40  ;;  %v3713_v40 = vld [vmem:[#allocation2 + $0x9a] sm:$0xff] }
 0x550   : > { %3608 = vrot.lane.b32.xlu1 %v3528_v42, %s4423_s30  ;;  %v3325_v42 = vld [vmem:[#allocation2 + $0x68] sm:$0xff] }
 0x551   : > { %3244 = vrot.lane.b32.xlu2 %v6980_v53, %s4421_s28 }
 0x552   : > { %3416 = vrot.lane.b32.xlu0 %v5736_v9, %s4422_s29  ;;  %v3037_v39 = vpop.permute.xlu1 %3036 }
 0x553   : > { %v3051_v13 = vpop.permute.xlu2 %3050  ;;  %3114 = vst.msk [vmem:[#allocation3 + $0x90] sm:$0xff] %vm1171_vm6, %v3037_v39 }
 0x554   : > { %3121 = vst.msk [vmem:[#allocation3 + $0xc8] sm:$0xff] %vm1171_vm6, %v3051_v13  ;;  %v3035_v52 = vpop.permute.xlu0 %3034  ;;  %v3930_v13 = vld [vmem:[%s6788_s3 + $0x10] sm:$0xff] }
 0x555   : > { %3113 = vst.msk [vmem:[#allocation3 + $0x88] sm:$0xff] %vm1171_vm6, %v3035_v52  ;;  %4386 = vmatpush.msra.mxu3 %v3930_v13  ;;  %4049 = vmatpush.msra.mxu1 %v3930_v13  ;;  %v3730_v13 = vld [vmem:[#allocation2 + $0x16a] sm:$0xff] }
 0x558   : > { %3576 = vrot.lane.b32.xlu1 %v3512_v32, %s4423_s30  ;;  %v3929_v32 = vld [vmem:[%s6788_s3 + $0x8] sm:$0xff] }
 0x559   : > { %3800 = vrot.lane.b32.xlu2 %v6973_v18, %s4424_s6  ;;  %4387 = vmatpush.msra.mxu3 %v3929_v32 }
 0x55a   : > { %3384 = vrot.lane.b32.xlu0 %v3320_v34, %s4422_s29  ;;  %v3043_v50 = vpop.permute.xlu1 %3042  ;;  %v3928_v34 = vld [vmem:[%s6788_s3] sm:$0xff]  ;;  %4050 = vmatpush.msra.mxu1 %v3929_v32 }
 0x55b   : > { %v3057_v9 = vpop.permute.xlu2 %3056  ;;  %3117 = vst.msk [vmem:[#allocation3 + $0xa8] sm:$0xff] %vm1171_vm6, %v3043_v50  ;;  %v3534_v50 = vld [vmem:[#allocation2 + $0x139] sm:$0xff]  ;;  %4388 = vmatpush.msra.mxu3 %v3928_v34 }
 0x55c   : > { %3124 = vst.msk [vmem:[#allocation3 + $0xe0] sm:$0xff] %vm1171_vm6, %v3057_v9  ;;  %v3041_v59 = vpop.permute.xlu0 %3040  ;;  %v3709_v9 = vld [vmem:[#allocation2 + $0x6a] sm:$0xff]  ;;  %4051 = vmatpush.msra.mxu1 %v3928_v34 }
 0x55d   : > { %3116 = vst.msk [vmem:[#allocation3 + $0xa0] sm:$0xff] %vm1171_vm6, %v3041_v59 }
 0x560   : > { %3610 = vrot.lane.b32.xlu1 %v3529_v2, %s4423_s30 }
 0x561   : > { %3418 = vrot.lane.b32.xlu2 %v5746_v31, %s4422_s29 }
 0x562   : > { %3768 = vrot.lane.b32.xlu0 %v3704_v37, %s4424_s6  ;;  %v3049_v58 = vpop.permute.xlu1 %3048 }
 0x563   : > { %v3063_v23 = vpop.permute.xlu2 %3062  ;;  %3120 = vst.msk [vmem:[#allocation3 + $0xc0] sm:$0xff] %vm1171_vm6, %v3049_v58  ;;  %v3518_v58 = vld [vmem:[#allocation2 + $0x79] sm:$0xff] }
 0x564   : > { %3127 = vst.msk [vmem:[#allocation3 + $0xf8] sm:$0xff] %vm1171_vm6, %v3063_v23  ;;  %v3047_v6 = vpop.permute.xlu0 %3046  ;;  %v3726_v23 = vld [vmem:[#allocation2 + $0x13a] sm:$0xff] }
 0x565   : > { %3119 = vst.msk [vmem:[#allocation3 + $0xb8] sm:$0xff] %vm1171_vm6, %v3047_v6  ;;  %v3326_v6 = vld [vmem:[#allocation2 + $0x78] sm:$0xff] }
 0x568   : > { %3578 = vrot.lane.b32.xlu1 %v3513_v54, %s4423_s30 }
 0x569   : > { %3802 = vrot.lane.b32.xlu2 %v6971_v48, %s4424_s6 }
 0x56a   : > { %3386 = vrot.lane.b32.xlu0 %v3321_v46, %s4422_s29  ;;  %v3055_v31 = vpop.permute.xlu1 %3054 }
 0x56b   : > { %v3197_v16 = vpop.permute.xlu2 %3196  ;;  %3123 = vst.msk [vmem:[#allocation3 + $0xd8] sm:$0xff] %vm1171_vm6, %v3055_v31  ;;  %v3535_v31 = vld [vmem:[#allocation2 + $0x141] sm:$0xff] }
 0x56c   : > { %3290 = vst.msk [vmem:[#allocation3 + $0x10] sm:$0xff] %vm1364_vm7, %v3197_v16  ;;  %v3053_v35 = vpop.permute.xlu0 %3052  ;;  %v3343_v16 = vld [vmem:[#allocation2 + $0x140] sm:$0xff] }
 0x56d   : > { %3122 = vst.msk [vmem:[#allocation3 + $0xd0] sm:$0xff] %vm1171_vm6, %v3053_v35  ;;  %v3710_v35 = vld [vmem:[#allocation2 + $0x7a] sm:$0xff] }
 0x570   : > { %3612 = vrot.lane.b32.xlu1 %v3530_v63, %s4423_s30 }
 0x571   : > { %3420 = vrot.lane.b32.xlu2 %v5770_v41, %s4422_s29 }
 0x572   : > { %3770 = vrot.lane.b32.xlu0 %v3705_v4, %s4424_s6  ;;  %v3061_v12 = vpop.permute.xlu1 %3060 }
 0x573   : > { %v3203_v43 = vpop.permute.xlu2 %3202  ;;  %3126 = vst.msk [vmem:[#allocation3 + $0xf0] sm:$0xff] %vm1171_vm6, %v3061_v12 }
 0x574   : > { %3293 = vst.msk [vmem:[#allocation3 + $0x28] sm:$0xff] %vm1364_vm7, %v3203_v43  ;;  %v3059_v28 = vpop.permute.xlu0 %3058  ;;  %v3519_v43 = vld [vmem:[#allocation2 + $0x81] sm:$0xff] }
 0x575   : > { %3125 = vst.msk [vmem:[#allocation3 + $0xe8] sm:$0xff] %vm1171_vm6, %v3059_v28  ;;  %v3727_v28 = vld [vmem:[#allocation2 + $0x142] sm:$0xff] }
 0x578   : > { %3580 = vrot.lane.b32.xlu1 %v3514_v27, %s4423_s30  ;;  %v3327_v27 = vld [vmem:[#allocation2 + $0x80] sm:$0xff] }
 0x579   : > { %3804 = vrot.lane.b32.xlu2 %v6975_v21, %s4424_s6 }
 0x57a   : > { %3388 = vrot.lane.b32.xlu0 %v3322_v44, %s4422_s29  ;;  %v3195_v41 = vpop.permute.xlu1 %3194 }
 0x57b   : > { %v3209_v14 = vpop.permute.xlu2 %3208  ;;  %3289 = vst.msk [vmem:[#allocation3 + $0x8] sm:$0xff] %vm1364_vm7, %v3195_v41 }
 0x57c   : > { %3296 = vst.msk [vmem:[#allocation3 + $0x40] sm:$0xff] %vm1364_vm7, %v3209_v14  ;;  %v3193_v17 = vpop.permute.xlu0 %3192 }
 0x57d   : > { %3288 = vst.msk [vmem:[#allocation3] sm:$0xff] %vm1364_vm7, %v3193_v17 }
 0x580   : > { %3614 = vrot.lane.b32.xlu1 %v3531_v10, %s4423_s30  ;;  %v3536_v10 = vld [vmem:[#allocation2 + $0x151] sm:$0xff] }
 0x581   : > { %3422 = vrot.lane.b32.xlu2 %v5780_v11, %s4422_s29 }
 0x582   : > { %3772 = vrot.lane.b32.xlu0 %v3706_v8, %s4424_s6  ;;  %v3201_v15 = vpop.permute.xlu1 %3200  ;;  %v3344_v8 = vld [vmem:[#allocation2 + $0x150] sm:$0xff] }
 0x583   : > { %v3215_v24 = vpop.permute.xlu2 %3214  ;;  %3292 = vst.msk [vmem:[#allocation3 + $0x20] sm:$0xff] %vm1364_vm7, %v3201_v15  ;;  %v3711_v15 = vld [vmem:[#allocation2 + $0x82] sm:$0xff] }
 0x584   : > { %3299 = vst.msk [vmem:[#allocation3 + $0x58] sm:$0xff] %vm1364_vm7, %v3215_v24  ;;  %v3199_v55 = vpop.permute.xlu0 %3198 }
 0x585   : > { %3291 = vst.msk [vmem:[#allocation3 + $0x18] sm:$0xff] %vm1364_vm7, %v3199_v55 }
 0x588   : > { %3582 = vrot.lane.b32.xlu1 %v3515_v38, %s4423_s30 }
 0x589   : > { %3806 = vrot.lane.b32.xlu2 %v6976_v7, %s4424_s6  ;;  %v3533_v7 = vld [vmem:[#allocation2 + $0x129] sm:$0xff] }
 0x58a   : > { %3390 = vrot.lane.b32.xlu0 %v3323_v19, %s4422_s29  ;;  %v3207_v11 = vpop.permute.xlu1 %3206  ;;  %v3520_v19 = vld [vmem:[#allocation2 + $0x91] sm:$0xff] }
 0x58b   : > { %v3221_v62 = vpop.permute.xlu2 %3220  ;;  %3295 = vst.msk [vmem:[#allocation3 + $0x38] sm:$0xff] %vm1364_vm7, %v3207_v11  ;;  %v3728_v11 = vld [vmem:[#allocation2 + $0x152] sm:$0xff] }
 0x58c   : > { %3302 = vst.msk [vmem:[#allocation3 + $0x70] sm:$0xff] %vm1364_vm7, %v3221_v62  ;;  %v3205_v45 = vpop.permute.xlu0 %3204  ;;  %v3328_v62 = vld [vmem:[#allocation2 + $0x90] sm:$0xff] }
 0x58d   : > { %3294 = vst.msk [vmem:[#allocation3 + $0x30] sm:$0xff] %vm1364_vm7, %v3205_v45 }
 0x590   : > { %3616 = vrot.lane.b32.xlu1 %v3532_v33, %s4423_s30 }
 0x591   : > { %3424 = vrot.lane.b32.xlu2 %v5795_v26, %s4422_s29 }
 0x592   : > { %3774 = vrot.lane.b32.xlu0 %v3707_v20, %s4424_s6  ;;  %v3213_v48 = vpop.permute.xlu1 %3212 }
 0x593   : > { %v3227_v61 = vpop.permute.xlu2 %3226  ;;  %3298 = vst.msk [vmem:[#allocation3 + $0x50] sm:$0xff] %vm1364_vm7, %v3213_v48 }
 0x594   : > { %3305 = vst.msk [vmem:[#allocation3 + $0x88] sm:$0xff] %vm1364_vm7, %v3227_v61  ;;  %v3211_v18 = vpop.permute.xlu0 %3210 }
 0x595   : > { %3297 = vst.msk [vmem:[#allocation3 + $0x48] sm:$0xff] %vm1364_vm7, %v3211_v18  ;;  %v3537_v18 = vld [vmem:[#allocation2 + $0x159] sm:$0xff] }
 0x598   : > { %3584 = vrot.lane.b32.xlu1 %v3516_v1, %s4423_s30  ;;  %v3345_v1 = vld [vmem:[#allocation2 + $0x158] sm:$0xff] }
 0x599   : > { %3808 = vrot.lane.b32.xlu2 %v3724_v25, %s4424_s6  ;;  %v3712_v25 = vld [vmem:[#allocation2 + $0x92] sm:$0xff] }
 0x59a   : > { %3392 = vrot.lane.b32.xlu0 %v3324_v47, %s4422_s29  ;;  %v3219_v26 = vpop.permute.xlu1 %3218 }
 0x59b   : > { %v3233_v60 = vpop.permute.xlu2 %3232  ;;  %3301 = vst.msk [vmem:[#allocation3 + $0x68] sm:$0xff] %vm1364_vm7, %v3219_v26 }
 0x59c   : > { %3308 = vst.msk [vmem:[#allocation3 + $0xa0] sm:$0xff] %vm1364_vm7, %v3233_v60  ;;  %v3217_v21 = vpop.permute.xlu0 %3216 }
 0x59d   : > { %3300 = vst.msk [vmem:[#allocation3 + $0x60] sm:$0xff] %vm1364_vm7, %v3217_v21  ;;  %v3521_v21 = vld [vmem:[#allocation2 + $0x99] sm:$0xff] }
 0x5a0   : > { %3618 = vrot.lane.b32.xlu1 %v3533_v7, %s4423_s30  ;;  %v3729_v7 = vld [vmem:[#allocation2 + $0x15a] sm:$0xff] }
 0x5a1   : > { %3426 = vrot.lane.b32.xlu2 %v3341_v51, %s4422_s29  ;;  %v3329_v51 = vld [vmem:[#allocation2 + $0x98] sm:$0xff] }
 0x5a2   : > { %3776 = vrot.lane.b32.xlu0 %v3708_v56, %s4424_s6  ;;  %v3225_v5 = vpop.permute.xlu1 %3224 }
 0x5a3   : > { %v3239_v36 = vpop.permute.xlu2 %3238  ;;  %3304 = vst.msk [vmem:[#allocation3 + $0x80] sm:$0xff] %vm1364_vm7, %v3225_v5 }
 0x5a4   : > { %3311 = vst.msk [vmem:[#allocation3 + $0xb8] sm:$0xff] %vm1364_vm7, %v3239_v36  ;;  %v3223_v0 = vpop.permute.xlu0 %3222 }
 0x5a5   : > { %3303 = vst.msk [vmem:[#allocation3 + $0x78] sm:$0xff] %vm1364_vm7, %v3223_v0 }
 0x5a8   : > { %3586 = vrot.lane.b32.xlu1 %v3517_v49, %s4423_s30 }
 0x5a9   : > { %3810 = vrot.lane.b32.xlu2 %v3725_v30, %s4424_s6  ;;  %v3538_v30 = vld [vmem:[#allocation2 + $0x169] sm:$0xff] }
 0x5aa   : > { %3394 = vrot.lane.b32.xlu0 %v3325_v42, %s4422_s29  ;;  %v3231_v53 = vpop.permute.xlu1 %3230 }
 0x5ab   : > { %v3245_v39 = vpop.permute.xlu2 %3244  ;;  %3307 = vst.msk [vmem:[#allocation3 + $0x98] sm:$0xff] %vm1364_vm7, %v3231_v53 }
 0x5ac   : > { %3314 = vst.msk [vmem:[#allocation3 + $0xd0] sm:$0xff] %vm1364_vm7, %v3245_v39  ;;  %v3229_v52 = vpop.permute.xlu0 %3228 }
 0x5ad   : > { %3306 = vst.msk [vmem:[#allocation3 + $0x90] sm:$0xff] %vm1364_vm7, %v3229_v52  ;;  %v3330_v52 = vld [vmem:[#allocation2 + $0xa8] sm:$0xff] }
 0x5b0   : > { %3620 = vrot.lane.b32.xlu1 %v3534_v50, %s4423_s30 }
 0x5b1   : > { %3428 = vrot.lane.b32.xlu2 %v5832_v22, %s4422_s29 }
 0x5b2   : > { %3778 = vrot.lane.b32.xlu0 %v3709_v9, %s4424_s6  ;;  %v3237_v59 = vpop.permute.xlu1 %3236 }
 0x5b3   : > { %v3801_v2 = vpop.permute.xlu2 %3800  ;;  %3310 = vst.msk [vmem:[#allocation3 + $0xb0] sm:$0xff] %vm1364_vm7, %v3237_v59 }
 0x5b4   : > { %v3235_v37 = vpop.permute.xlu0 %3234 }
 0x5b5   : > { %3309 = vst.msk [vmem:[#allocation3 + $0xa8] sm:$0xff] %vm1364_vm7, %v3235_v37  ;;  %v3522_v37 = vld [vmem:[#allocation2 + $0xa9] sm:$0xff] }
 0x5b8   : > { %3588 = vrot.lane.b32.xlu1 %v3518_v58, %s4423_s30  ;;  %v3347_v58 = vld [vmem:[#allocation2 + $0x170] sm:$0xff] }
 0x5b9   : > { %3812 = vrot.lane.b32.xlu2 %v3726_v23, %s4424_s6 }
 0x5ba   : > { %3396 = vrot.lane.b32.xlu0 %v3326_v6, %s4422_s29  ;;  %v3243_v22 = vpop.permute.xlu1 %3242 }
 0x5bb   : > { %v3419_v54 = vpop.permute.xlu2 %3418  ;;  %3313 = vst.msk [vmem:[#allocation3 + $0xc8] sm:$0xff] %vm1364_vm7, %v3243_v22 }
 0x5bc   : > { %3497 = vst.msk [vmem:[#allocation3 + $0x88] sm:$0xff] %vm1558_vm8, %v3419_v54  ;;  %v3241_v46 = vpop.permute.xlu0 %3240  ;;  %v3331_v54 = vld [vmem:[#allocation2 + $0xb0] sm:$0xff] }
 0x5bd   : > { %3312 = vst.msk [vmem:[#allocation3 + $0xc0] sm:$0xff] %vm1364_vm7, %v3241_v46  ;;  %v3539_v46 = vld [vmem:[#allocation2 + $0x171] sm:$0xff] }
 0x5c0   : > { %3622 = vrot.lane.b32.xlu1 %v3535_v31, %s4423_s30  ;;  %v3731_v31 = vld [vmem:[#allocation2 + $0x172] sm:$0xff] }
 0x5c1   : > { %3430 = vrot.lane.b32.xlu2 %v3343_v16, %s4422_s29 }
 0x5c2   : > { %3780 = vrot.lane.b32.xlu0 %v3710_v35, %s4424_s6  ;;  %v3609_v63 = vpop.permute.xlu1 %3608 }
 0x5c3   : > { %v3803_v4 = vpop.permute.xlu2 %3802 }
 0x5c4   : > { %v3417_v12 = vpop.permute.xlu0 %3416 }
 0x5c5   : > { %3496 = vst.msk [vmem:[#allocation3 + $0x80] sm:$0xff] %vm1558_vm8, %v3417_v12 }
 0x5c6   : > { %3688 = vst.msk [vmem:[#allocation3 + $0x80] sm:$0xff] %vm1751_vm9, %v3609_v63 }
 0x5c7   : > { %3880 = vst.msk [vmem:[#allocation3 + $0x80] sm:$0xff] %vm1944_vm11, %v3801_v2  ;;  %v3714_v2 = vld [vmem:[#allocation2 + $0xaa] sm:$0xff] }
 0x5c8   : > { %3590 = vrot.lane.b32.xlu1 %v3519_v43, %s4423_s30  ;;  %v3348_v43 = vld [vmem:[#allocation2 + $0x180] sm:$0xff] }
 0x5c9   : > { %3814 = vrot.lane.b32.xlu2 %v3727_v28, %s4424_s6  ;;  %v3523_v28 = vld [vmem:[#allocation2 + $0xb1] sm:$0xff] }
 0x5ca   : > { %3398 = vrot.lane.b32.xlu0 %v3327_v27, %s4422_s29  ;;  %v3577_v44 = vpop.permute.xlu1 %3576 }
 0x5cb   : > { %v3421_v41 = vpop.permute.xlu2 %3420 }
 0x5cc   : > { %3498 = vst.msk [vmem:[#allocation3 + $0x90] sm:$0xff] %vm1558_vm8, %v3421_v41  ;;  %v3385_v14 = vpop.permute.xlu0 %3384 }
 0x5cd   : > { %3480 = vst.msk [vmem:[#allocation3] sm:$0xff] %vm1558_vm8, %v3385_v14  ;;  %v3732_v14 = vld [vmem:[#allocation2 + $0x182] sm:$0xff] }
 0x5ce   : > { %3672 = vst.msk [vmem:[#allocation3] sm:$0xff] %vm1751_vm9, %v3577_v44  ;;  %v3912_v17 = vld [vmem:[#allocation3 + $0x80] sm:$0xff] }
 0x5cf   : > { %4359 = vmatmul.msk.f32.vlgmr.msra.gmra.mxu3 %vm2018_vm12, %v3912_v17  ;;  %v3715_v17 = vld [vmem:[#allocation2 + $0xb2] sm:$0xff] }
 0x5d0   : > { %3624 = vrot.lane.b32.xlu1 %v3536_v10, %s4423_s30 }
 0x5d1   : > { %3432 = vrot.lane.b32.xlu2 %v3344_v8, %s4422_s29 }
 0x5d2   : > { %3782 = vrot.lane.b32.xlu0 %v3711_v15, %s4424_s6  ;;  %v3611_v24 = vpop.permute.xlu1 %3610 }
 0x5d3   : > { %v3805_v55 = vpop.permute.xlu2 %3804  ;;  %3689 = vst.msk [vmem:[#allocation3 + $0x88] sm:$0xff] %vm1751_vm9, %v3611_v24 }
 0x5d4   : > { %3881 = vst.msk [vmem:[#allocation3 + $0x88] sm:$0xff] %vm1944_vm11, %v3803_v4  ;;  %v3769_v38 = vpop.permute.xlu0 %3768 }
 0x5d5   : > { %3864 = vst.msk [vmem:[#allocation3] sm:$0xff] %vm1944_vm11, %v3769_v38  ;;  %v3524_v38 = vld [vmem:[#allocation2 + $0xc1] sm:$0xff] }
 0x5d8   : > { %3592 = vrot.lane.b32.xlu1 %v3520_v19, %s4423_s30  ;;  %v3332_v19 = vld [vmem:[#allocation2 + $0xc0] sm:$0xff] }
 0x5d9   : > { %3816 = vrot.lane.b32.xlu2 %v3728_v11, %s4424_s6 }
 0x5da   : > { %3400 = vrot.lane.b32.xlu0 %v3328_v62, %s4422_s29  ;;  %v3579_v45 = vpop.permute.xlu1 %3578 }
 0x5db   : > { %v3423_v33 = vpop.permute.xlu2 %3422  ;;  %v3913_v20 = vld [vmem:[#allocation3 + $0x88] sm:$0xff] }
 0x5dc   : > { %3499 = vst.msk [vmem:[#allocation3 + $0x98] sm:$0xff] %vm1558_vm8, %v3423_v33  ;;  %v3387_v48 = vpop.permute.xlu0 %3386  ;;  %4360 = vmatmul.msk.f32.gmra.mxu3 %vm2018_vm12, %v3913_v20  ;;  %v3896_v61 = vld [vmem:[#allocation3] sm:$0xff]  ;;  %v3716_v33 = vld [vmem:[#allocation2 + $0xc2] sm:$0xff] }
 0x5dd   : > { %3481 = vst.msk [vmem:[#allocation3 + $0x8] sm:$0xff] %vm1558_vm8, %v3387_v48  ;;  %4343 = vmatmul.msk.f32.vlgmr.msra.gmra.mxu1 %vm2018_vm12, %v3896_v61 }
 0x5de   : > { %3673 = vst.msk [vmem:[#allocation3 + $0x8] sm:$0xff] %vm1751_vm9, %v3579_v45  ;;  %v3349_v45 = vld [vmem:[#allocation2 + $0x188] sm:$0xff] }
 0x5e0   : > { %3626 = vrot.lane.b32.xlu1 %v3537_v18, %s4423_s30 }
 0x5e1   : > { %3434 = vrot.lane.b32.xlu2 %v3345_v1, %s4422_s29 }
 0x5e2   : > { %3784 = vrot.lane.b32.xlu0 %v3712_v25, %s4424_s6  ;;  %v3613_v47 = vpop.permute.xlu1 %3612  ;;  %v3333_v25 = vld [vmem:[#allocation2 + $0xc8] sm:$0xff] }
 0x5e3   : > { %v3807_v26 = vpop.permute.xlu2 %3806  ;;  %3690 = vst.msk [vmem:[#allocation3 + $0x90] sm:$0xff] %vm1751_vm9, %v3613_v47 }
 0x5e4   : > { %3882 = vst.msk [vmem:[#allocation3 + $0x90] sm:$0xff] %vm1944_vm11, %v3805_v55  ;;  %v3771_v60 = vpop.permute.xlu0 %3770 }
 0x5e5   : > { %3865 = vst.msk [vmem:[#allocation3 + $0x8] sm:$0xff] %vm1944_vm11, %v3771_v60 }
 0x5e8   : > { %3594 = vrot.lane.b32.xlu1 %v3521_v21, %s4423_s30  ;;  %v3717_v21 = vld [vmem:[#allocation2 + $0xca] sm:$0xff] }
 0x5e9   : > { %3818 = vrot.lane.b32.xlu2 %v3729_v7, %s4424_s6 }
 0x5ea   : > { %3402 = vrot.lane.b32.xlu0 %v3329_v51, %s4422_s29  ;;  %v3581_v56 = vpop.permute.xlu1 %3580  ;;  %v3350_v51 = vld [vmem:[#allocation2 + $0x198] sm:$0xff] }
 0x5eb   : > { %v3425_v5 = vpop.permute.xlu2 %3424  ;;  %v3914_v36 = vld [vmem:[#allocation3 + $0x90] sm:$0xff] }
 0x5ec   : > { %3500 = vst.msk [vmem:[#allocation3 + $0xa0] sm:$0xff] %vm1558_vm8, %v3425_v5  ;;  %v3389_v0 = vpop.permute.xlu0 %3388  ;;  %4361 = vmatmul.msk.f32.gmra.mxu3 %vm2018_vm12, %v3914_v36  ;;  %v3897_v49 = vld [vmem:[#allocation3 + $0x8] sm:$0xff] }
 0x5ed   : > { %3482 = vst.msk [vmem:[#allocation3 + $0x10] sm:$0xff] %vm1558_vm8, %v3389_v0  ;;  %4344 = vmatmul.msk.f32.gmra.mxu1 %vm2018_vm12, %v3897_v49 }
 0x5ee   : > { %3674 = vst.msk [vmem:[#allocation3 + $0x10] sm:$0xff] %vm1751_vm9, %v3581_v56 }
 0x5f0   : > { %3628 = vrot.lane.b32.xlu1 %v3538_v30, %s4423_s30  ;;  %v3542_v30 = vld [vmem:[#allocation2 + $0x199] sm:$0xff] }
 0x5f1   : > { %3436 = vrot.lane.b32.xlu2 %v3346_v3, %s4422_s29  ;;  %v3334_v3 = vld [vmem:[#allocation2 + $0xd8] sm:$0xff] }
 0x5f2   : > { %3786 = vrot.lane.b32.xlu0 %v3713_v40, %s4424_s6  ;;  %v3615_v42 = vpop.permute.xlu1 %3614  ;;  %v3734_v40 = vld [vmem:[#allocation2 + $0x19a] sm:$0xff] }
 0x5f3   : > { %v3809_v53 = vpop.permute.xlu2 %3808  ;;  %3691 = vst.msk [vmem:[#allocation3 + $0x98] sm:$0xff] %vm1751_vm9, %v3615_v42 }
 0x5f4   : > { %3883 = vst.msk [vmem:[#allocation3 + $0x98] sm:$0xff] %vm1944_vm11, %v3807_v26  ;;  %v3773_v39 = vpop.permute.xlu0 %3772 }
 0x5f5   : > { %3866 = vst.msk [vmem:[#allocation3 + $0x10] sm:$0xff] %vm1944_vm11, %v3773_v39 }
 0x5f8   : > { %3246 = vrot.lane.b32.xlu1 %v3729_v7, %s4421_s28  ;;  %v3525_v7 = vld [vmem:[#allocation2 + $0xc9] sm:$0xff] }
 0x5f9   : > { %3820 = vrot.lane.b32.xlu2 %v3730_v13, %s4424_s6 }
 0x5fa   : > { %3404 = vrot.lane.b32.xlu0 %v3330_v52, %s4422_s29  ;;  %v3583_v32 = vpop.permute.xlu1 %3582  ;;  %v3526_v52 = vld [vmem:[#allocation2 + $0xd9] sm:$0xff] }
 0x5fb   : > { %v3427_v34 = vpop.permute.xlu2 %3426  ;;  %v3915_v50 = vld [vmem:[#allocation3 + $0x98] sm:$0xff] }
 0x5fc   : > { %3501 = vst.msk [vmem:[#allocation3 + $0xa8] sm:$0xff] %vm1558_vm8, %v3427_v34  ;;  %v3391_v9 = vpop.permute.xlu0 %3390  ;;  %4362 = vmatmul.msk.f32.gmra.mxu3 %vm2018_vm12, %v3915_v50  ;;  %v3898_v59 = vld [vmem:[#allocation3 + $0x10] sm:$0xff] }
 0x5fd   : > { %3483 = vst.msk [vmem:[#allocation3 + $0x18] sm:$0xff] %vm1558_vm8, %v3391_v9  ;;  %4345 = vmatmul.msk.f32.gmra.mxu1 %vm2018_vm12, %v3898_v59 }
 0x5fe   : > { %3675 = vst.msk [vmem:[#allocation3 + $0x18] sm:$0xff] %vm1751_vm9, %v3583_v32 }
 0x600   : > { %3788 = vrot.lane.b32.xlu1 %v3714_v2, %s4424_s6  ;;  %v3735_v2 = vld [vmem:[#allocation2 + $0x1a2] sm:$0xff] }
 0x601   : > { %3596 = vrot.lane.b32.xlu2 %v3522_v37, %s4423_s30  ;;  %v3718_v37 = vld [vmem:[#allocation2 + $0xda] sm:$0xff] }
 0x602   : > { %3438 = vrot.lane.b32.xlu0 %v3347_v58, %s4422_s29  ;;  %v3617_v23 = vpop.permute.xlu1 %3616  ;;  %v3543_v58 = vld [vmem:[#allocation2 + $0x1a1] sm:$0xff] }
 0x603   : > { %v3811_v6 = vpop.permute.xlu2 %3810  ;;  %3692 = vst.msk [vmem:[#allocation3 + $0xa0] sm:$0xff] %vm1751_vm9, %v3617_v23  ;;  %v6578_v23 = vld [vmem:[%s6789_s4] ss:$0 sm:$0xff] }
 0x604   : > { %3884 = vst.msk [vmem:[#allocation3 + $0xa0] sm:$0xff] %vm1944_vm11, %v3809_v53  ;;  %v3775_v22 = vpop.permute.xlu0 %3774 }
 0x605   : > { %3867 = vst.msk [vmem:[#allocation3 + $0x18] sm:$0xff] %vm1944_vm11, %v3775_v22 }
 0x608   : > { %3406 = vrot.lane.b32.xlu1 %v3331_v54, %s4422_s29  ;;  %v4165_v54 = vld [vmem:[%s4480_s23 + $0x80] sm:$0xff] }
 0x609   : > { %3630 = vrot.lane.b32.xlu2 %v3539_v46, %s4423_s30 }
 0x60a   : > { %3822 = vrot.lane.b32.xlu0 %v3731_v31, %s4424_s6  ;;  %v3585_v16 = vpop.permute.xlu1 %3584 }
 0x60b   : > { %v3429_v35 = vpop.permute.xlu2 %3428  ;;  %v3916_v63 = vld [vmem:[#allocation3 + $0xa0] sm:$0xff] }
 0x60c   : > { %3502 = vst.msk [vmem:[#allocation3 + $0xb0] sm:$0xff] %vm1558_vm8, %v3429_v35  ;;  %v3393_v4 = vpop.permute.xlu0 %3392  ;;  %4363 = vmatmul.msk.f32.gmra.mxu3 %vm2018_vm12, %v3916_v63  ;;  %v3899_v12 = vld [vmem:[#allocation3 + $0x18] sm:$0xff] }
 0x60d   : > { %3484 = vst.msk [vmem:[#allocation3 + $0x20] sm:$0xff] %vm1558_vm8, %v3393_v4  ;;  %4346 = vmatmul.msk.f32.gmra.mxu1 %vm2018_vm12, %v3899_v12  ;;  %v3719_v63 = vld [vmem:[#allocation2 + $0xe2] sm:$0xff] }
 0x60e   : > { %3676 = vst.msk [vmem:[#allocation3 + $0x20] sm:$0xff] %vm1751_vm9, %v3585_v16  ;;  %v3335_v4 = vld [vmem:[#allocation2 + $0xe0] sm:$0xff] }
 0x60f   : > { %v3527_v12 = vld [vmem:[#allocation2 + $0xe1] sm:$0xff] }
 0x610   : > { %3440 = vrot.lane.b32.xlu1 %v3348_v43, %s4422_s29 }
 0x611   : > { %3248 = vrot.lane.b32.xlu2 %v3730_v13, %s4421_s28  ;;  %v3351_v13 = vld [vmem:[#allocation2 + $0x1a0] sm:$0xff] }
 0x612   : > { %3598 = vrot.lane.b32.xlu0 %v3523_v28, %s4423_s30  ;;  %v3619_v27 = vpop.permute.xlu1 %3618 }
 0x613   : > { %v3813_v44 = vpop.permute.xlu2 %3812  ;;  %3693 = vst.msk [vmem:[#allocation3 + $0xa8] sm:$0xff] %vm1751_vm9, %v3619_v27  ;;  %v4149_v27 = vld [vmem:[%s4480_s23] sm:$0xff] }
 0x614   : > { %3885 = vst.msk [vmem:[#allocation3 + $0xa8] sm:$0xff] %vm1944_vm11, %v3811_v6  ;;  %v3777_v41 = vpop.permute.xlu0 %3776 }
 0x615   : > { %3868 = vst.msk [vmem:[#allocation3 + $0x20] sm:$0xff] %vm1944_vm11, %v3777_v41 }
 0x618   : > { %3824 = vrot.lane.b32.xlu1 %v3732_v14, %s4424_s6 }
 0x619   : > { %3790 = vrot.lane.b32.xlu2 %v3715_v17, %s4424_s6 }
 0x61a   : > { %3632 = vrot.lane.b32.xlu0 %v6243_v29, %s4423_s30  ;;  %v3587_v10 = vpop.permute.xlu1 %3586 }
 0x61b   : > { %v3431_v8 = vpop.permute.xlu2 %3430  ;;  %v3917_v15 = vld [vmem:[#allocation3 + $0xa8] sm:$0xff] }
 0x61c   : > { %3503 = vst.msk [vmem:[#allocation3 + $0xb8] sm:$0xff] %vm1558_vm8, %v3431_v8  ;;  %v3395_v24 = vpop.permute.xlu0 %3394  ;;  %4364 = vmatmul.msk.f32.gmra.mxu3 %vm2018_vm12, %v3917_v15  ;;  %v3900_v55 = vld [vmem:[#allocation3 + $0x20] sm:$0xff] }
 0x61d   : > { %3485 = vst.msk [vmem:[#allocation3 + $0x28] sm:$0xff] %vm1558_vm8, %v3395_v24  ;;  %4347 = vmatmul.msk.f32.gmra.mxu1 %vm2018_vm12, %v3900_v55  ;;  %v4166_v24 = vld [vmem:[%s4480_s23 + $0x88] sm:$0xff] }
 0x61e   : > { %3677 = vst.msk [vmem:[#allocation3 + $0x28] sm:$0xff] %vm1751_vm9, %v3587_v10 }
 0x620   : > { %3600 = vrot.lane.b32.xlu1 %v3524_v38, %s4423_s30 }
 0x621   : > { %3408 = vrot.lane.b32.xlu2 %v3332_v19, %s4422_s29 }
 0x622   : > { %3250 = vrot.lane.b32.xlu0 %v3731_v31, %s4421_s28  ;;  %v3621_v29 = vpop.permute.xlu1 %3620 }
 0x623   : > { %v3815_v11 = vpop.permute.xlu2 %3814  ;;  %3694 = vst.msk [vmem:[#allocation3 + $0xb0] sm:$0xff] %vm1751_vm9, %v3621_v29 }
 0x624   : > { %3886 = vst.msk [vmem:[#allocation3 + $0xb0] sm:$0xff] %vm1944_vm11, %v3813_v44  ;;  %v3779_v62 = vpop.permute.xlu0 %3778 }
 0x625   : > { %3869 = vst.msk [vmem:[#allocation3 + $0x28] sm:$0xff] %vm1944_vm11, %v3779_v62 }
 0x628   : > { %3634 = vrot.lane.b32.xlu1 %v6254_v57, %s4423_s30  ;;  %v3733_v57 = vld [vmem:[#allocation2 + $0x18a] sm:$0xff] }
 0x629   : > { %3442 = vrot.lane.b32.xlu2 %v3349_v45, %s4422_s29 }
 0x62a   : > { %3792 = vrot.lane.b32.xlu0 %v3716_v33, %s4424_s6  ;;  %v3589_v20 = vpop.permute.xlu1 %3588  ;;  %v4150_v33 = vld [vmem:[%s4480_s23 + $0x8] sm:$0xff] }
 0x62b   : > { %v3433_v48 = vpop.permute.xlu2 %3432  ;;  %v3918_v61 = vld [vmem:[#allocation3 + $0xb0] sm:$0xff] }
 0x62c   : > { %3504 = vst.msk [vmem:[#allocation3 + $0xc0] sm:$0xff] %vm1558_vm8, %v3433_v48  ;;  %v3397_v18 = vpop.permute.xlu0 %3396  ;;  %4365 = vmatmul.msk.f32.gmra.mxu3 %vm2018_vm12, %v3918_v61  ;;  %v3901_v1 = vld [vmem:[#allocation3 + $0x28] sm:$0xff] }
 0x62d   : > { %3486 = vst.msk [vmem:[#allocation3 + $0x30] sm:$0xff] %vm1558_vm8, %v3397_v18  ;;  %4348 = vmatmul.msk.f32.gmra.mxu1 %vm2018_vm12, %v3901_v1 }
 0x62e   : > { %3678 = vst.msk [vmem:[#allocation3 + $0x30] sm:$0xff] %vm1751_vm9, %v3589_v20 }
 0x630   : > { %3252 = vrot.lane.b32.xlu1 %v3732_v14, %s4421_s28 }
 0x631   : > { %3826 = vrot.lane.b32.xlu2 %v3733_v57, %s4424_s6 }
 0x632   : > { %3410 = vrot.lane.b32.xlu0 %v3333_v25, %s4422_s29  ;;  %v3623_v47 = vpop.permute.xlu1 %3622 }
 0x633   : > { %v3817_v26 = vpop.permute.xlu2 %3816  ;;  %3695 = vst.msk [vmem:[#allocation3 + $0xb8] sm:$0xff] %vm1751_vm9, %v3623_v47  ;;  %v4167_v47 = vld [vmem:[%s4480_s23 + $0x90] sm:$0xff] }
 0x634   : > { %3887 = vst.msk [vmem:[#allocation3 + $0xb8] sm:$0xff] %vm1944_vm11, %v3815_v11  ;;  %v3781_v60 = vpop.permute.xlu0 %3780 }
 0x635   : > { %3870 = vst.msk [vmem:[#allocation3 + $0x30] sm:$0xff] %vm1944_vm11, %v3781_v60 }
 0x638   : > { %3794 = vrot.lane.b32.xlu1 %v3717_v21, %s4424_s6 }
 0x639   : > { %3602 = vrot.lane.b32.xlu2 %v3525_v7, %s4423_s30 }
 0x63a   : > { %3444 = vrot.lane.b32.xlu0 %v3350_v51, %s4422_s29  ;;  %v3591_v56 = vpop.permute.xlu1 %3590 }
 0x63b   : > { %v3435_v5 = vpop.permute.xlu2 %3434  ;;  %v3919_v36 = vld [vmem:[#allocation3 + $0xb8] sm:$0xff] }
 0x63c   : > { %3505 = vst.msk [vmem:[#allocation3 + $0xc8] sm:$0xff] %vm1558_vm8, %v3435_v5  ;;  %v3399_v0 = vpop.permute.xlu0 %3398  ;;  %4366 = vmatmul.msk.f32.gmra.mxu3 %vm2018_vm12, %v3919_v36  ;;  %v3902_v49 = vld [vmem:[#allocation3 + $0x30] sm:$0xff]  ;;  %v4151_v36 = vld [vmem:[%s4480_s23 + $0x10] sm:$0xff] }
 0x63d   : > { %3487 = vst.msk [vmem:[#allocation3 + $0x38] sm:$0xff] %vm1558_vm8, %v3399_v0  ;;  %4349 = vmatmul.msk.f32.gmra.mxu1 %vm2018_vm12, %v3902_v49 }
 0x63e   : > { %3679 = vst.msk [vmem:[#allocation3 + $0x38] sm:$0xff] %vm1751_vm9, %v3591_v56 }
 0x640   : > { %3412 = vrot.lane.b32.xlu1 %v3334_v3, %s4422_s29 }
 0x641   : > { %3636 = vrot.lane.b32.xlu2 %v3542_v30, %s4423_s30 }
 0x642   : > { %3828 = vrot.lane.b32.xlu0 %v3734_v40, %s4424_s6  ;;  %v3625_v42 = vpop.permute.xlu1 %3624 }
 0x643   : > { %v3819_v53 = vpop.permute.xlu2 %3818  ;;  %3696 = vst.msk [vmem:[#allocation3 + $0xc0] sm:$0xff] %vm1751_vm9, %v3625_v42 }
 0x644   : > { %3888 = vst.msk [vmem:[#allocation3 + $0xc0] sm:$0xff] %vm1944_vm11, %v3817_v26  ;;  %v3783_v39 = vpop.permute.xlu0 %3782 }
 0x645   : > { %3871 = vst.msk [vmem:[#allocation3 + $0x38] sm:$0xff] %vm1944_vm11, %v3783_v39 }
 0x648   : > { %3446 = vrot.lane.b32.xlu1 %v3351_v13, %s4422_s29 }
 0x649   : > { %3254 = vrot.lane.b32.xlu2 %v3733_v57, %s4421_s28 }
 0x64a   : > { %3604 = vrot.lane.b32.xlu0 %v3526_v52, %s4423_s30  ;;  %v3593_v32 = vpop.permute.xlu1 %3592 }
 0x64b   : > { %v3437_v34 = vpop.permute.xlu2 %3436  ;;  %v3920_v50 = vld [vmem:[#allocation3 + $0xc0] sm:$0xff] }
 0x64c   : > { %3506 = vst.msk [vmem:[#allocation3 + $0xd0] sm:$0xff] %vm1558_vm8, %v3437_v34  ;;  %v3401_v9 = vpop.permute.xlu0 %3400  ;;  %4367 = vmatmul.msk.f32.gmra.mxu3 %vm2018_vm12, %v3920_v50  ;;  %v3903_v59 = vld [vmem:[#allocation3 + $0x38] sm:$0xff] }
 0x64d   : > { %3488 = vst.msk [vmem:[#allocation3 + $0x40] sm:$0xff] %vm1558_vm8, %v3401_v9  ;;  %4350 = vmatmul.msk.f32.gmra.mxu1 %vm2018_vm12, %v3903_v59 }
 0x64e   : > { %3680 = vst.msk [vmem:[#allocation3 + $0x40] sm:$0xff] %vm1751_vm9, %v3593_v32 }
 0x650   : > { %3830 = vrot.lane.b32.xlu1 %v3735_v2, %s4424_s6  ;;  %v4152_v2 = vld [vmem:[%s4480_s23 + $0x18] sm:$0xff] }
 0x651   : > { %3796 = vrot.lane.b32.xlu2 %v3718_v37, %s4424_s6 }
 0x652   : > { %3638 = vrot.lane.b32.xlu0 %v3543_v58, %s4423_s30  ;;  %v3627_v6 = vpop.permute.xlu1 %3626  ;;  %v4101_v22 = vpop.f32.mrf.mxu3 }
 0x653   : > { %3697 = vst.msk [vmem:[#allocation3 + $0xc8] sm:$0xff] %vm1751_vm9, %v3627_v6  ;;  %v4102_v46 = vadd.f32 %v6578_v23, %v4101_v22  ;;  %v3821_v31 = vpop.permute.xlu2 %3820 }
 0x654   : > { %3889 = vst.msk [vmem:[#allocation3 + $0xc8] sm:$0xff] %vm1944_vm11, %v3819_v53  ;;  %v3785_v16 = vpop.permute.xlu0 %3784  ;;  %v4168_v53 = vld [vmem:[%s4480_s23 + $0x98] sm:$0xff] }
 0x655   : > { %v4197_v35 = vadd.f32 %v4165_v54, %v4102_v46  ;;  %3872 = vst.msk [vmem:[#allocation3 + $0x40] sm:$0xff] %vm1944_vm11, %v3785_v16 }
 0x657   : > { %4229 = vst.msk [vmem:[%s6592_s15 + $0x80] sm:$0xff] %vm225_vm0, %v4197_v35 }
 0x658   : > { %3798 = vrot.lane.b32.xlu1 %v3719_v63, %s4424_s6 }
 0x659   : > { %3414 = vrot.lane.b32.xlu2 %v3335_v4, %s4422_s29 }
 0x65a   : > { %3606 = vrot.lane.b32.xlu0 %v3527_v12, %s4423_s30  ;;  %v3595_v43 = vpop.permute.xlu1 %3594  ;;  %v4053_v28 = vpop.f32.mrf.mxu1 }
 0x65b   : > { %v4054_v44 = vadd.f32 %v6578_v23, %v4053_v28  ;;  %v3597_v41 = vpop.permute.xlu2 %3596  ;;  %v3921_v14 = vld [vmem:[#allocation3 + $0xc8] sm:$0xff] }
 0x65c   : > { %v3403_v17 = vpop.permute.xlu0 %3402  ;;  %4368 = vmatmul.msk.f32.gmra.mxu3 %vm2018_vm12, %v3921_v14  ;;  %v3904_v10 = vld [vmem:[#allocation3 + $0x40] sm:$0xff] }
 0x65d   : > { %v4181_v8 = vadd.f32 %v4149_v27, %v4054_v44  ;;  %3489 = vst.msk [vmem:[#allocation3 + $0x48] sm:$0xff] %vm1558_vm8, %v3403_v17  ;;  %4351 = vmatmul.msk.f32.gmra.mxu1 %vm2018_vm12, %v3904_v10  ;;  %v4153_v44 = vld [vmem:[%s4480_s23 + $0x20] sm:$0xff] }
 0x65e   : > { %3681 = vst.msk [vmem:[#allocation3 + $0x48] sm:$0xff] %vm1751_vm9, %v3595_v43 }
 0x65f   : > { %4213 = vst.msk [vmem:[%s6592_s15] sm:$0xff] %vm225_vm0, %v4181_v8  ;;  %v4104_v15 = vpop.f32.mrf.mxu3 }
 0x660   : > { %v4105_v55 = vadd.f32 %v6578_v23, %v4104_v15  ;;  %v4170_v15 = vld [vmem:[%s4480_s23 + $0xa8] sm:$0xff] }
 0x662   : > { %v4198_v38 = vadd.f32 %v4166_v24, %v4105_v55  ;;  %v3629_v19 = vpop.permute.xlu1 %3628 }
 0x663   : > { %3698 = vst.msk [vmem:[#allocation3 + $0xd0] sm:$0xff] %vm1751_vm9, %v3629_v19  ;;  %v3631_v29 = vpop.permute.xlu2 %3630 }
 0x664   : > { %4230 = vst.msk [vmem:[%s6592_s15 + $0x88] sm:$0xff] %vm225_vm0, %v4198_v38  ;;  %v3787_v11 = vpop.permute.xlu0 %3786 }
 0x665   : > { %3890 = vst.msk [vmem:[#allocation3 + $0xd0] sm:$0xff] %vm1944_vm11, %v3821_v31  ;;  %v4169_v31 = vld [vmem:[%s4480_s23 + $0xa0] sm:$0xff] }
 0x666   : > { %3873 = vst.msk [vmem:[#allocation3 + $0x48] sm:$0xff] %vm1944_vm11, %v3787_v11 }
 0x66a   : > { %v3247_v62 = vpop.permute.xlu1 %3246  ;;  %v4056_v45 = vpop.f32.mrf.mxu1 }
 0x66b   : > { %3315 = vst.msk [vmem:[#allocation3 + $0xd8] sm:$0xff] %vm1364_vm7, %v3247_v62  ;;  %v4057_v20 = vadd.f32 %v6578_v23, %v4056_v45  ;;  %v3249_v48 = vpop.permute.xlu2 %3248 }
 0x66c   : > { %3316 = vst.msk [vmem:[#allocation3 + $0xe0] sm:$0xff] %vm1364_vm7, %v3249_v48  ;;  %v3405_v61 = vpop.permute.xlu0 %3404  ;;  %v3922_v18 = vld [vmem:[#allocation3 + $0xd0] sm:$0xff] }
 0x66d   : > { %v4182_v1 = vadd.f32 %v4150_v33, %v4057_v20  ;;  %3490 = vst.msk [vmem:[#allocation3 + $0x50] sm:$0xff] %vm1558_vm8, %v3405_v61  ;;  %4369 = vmatmul.msk.f32.gmra.mxu3 %vm2018_vm12, %v3922_v18  ;;  %v3905_v57 = vld [vmem:[#allocation3 + $0x48] sm:$0xff]  ;;  %v4154_v20 = vld [vmem:[%s4480_s23 + $0x28] sm:$0xff] }
 0x66e   : > { %3682 = vst.msk [vmem:[#allocation3 + $0x50] sm:$0xff] %vm1751_vm9, %v3597_v41  ;;  %4352 = vmatmul.msk.f32.gmra.mxu1 %vm2018_vm12, %v3905_v57 }
 0x66f   : > { %4214 = vst.msk [vmem:[%s6592_s15 + $0x8] sm:$0xff] %vm225_vm0, %v4182_v1  ;;  %v4107_v25 = vpop.f32.mrf.mxu3 }
 0x670   : > { %v4108_v26 = vadd.f32 %v6578_v23, %v4107_v25  ;;  %v4171_v25 = vld [vmem:[%s4480_s23 + $0xb0] sm:$0xff] }
 0x672   : > { %v4199_v60 = vadd.f32 %v4167_v47, %v4108_v26  ;;  %v3789_v21 = vpop.permute.xlu1 %3788 }
 0x673   : > { %3874 = vst.msk [vmem:[#allocation3 + $0x50] sm:$0xff] %vm1944_vm11, %v3789_v21  ;;  %v3791_v7 = vpop.permute.xlu2 %3790 }
 0x674   : > { %4231 = vst.msk [vmem:[%s6592_s15 + $0x90] sm:$0xff] %vm225_vm0, %v4199_v60  ;;  %v3439_v51 = vpop.permute.xlu0 %3438 }
 0x675   : > { %3507 = vst.msk [vmem:[#allocation3 + $0xd8] sm:$0xff] %vm1558_vm8, %v3439_v51 }
 0x676   : > { %3699 = vst.msk [vmem:[#allocation3 + $0xd8] sm:$0xff] %vm1751_vm9, %v3631_v29 }
 0x67a   : > { %v3407_v56 = vpop.permute.xlu1 %3406  ;;  %v4059_v5 = vpop.f32.mrf.mxu1  ;;  %v3906_v0 = vld [vmem:[#allocation3 + $0x50] sm:$0xff] }
 0x67b   : > { %3491 = vst.msk [vmem:[#allocation3 + $0x58] sm:$0xff] %vm1558_vm8, %v3407_v56  ;;  %v4060_v49 = vadd.f32 %v6578_v23, %v4059_v5  ;;  %v3409_v30 = vpop.permute.xlu2 %3408  ;;  %4353 = vmatmul.msk.f32.gmra.mxu1 %vm2018_vm12, %v3906_v0 }
 0x67c   : > { %3492 = vst.msk [vmem:[#allocation3 + $0x60] sm:$0xff] %vm1558_vm8, %v3409_v30  ;;  %v3823_v3 = vpop.permute.xlu0 %3822 }
 0x67d   : > { %v4183_v40 = vadd.f32 %v4151_v36, %v4060_v49  ;;  %3891 = vst.msk [vmem:[#allocation3 + $0xd8] sm:$0xff] %vm1944_vm11, %v3823_v3  ;;  %v4155_v36 = vld [vmem:[%s4480_s23 + $0x30] sm:$0xff] }
 0x67f   : > { %4215 = vst.msk [vmem:[%s6592_s15 + $0x10] sm:$0xff] %vm225_vm0, %v4183_v40  ;;  %v4110_v42 = vpop.f32.mrf.mxu3 }
 0x680   : > { %v4111_v39 = vadd.f32 %v6578_v23, %v4110_v42  ;;  %v4172_v42 = vld [vmem:[%s4480_s23 + $0xb8] sm:$0xff] }
 0x682   : > { %v4200_v13 = vadd.f32 %v4168_v53, %v4111_v39  ;;  %v3441_v52 = vpop.permute.xlu1 %3440 }
 0x683   : > { %3508 = vst.msk [vmem:[#allocation3 + $0xe0] sm:$0xff] %vm1558_vm8, %v3441_v52  ;;  %v3443_v32 = vpop.permute.xlu2 %3442 }
 0x684   : > { %4232 = vst.msk [vmem:[%s6592_s15 + $0x98] sm:$0xff] %vm225_vm0, %v4200_v13  ;;  %v3599_v34 = vpop.permute.xlu0 %3598  ;;  %v3923_v50 = vld [vmem:[#allocation3 + $0xd8] sm:$0xff] }
 0x685   : > { %3683 = vst.msk [vmem:[#allocation3 + $0x58] sm:$0xff] %vm1751_vm9, %v3599_v34  ;;  %4370 = vmatmul.msk.f32.gmra.mxu3 %vm2018_vm12, %v3923_v50  ;;  %v4156_v50 = vld [vmem:[%s4480_s23 + $0x38] sm:$0xff] }
 0x686   : > { %3875 = vst.msk [vmem:[#allocation3 + $0x58] sm:$0xff] %vm1944_vm11, %v3791_v7 }
 0x68a   : > { %v3825_v9 = vpop.permute.xlu1 %3824  ;;  %v4062_v59 = vpop.f32.mrf.mxu1 }
 0x68b   : > { %v4063_v37 = vadd.f32 %v6578_v23, %v4062_v59  ;;  %v3827_v58 = vpop.permute.xlu2 %3826 }
 0x68c   : > { %v3633_v6 = vpop.permute.xlu0 %3632 }
 0x68d   : > { %v4184_v22 = vadd.f32 %v4152_v2, %v4063_v37  ;;  %3700 = vst.msk [vmem:[#allocation3 + $0xe0] sm:$0xff] %vm1751_vm9, %v3633_v6  ;;  %v3907_v54 = vld [vmem:[#allocation3 + $0x58] sm:$0xff] }
 0x68e   : > { %3892 = vst.msk [vmem:[#allocation3 + $0xe0] sm:$0xff] %vm1944_vm11, %v3825_v9  ;;  %4354 = vmatmul.msk.f32.gmra.mxu1 %vm2018_vm12, %v3907_v54 }
 0x68f   : > { %4216 = vst.msk [vmem:[%s6592_s15 + $0x18] sm:$0xff] %vm225_vm0, %v4184_v22  ;;  %v4113_v46 = vpop.f32.mrf.mxu3  ;;  %v4173_v22 = vld [vmem:[%s4480_s23 + $0xc0] sm:$0xff] }
 0x690   : > { %v4114_v16 = vadd.f32 %v6578_v23, %v4113_v46 }
 0x692   : > { %v4201_v35 = vadd.f32 %v4169_v31, %v4114_v16  ;;  %v3601_v63 = vpop.permute.xlu1 %3600 }
 0x693   : > { %3684 = vst.msk [vmem:[#allocation3 + $0x60] sm:$0xff] %vm1751_vm9, %v3601_v63  ;;  %v3603_v4 = vpop.permute.xlu2 %3602 }
 0x694   : > { %4233 = vst.msk [vmem:[%s6592_s15 + $0xa0] sm:$0xff] %vm225_vm0, %v4201_v35  ;;  %v3251_v12 = vpop.permute.xlu0 %3250  ;;  %v4157_v35 = vld [vmem:[%s4480_s23 + $0x40] sm:$0xff] }
 0x695   : > { %3317 = vst.msk [vmem:[#allocation3 + $0xe8] sm:$0xff] %vm1364_vm7, %v3251_v12  ;;  %v3924_v43 = vld [vmem:[#allocation3 + $0xe0] sm:$0xff] }
 0x696   : > { %3509 = vst.msk [vmem:[#allocation3 + $0xe8] sm:$0xff] %vm1558_vm8, %v3443_v32  ;;  %4371 = vmatmul.msk.f32.gmra.mxu3 %vm2018_vm12, %v3924_v43  ;;  %v4174_v43 = vld [vmem:[%s4480_s23 + $0xc8] sm:$0xff] }
 0x69a   : > { %v3635_v28 = vpop.permute.xlu1 %3634  ;;  %v4065_v27 = vpop.f32.mrf.mxu1 }
 0x69b   : > { %3701 = vst.msk [vmem:[#allocation3 + $0xe8] sm:$0xff] %vm1751_vm9, %v3635_v28  ;;  %v3637_v41 = vpop.permute.xlu2 %3636  ;;  %v4066_v14 = vadd.f32 %v6578_v23, %v4065_v27 }
 0x69c   : > { %3893 = vst.msk [vmem:[#allocation3 + $0xe8] sm:$0xff] %vm1944_vm11, %v3827_v58  ;;  %v3793_v17 = vpop.permute.xlu0 %3792 }
 0x69d   : > { %v4185_v10 = vadd.f32 %v4153_v44, %v4066_v14  ;;  %3876 = vst.msk [vmem:[#allocation3 + $0x60] sm:$0xff] %vm1944_vm11, %v3793_v17 }
 0x69f   : > { %4217 = vst.msk [vmem:[%s6592_s15 + $0x20] sm:$0xff] %vm225_vm0, %v4185_v10  ;;  %v4116_v8 = vpop.f32.mrf.mxu3 }
 0x6a0   : > { %v4117_v24 = vadd.f32 %v6578_v23, %v4116_v8  ;;  %v4175_v8 = vld [vmem:[%s4480_s23 + $0xd0] sm:$0xff] }
 0x6a2   : > { %v4202_v55 = vadd.f32 %v4170_v15, %v4117_v24  ;;  %v3253_v38 = vpop.permute.xlu1 %3252 }
 0x6a3   : > { %3318 = vst.msk [vmem:[#allocation3 + $0xf0] sm:$0xff] %vm1364_vm7, %v3253_v38  ;;  %v3255_v19 = vpop.permute.xlu2 %3254  ;;  %v3925_v29 = vld [vmem:[#allocation3 + $0xe8] sm:$0xff]  ;;  %v4159_v38 = vld [vmem:[%s4480_s23 + $0x50] sm:$0xff] }
 0x6a4   : > { %4234 = vst.msk [vmem:[%s6592_s15 + $0xa8] sm:$0xff] %vm225_vm0, %v4202_v55  ;;  %v3411_v11 = vpop.permute.xlu0 %3410  ;;  %4372 = vmatmul.msk.f32.gmra.mxu3 %vm2018_vm12, %v3925_v29  ;;  %v3908_v62 = vld [vmem:[#allocation3 + $0x60] sm:$0xff] }
 0x6a5   : > { %3319 = vst.msk [vmem:[#allocation3 + $0xf8] sm:$0xff] %vm1364_vm7, %v3255_v19  ;;  %4355 = vmatmul.msk.f32.gmra.mxu1 %vm2018_vm12, %v3908_v62  ;;  %v4176_v62 = vld [vmem:[%s4480_s23 + $0xd8] sm:$0xff] }
 0x6a6   : > { %3493 = vst.msk [vmem:[#allocation3 + $0x68] sm:$0xff] %vm1558_vm8, %v3411_v11 }
 0x6a7   : > { %3685 = vst.msk [vmem:[#allocation3 + $0x68] sm:$0xff] %vm1751_vm9, %v3603_v4 }
 0x6aa   : > { %v3795_v45 = vpop.permute.xlu1 %3794  ;;  %v4068_v33 = vpop.f32.mrf.mxu1 }
 0x6ab   : > { %3877 = vst.msk [vmem:[#allocation3 + $0x68] sm:$0xff] %vm1944_vm11, %v3795_v45  ;;  %v3797_v48 = vpop.permute.xlu2 %3796  ;;  %v4069_v61 = vadd.f32 %v6578_v23, %v4068_v33 }
 0x6ac   : > { %v3445_v18 = vpop.permute.xlu0 %3444 }
 0x6ad   : > { %v4186_v1 = vadd.f32 %v4154_v20, %v4069_v61  ;;  %3510 = vst.msk [vmem:[#allocation3 + $0xf0] sm:$0xff] %vm1558_vm8, %v3445_v18 }
 0x6ae   : > { %3702 = vst.msk [vmem:[#allocation3 + $0xf0] sm:$0xff] %vm1751_vm9, %v3637_v41  ;;  %v4158_v41 = vld [vmem:[%s4480_s23 + $0x48] sm:$0xff] }
 0x6af   : > { %4218 = vst.msk [vmem:[%s6592_s15 + $0x28] sm:$0xff] %vm225_vm0, %v4186_v1  ;;  %v4119_v57 = vpop.f32.mrf.mxu3 }
 0x6b0   : > { %v4120_v47 = vadd.f32 %v6578_v23, %v4119_v57  ;;  %v4177_v57 = vld [vmem:[%s4480_s23 + $0xe0] sm:$0xff] }
 0x6b2   : > { %v4203_v26 = vadd.f32 %v4171_v25, %v4120_v47  ;;  %v3413_v60 = vpop.permute.xlu1 %3412  ;;  %v3909_v21 = vld [vmem:[#allocation3 + $0x68] sm:$0xff] }
 0x6b3   : > { %3494 = vst.msk [vmem:[#allocation3 + $0x70] sm:$0xff] %vm1558_vm8, %v3413_v60  ;;  %v3415_v7 = vpop.permute.xlu2 %3414  ;;  %4356 = vmatmul.msk.f32.gmra.mxu1 %vm2018_vm12, %v3909_v21  ;;  %v4161_v60 = vld [vmem:[%s4480_s23 + $0x60] sm:$0xff] }
 0x6b4   : > { %4235 = vst.msk [vmem:[%s6592_s15 + $0xb0] sm:$0xff] %vm225_vm0, %v4203_v26  ;;  %v3829_v51 = vpop.permute.xlu0 %3828 }
 0x6b5   : > { %3495 = vst.msk [vmem:[#allocation3 + $0x78] sm:$0xff] %vm1558_vm8, %v3415_v7 }
 0x6b6   : > { %3894 = vst.msk [vmem:[#allocation3 + $0xf0] sm:$0xff] %vm1944_vm11, %v3829_v51 }
 0x6ba   : > { %v3447_v56 = vpop.permute.xlu1 %3446  ;;  %v4071_v5 = vpop.f32.mrf.mxu1 }
 0x6bb   : > { %3511 = vst.msk [vmem:[#allocation3 + $0xf8] sm:$0xff] %vm1558_vm8, %v3447_v56  ;;  %v4072_v0 = vadd.f32 %v6578_v23, %v4071_v5  ;;  %v4178_v56 = vld [vmem:[%s4480_s23 + $0xe8] sm:$0xff] }
 0x6bc   : > { %v3605_v49 = vpop.permute.xlu0 %3604 }
 0x6bd   : > { %v4187_v30 = vadd.f32 %v4155_v36, %v4072_v0  ;;  %3686 = vst.msk [vmem:[#allocation3 + $0x70] sm:$0xff] %vm1751_vm9, %v3605_v49  ;;  %v3926_v3 = vld [vmem:[#allocation3 + $0xf0] sm:$0xff]  ;;  %v4162_v49 = vld [vmem:[%s4480_s23 + $0x68] sm:$0xff] }
 0x6be   : > { %3878 = vst.msk [vmem:[#allocation3 + $0x70] sm:$0xff] %vm1944_vm11, %v3797_v48  ;;  %4373 = vmatmul.msk.f32.gmra.mxu3 %vm2018_vm12, %v3926_v3  ;;  %v4160_v48 = vld [vmem:[%s4480_s23 + $0x58] sm:$0xff] }
 0x6bf   : > { %4219 = vst.msk [vmem:[%s6592_s15 + $0x30] sm:$0xff] %vm225_vm0, %v4187_v30  ;;  %v4122_v40 = vpop.f32.mrf.mxu3 }
 0x6c0   : > { %v4123_v53 = vadd.f32 %v6578_v23, %v4122_v40 }
 0x6c2   : > { %v4204_v39 = vadd.f32 %v4172_v42, %v4123_v53  ;;  %v3831_v13 = vpop.permute.xlu1 %3830  ;;  %v4179_v42 = vld [vmem:[%s4480_s23 + $0xf0] sm:$0xff] }
 0x6c4   : > { %4236 = vst.msk [vmem:[%s6592_s15 + $0xb8] sm:$0xff] %vm225_vm0, %v4204_v39  ;;  %v3639_v52 = vpop.permute.xlu0 %3638 }
 0x6c5   : > { %3703 = vst.msk [vmem:[#allocation3 + $0xf8] sm:$0xff] %vm1751_vm9, %v3639_v52  ;;  %v3910_v32 = vld [vmem:[#allocation3 + $0x70] sm:$0xff] }
 0x6c6   : > { %3895 = vst.msk [vmem:[#allocation3 + $0xf8] sm:$0xff] %vm1944_vm11, %v3831_v13  ;;  %4357 = vmatmul.msk.f32.gmra.mxu1 %vm2018_vm12, %v3910_v32  ;;  %v4163_v13 = vld [vmem:[%s4480_s23 + $0x70] sm:$0xff] }
 0x6ca   : > { %v4074_v34 = vpop.f32.mrf.mxu1  ;;  %v3799_v2 = vpop.permute.xlu1 %3798 }
 0x6cb   : > { %v4075_v9 = vadd.f32 %v6578_v23, %v4074_v34 }
 0x6cc   : > { %v3607_v59 = vpop.permute.xlu0 %3606 }
 0x6cd   : > { %v4188_v37 = vadd.f32 %v4156_v50, %v4075_v9  ;;  %3687 = vst.msk [vmem:[#allocation3 + $0x78] sm:$0xff] %vm1751_vm9, %v3607_v59  ;;  %v3927_v58 = vld [vmem:[#allocation3 + $0xf8] sm:$0xff]  ;;  %v4180_v9 = vld [vmem:[%s4480_s23 + $0xf8] sm:$0xff] }
 0x6ce   : > { %3879 = vst.msk [vmem:[#allocation3 + $0x78] sm:$0xff] %vm1944_vm11, %v3799_v2  ;;  %4374 = vmatmul.msk.f32.gmra.mxu3 %vm2018_vm12, %v3927_v58 }
 0x6cf   : > { %4220 = vst.msk [vmem:[%s6592_s15 + $0x38] sm:$0xff] %vm225_vm0, %v4188_v37  ;;  %v4125_v6 = vpop.f32.mrf.mxu3  ;;  %v4164_v37 = vld [vmem:[%s4480_s23 + $0x78] sm:$0xff] }
 0x6d0   : > { %v4126_v54 = vadd.f32 %v6578_v23, %v4125_v6 }
 0x6d2   : > { %v4205_v46 = vadd.f32 %v4173_v22, %v4126_v54 }
 0x6d4   : > { %4237 = vst.msk [vmem:[%s6592_s15 + $0xc0] sm:$0xff] %vm225_vm0, %v4205_v46 }
 0x6d5   : > { %v3911_v31 = vld [vmem:[#allocation3 + $0x78] sm:$0xff] }
 0x6d6   : > { %4358 = vmatmul.msk.f32.gmra.mxu1 %vm2018_vm12, %v3911_v31 }
 0x6da   : > { %v4077_v16 = vpop.f32.mrf.mxu1 }
 0x6db   : > { %v4078_v63 = vadd.f32 %v6578_v23, %v4077_v16 }
 0x6dd   : > { %v4189_v4 = vadd.f32 %v4157_v35, %v4078_v63 }
 0x6df   : > { %4221 = vst.msk [vmem:[%s6592_s15 + $0x40] sm:$0xff] %vm225_vm0, %v4189_v4  ;;  %v4128_v12 = vpop.f32.mrf.mxu3 }
 0x6e0   : > { %v4129_v28 = vadd.f32 %v6578_v23, %v4128_v12 }
 0x6e2   : > { %v4206_v27 = vadd.f32 %v4174_v43, %v4129_v28 }
 0x6e4   : > { %4238 = vst.msk [vmem:[%s6592_s15 + $0xc8] sm:$0xff] %vm225_vm0, %v4206_v27 }
 0x6eb   : > { %v4080_v44 = vpop.f32.mrf.mxu1 }
 0x6ec   : > { %v4081_v14 = vadd.f32 %v6578_v23, %v4080_v44 }
 0x6ee   : > { %v4190_v17 = vadd.f32 %v4158_v41, %v4081_v14 }
 0x6f0   : > { %4222 = vst.msk [vmem:[%s6592_s15 + $0x48] sm:$0xff] %vm225_vm0, %v4190_v17  ;;  %v4131_v10 = vpop.f32.mrf.mxu3 }
 0x6f1   : > { %v4132_v15 = vadd.f32 %v6578_v23, %v4131_v10 }
 0x6f3   : > { %v4207_v24 = vadd.f32 %v4175_v8, %v4132_v15 }
 0x6f5   : > { %4239 = vst.msk [vmem:[%s6592_s15 + $0xd0] sm:$0xff] %vm225_vm0, %v4207_v24 }
 0x6f8   : > { %v4083_v55 = vpop.f32.mrf.mxu1 }
 0x6f9   : > { %v4084_v19 = vadd.f32 %v6578_v23, %v4083_v55 }
 0x6fb   : > { %v4191_v29 = vadd.f32 %v4159_v38, %v4084_v19 }
 0x6fd   : > { %4223 = vst.msk [vmem:[%s6592_s15 + $0x50] sm:$0xff] %vm225_vm0, %v4191_v29 }
 0x708   : > { %v4134_v11 = vpop.f32.mrf.mxu3 }
 0x709   : > { %v4135_v45 = vadd.f32 %v6578_v23, %v4134_v11 }
 0x70b   : > { %v4208_v33 = vadd.f32 %v4176_v62, %v4135_v45  ;;  %v4086_v20 = vpop.f32.mrf.mxu1 }
 0x70c   : > { %v4087_v61 = vadd.f32 %v6578_v23, %v4086_v20 }
 0x70d   : > { %4240 = vst.msk [vmem:[%s6592_s15 + $0xd8] sm:$0xff] %vm225_vm0, %v4208_v33 }
 0x70e   : > { %v4192_v18 = vadd.f32 %v4160_v48, %v4087_v61 }
 0x710   : > { %4224 = vst.msk [vmem:[%s6592_s15 + $0x58] sm:$0xff] %vm225_vm0, %v4192_v18 }
 0x719   : > { %v4137_v1 = vpop.f32.mrf.mxu3 }
 0x71a   : > { %v4138_v25 = vadd.f32 %v6578_v23, %v4137_v1 }
 0x71c   : > { %v4209_v47 = vadd.f32 %v4177_v57, %v4138_v25 }
 0x71e   : > { %4241 = vst.msk [vmem:[%s6592_s15 + $0xe0] sm:$0xff] %vm225_vm0, %v4209_v47 }
 0x722   : > { %v4089_v26 = vpop.f32.mrf.mxu1 }
 0x723   : > { %v4090_v21 = vadd.f32 %v6578_v23, %v4089_v26 }
 0x725   : > { %v4193_v7 = vadd.f32 %v4161_v60, %v4090_v21 }
 0x727   : > { %4225 = vst.msk [vmem:[%s6592_s15 + $0x60] sm:$0xff] %vm225_vm0, %v4193_v7  ;;  %v4140_v51 = vpop.f32.mrf.mxu3 }
 0x728   : > { %v4141_v5 = vadd.f32 %v6578_v23, %v4140_v51 }
 0x72a   : > { %v4210_v36 = vadd.f32 %v4178_v56, %v4141_v5 }
 0x72c   : > { %4242 = vst.msk [vmem:[%s6592_s15 + $0xe8] sm:$0xff] %vm225_vm0, %v4210_v36 }
 0x730   : > { %v4092_v0 = vpop.f32.mrf.mxu1 }
 0x731   : > { %v4093_v30 = vadd.f32 %v6578_v23, %v4092_v0 }
 0x733   : > { %v4194_v3 = vadd.f32 %v4162_v49, %v4093_v30 }
 0x735   : > { %4226 = vst.msk [vmem:[%s6592_s15 + $0x68] sm:$0xff] %vm225_vm0, %v4194_v3 }
 0x741   : > { %v4143_v40 = vpop.f32.mrf.mxu3 }
 0x742   : > { %v4144_v53 = vadd.f32 %v6578_v23, %v4143_v40 }
 0x743   : > { %v4095_v39 = vpop.f32.mrf.mxu1 }
 0x744   : > { %v4211_v52 = vadd.f32 %v4179_v42, %v4144_v53  ;;  %v4096_v32 = vadd.f32 %v6578_v23, %v4095_v39 }
 0x746   : > { %4243 = vst.msk [vmem:[%s6592_s15 + $0xf0] sm:$0xff] %vm225_vm0, %v4211_v52  ;;  %v4195_v34 = vadd.f32 %v4163_v13, %v4096_v32 }
 0x748   : > { %4227 = vst.msk [vmem:[%s6592_s15 + $0x70] sm:$0xff] %vm225_vm0, %v4195_v34 }
 0x751   : > { %v4146_v50 = vpop.f32.mrf.mxu3 }
 0x752   : > { %v4147_v59 = vadd.f32 %v6578_v23, %v4146_v50 }
 0x753   : > { %v4098_v2 = vpop.f32.mrf.mxu1 }
 0x754   : > { %v4212_v58 = vadd.f32 %v4180_v9, %v4147_v59  ;;  %v4099_v6 = vadd.f32 %v6578_v23, %v4098_v2 }
 0x756   : > { %4244 = vst.msk [vmem:[%s6592_s15 + $0xf8] sm:$0xff] %vm225_vm0, %v4212_v58  ;;  %v4196_v22 = vadd.f32 %v4164_v37, %v4099_v6 }
 0x758   : > { %4228 = vst.msk [vmem:[%s6592_s15 + $0x78] sm:$0xff] %vm225_vm0, %v4196_v22 }
 0x759 PF: > { %s15_s18 = sadd.s32 1, %s4414_s18  }
 0x75a   : > { %p12_p4 = scmp.ge.s32.totalorder %s15_s18, 4  }
 0x75c   :  { %14 = sbr.rel (!%p12_p4) target bundleno = 1 (0x1), region = 73 }

</bundles_post_ra>
